<compile_context>
chip_gen: v6e
topology: v6e:2x2x1
jax: 0.10.0
libtpu: 0.0.40
codegen_flags: <defaults>
</compile_context>

<pallas_src>
import functools

import jax
import jax.numpy as jnp
from jax.experimental import pallas as pl
from jax.experimental.pallas import tpu as pltpu

LN_EPS = 1e-5


# --------------------------------------------------------------------------- kernels
def _mlplayer_fused_kernel(x_ref, gamma_ref, beta_ref, w1_ref, b1_ref, w2_ref, b2_ref,
                           out_ref, *, add_pre_layer_norm):
    """Single pass per row tile; all weights resident in VMEM."""
    xin = x_ref[...].astype(jnp.float32)                       # (tm, D)

    if add_pre_layer_norm:
        gamma = gamma_ref[...].astype(jnp.float32)              # (1, D)
        beta = beta_ref[...].astype(jnp.float32)
        mean = jnp.mean(xin, axis=-1, keepdims=True)
        xc = xin - mean
        var = jnp.mean(xc * xc, axis=-1, keepdims=True)
        h = xc * jax.lax.rsqrt(var + LN_EPS) * gamma + beta
    else:
        h = xin

    # fc1 + quick_gelu.  Cast the activation tile to the weights' native dtype (bf16
    # on real models) so the MXU runs its fast path; accumulate in f32.
    h1 = jnp.dot(h.astype(w1_ref.dtype), w1_ref[...],
                 preferred_element_type=jnp.float32)
    h1 = h1 + b1_ref[...].astype(jnp.float32)
    h1 = h1 * jax.nn.sigmoid(1.702 * h1)                        # quick_gelu (EUP)

    # fc2 + residual.  Re-read x_ref so the earlier f32 copy is dead across the matmuls.
    h2 = jnp.dot(h1.astype(w2_ref.dtype), w2_ref[...],
                 preferred_element_type=jnp.float32)
    out = h2 + b2_ref[...].astype(jnp.float32) + x_ref[...].astype(jnp.float32)
    out_ref[...] = out.astype(out_ref.dtype)


def _mlplayer_htiled_kernel(x_ref, gamma_ref, beta_ref, w1_ref, b1_ref, w2_ref, b2_ref,
                            out_ref, ln_ref, acc_ref, *, add_pre_layer_norm):
    """H-tiled path: grid=(rows, H//th); fc2 output accumulated in f32 scratch."""
    k = pl.program_id(1)

    @pl.when(k == 0)
    def _():
        x = x_ref[...].astype(jnp.float32)
        if add_pre_layer_norm:
            mean = jnp.mean(x, axis=-1, keepdims=True)
            xc = x - mean
            var = jnp.mean(xc * xc, axis=-1, keepdims=True)
            h = (xc * jax.lax.rsqrt(var + LN_EPS)
                 * gamma_ref[...].astype(jnp.float32)
                 + beta_ref[...].astype(jnp.float32))
        else:
            h = x
        ln_ref[...] = h.astype(ln_ref.dtype)        # stored in the weights' MXU dtype
        acc_ref[...] = jnp.zeros_like(acc_ref)

    h1 = jnp.dot(ln_ref[...], w1_ref[...], preferred_element_type=jnp.float32)
    h1 = h1 + b1_ref[...].astype(jnp.float32)
    h1 = h1 * jax.nn.sigmoid(1.702 * h1)                         # quick_gelu
    acc_ref[...] += jnp.dot(h1.astype(w2_ref.dtype), w2_ref[...],
                            preferred_element_type=jnp.float32)

    @pl.when(k == pl.num_programs(1) - 1)
    def _():
        out = (acc_ref[...] + b2_ref[...].astype(jnp.float32)
               + x_ref[...].astype(jnp.float32))                 # residual
        out_ref[...] = out.astype(out_ref.dtype)


# --------------------------------------------------------------------------- helpers
def _round_up(a, b):
    return pl.cdiv(a, b) * b


def _device_kind():
    try:
        return jax.devices()[0].device_kind.lower()
    except Exception:
        return ""


def _tpu_vmem_budget_bytes():
    cap = None
    try:
        cap = int(pltpu.get_tpu_info().vmem_capacity_bytes)
    except Exception:
        cap = None
    if cap is None:
        cap = (64 << 20) if "v7" in _device_kind() else (128 << 20)
    return max(32 << 20, cap - (16 << 20))       # headroom for Mosaic internal scratch


def _choose_th(D, H, tm, w_itemsize, x_itemsize, budget):
    """Return H (fused, weights resident) or a 128-multiple divisor of H (tiled)."""
    fused_bytes = ((2 * D * H + 3 * D + H) * w_itemsize          # single-buffered weights
                   + 2 * 2 * tm * D * x_itemsize                 # x/out double-buffered
                   + 4 * tm * (D + H))                           # f32 intermediates
    if H % 128 != 0 or fused_bytes <= 0.7 * budget:
        return H
    for th in sorted((c for c in range(128, H + 1, 128) if H % c == 0), reverse=True):
        tiled_bytes = ((2 * 2 * D * th + 2 * th + 3 * D) * w_itemsize  # w1/w2/b1 tiles 2x buf
                       + tm * D * w_itemsize + tm * D * 4               # LN scratch + f32 acc
                       + 2 * 2 * tm * D * x_itemsize
                       + 4 * tm * (D + th))
        if tiled_bytes <= 0.7 * budget:
            return th
    return 128


# --------------------------------------------------------------------------- wrapper
def mlplayer_forward(x, params, *, add_pre_layer_norm=True, add_post_layer_norm=False,
                     tm=None, th=None):
    """out = fc2(quick_gelu(fc1(LN(x)))) + x, x: [batch, feature_dim]."""
    if add_post_layer_norm:
        # TODO(synk): post_layer_norm needs its own learnable gamma/beta (separate from
        # the pre-LN params); module default is False, so error rather than silently
        # normalizing without an affine.
        raise NotImplementedError("add_post_layer_norm=True is not supported")

    N, D = x.shape
    H = params["w1"].shape[1]
    assert params["w2"].shape == (H, D)          # module asserts feature_dim == output_dim

    is_v7x = "v7" in _device_kind()
    vmem_budget = _tpu_vmem_budget_bytes()

    # Row tile: generation default, clamped to the sublane-rounded batch; on v7x make
    # sure the (parallel) row grid has >= 2 steps so both TensorCores get work.
    if tm is None:
        tm = 256 if is_v7x else 512
    n8 = _round_up(N, 8)
    tm = max(8, min(_round_up(tm, 8), n8))
    if is_v7x and N > 8 and pl.cdiv(N, tm) < 2:
        tm = max(8, _round_up(pl.cdiv(N, 2), 8))
    grid_m = pl.cdiv(N, tm)                      # partial last block: masked stores

    w_itemsize = params["w1"].dtype.itemsize
    x_itemsize = x.dtype.itemsize
    if th is None:
        th = _choose_th(D, H, tm, w_itemsize, x_itemsize, vmem_budget)
    assert H % th == 0 and (th == H or th % 128 == 0)

    w_bytes = int(sum(int(a.size) * a.dtype.itemsize
                      for a in (params["w1"], params["w2"], params["b1"],
                                params["b2"], params["gamma"], params["beta"])))
    cost = pl.CostEstimate(flops=4 * N * D * H,
                           transcendentals=N * H,
                           bytes_accessed=int(2 * N * D * x_itemsize) + w_bytes)
    compiler_params = pltpu.CompilerParams(
        dimension_semantics=("parallel",) if th == H else ("parallel", "arbitrary"),
        vmem_limit_bytes=int(vmem_budget))
    out_shape = jax.ShapeDtypeStruct((N, D), x.dtype)

    def run(single_buffer_consts):
        def const(shape, index_map):
            if single_buffer_consts:
                return pl.BlockSpec(shape, index_map, pipeline_mode=pl.Buffered(1))
            return pl.BlockSpec(shape, index_map)

        if th == H:
            # Fused path: all weights resident, one pass per row tile.
            kernel = functools.partial(_mlplayer_fused_kernel,
                                       add_pre_layer_norm=add_pre_layer_norm)
            row = pl.BlockSpec((tm, D), lambda i: (i, 0))
            grid_spec = pltpu.PrefetchScalarGridSpec(
                num_scalar_prefetch=0, grid=(grid_m,),
                in_specs=[row,
                          const((1, D), lambda i: (0, 0)),     # ln gamma
                          const((1, D), lambda i: (0, 0)),     # ln beta
                          const((D, H), lambda i: (0, 0)),     # w1 (in x out)
                          const((1, H), lambda i: (0, 0)),     # b1
                          const((H, D), lambda i: (0, 0)),     # w2 (in x out)
                          const((1, D), lambda i: (0, 0))],    # b2
                out_specs=row)
        else:
            # H-tiled accumulator path (weights too large to stay resident, e.g. v7x).
            kernel = functools.partial(_mlplayer_htiled_kernel,
                                       add_pre_layer_norm=add_pre_layer_norm)
            row = pl.BlockSpec((tm, D), lambda i, k: (i, 0))
            grid_spec = pltpu.PrefetchScalarGridSpec(
                num_scalar_prefetch=0, grid=(grid_m, H // th),
                in_specs=[row,
                          const((1, D), lambda i, k: (0, 0)),          # ln gamma
                          const((1, D), lambda i, k: (0, 0)),          # ln beta
                          pl.BlockSpec((D, th), lambda i, k: (0, k)),  # w1 tile
                          pl.BlockSpec((1, th), lambda i, k: (0, k)),  # b1 tile
                          pl.BlockSpec((th, D), lambda i, k: (k, 0)),  # w2 tile
                          const((1, D), lambda i, k: (0, 0))],         # b2
                out_specs=row,
                scratch_shapes=[pltpu.VMEM((tm, D), params["w1"].dtype),  # LN(x)
                                pltpu.VMEM((tm, D), jnp.float32)])        # fc2 accumulator
        return pl.pallas_call(kernel, out_shape=out_shape, grid_spec=grid_spec,
                              compiler_params=compiler_params, cost_estimate=cost)(
            x, params["gamma"], params["beta"], params["w1"], params["b1"],
            params["w2"], params["b2"])

    try:
        return run(True)
    except Exception:
        # pipeline_mode=pl.Buffered(1) may not be supported by every jax release;
        # retry with default double-buffering (only costs extra VMEM).
        return run(False)


# --------------------------------------------------------------------------- params / ref
def init_params(key, feature_dim, downscale_dim, dtype=jnp.float32):
    """Weights stored pre-transposed (in x out). Pass dtype=jnp.bfloat16 for the fast
    MXU path and half the resident VMEM at real model sizes."""
    k1, k2 = jax.random.split(key)
    w1 = (0.02 * jax.random.normal(k1, (downscale_dim, feature_dim), jnp.float32)).T
    w2 = (0.02 * jax.random.normal(k2, (feature_dim, downscale_dim), jnp.float32)).T
    return {
        "w1": jnp.asarray(w1, dtype),
        "b1": jnp.zeros((1, downscale_dim), dtype),
        "w2": jnp.asarray(w2, dtype),
        "b2": jnp.zeros((1, feature_dim), dtype),
        "gamma": jnp.ones((1, feature_dim), dtype),
        "beta": jnp.zeros((1, feature_dim), dtype),
    }


def mlplayer_ref(x, params):
    x32 = x.astype(jnp.float32)
    mean = jnp.mean(x32, axis=-1, keepdims=True)
    var = jnp.mean((x32 - mean) ** 2, axis=-1, keepdims=True)
    h = ((x32 - mean) * jax.lax.rsqrt(var + LN_EPS)
         * params["gamma"].astype(jnp.float32) + params["beta"].astype(jnp.float32))
    h1 = jnp.dot(h, params["w1"].astype(jnp.float32),
                 preferred_element_type=jnp.float32) + params["b1"].astype(jnp.float32)
    h1 = h1 * jax.nn.sigmoid(1.702 * h1)
    h2 = jnp.dot(h1, params["w2"].astype(jnp.float32),
                 preferred_element_type=jnp.float32) + params["b2"].astype(jnp.float32)
    return (h2 + x32).astype(x.dtype)


# --------------------------------------------------------------------------- demo
if __name__ == "__main__":
    # Lane-dense feature/downscale dims (multiples of 128); batch 200 is NOT a multiple
    # of the row tile -> exercises the partial last block (padded reads, masked stores).
    feature_dim, downscale_dim, output_dim = 256, 256, 256     # feature_dim == output_dim
    N = 200

    key = jax.random.PRNGKey(0)
    kx, kp = jax.random.split(key)
    x = jax.random.normal(kx, (N, feature_dim), jnp.float32)
    params = init_params(kp, feature_dim, downscale_dim, dtype=jnp.float32)

    ref = mlplayer_ref(x, params)

    # Fused (weights fully VMEM-resident) path, 2-step row grid.
    out = jax.block_until_ready(mlplayer_forward(x, params, tm=128))
    assert out.shape == (N, output_dim)
    assert jnp.allclose(out, ref, atol=1e-4, rtol=1e-4), float(jnp.max(jnp.abs(out - ref)))

    # Force the H-tiled accumulator path (used when weights don't fit VMEM, e.g. v7x).
    out_t = jax.block_until_ready(mlplayer_forward(x, params, tm=128, th=128))
    assert jnp.allclose(out_t, ref, atol=1e-4, rtol=1e-4), float(jnp.max(jnp.abs(out_t - ref)))

    print("KERNEL_OK")
</pallas_src>

<mosaic_0001>
module attributes {stable_mosaic.version = 11 : i64} {
  func.func @_mlplayer_fused_kernel(%arg0: i32, %arg1: memref<128x256xf32, #tpu.memory_space<vmem>>, %arg2: memref<1x256xf32, #tpu.memory_space<vmem>>, %arg3: memref<1x256xf32, #tpu.memory_space<vmem>>, %arg4: memref<256x256xf32, #tpu.memory_space<vmem>>, %arg5: memref<1x256xf32, #tpu.memory_space<vmem>>, %arg6: memref<256x256xf32, #tpu.memory_space<vmem>>, %arg7: memref<1x256xf32, #tpu.memory_space<vmem>>, %arg8: memref<128x256xf32, #tpu.memory_space<vmem>>) attributes {dimension_semantics = [#tpu.dimension_semantics<parallel>], iteration_bounds = array<i64: 2>, scalar_prefetch = 0 : i64, scratch_operands = 0 : i64, tpu.core_type = #tpu.core_type<tc>, window_params = [{transform_indices = @transform_0, window_bounds = array<i64: 128, 256>}, {pipeline_mode = #tpu.pipeline_mode<synchronous>, transform_indices = @transform_1, window_bounds = array<i64: 1, 256>}, {pipeline_mode = #tpu.pipeline_mode<synchronous>, transform_indices = @transform_2, window_bounds = array<i64: 1, 256>}, {pipeline_mode = #tpu.pipeline_mode<synchronous>, transform_indices = @transform_3, window_bounds = array<i64: 256, 256>}, {pipeline_mode = #tpu.pipeline_mode<synchronous>, transform_indices = @transform_4, window_bounds = array<i64: 1, 256>}, {pipeline_mode = #tpu.pipeline_mode<synchronous>, transform_indices = @transform_5, window_bounds = array<i64: 256, 256>}, {pipeline_mode = #tpu.pipeline_mode<synchronous>, transform_indices = @transform_6, window_bounds = array<i64: 1, 256>}, {transform_indices = @transform_7, window_bounds = array<i64: 128, 256>}]} {
    %c0 = arith.constant 0 : index
    %c0_0 = arith.constant 0 : index
    %0 = vector.load %arg1[%c0, %c0_0] : memref<128x256xf32, #tpu.memory_space<vmem>>, vector<128x256xf32>
    %c0_1 = arith.constant 0 : index
    %c0_2 = arith.constant 0 : index
    %1 = vector.load %arg2[%c0_1, %c0_2] : memref<1x256xf32, #tpu.memory_space<vmem>>, vector<1x256xf32>
    %c0_3 = arith.constant 0 : index
    %c0_4 = arith.constant 0 : index
    %2 = vector.load %arg3[%c0_3, %c0_4] : memref<1x256xf32, #tpu.memory_space<vmem>>, vector<1x256xf32>
    %cst = arith.constant dense<0.000000e+00> : vector<128xf32>
    %3 = vector.multi_reduction <add>, %0, %cst [1] : vector<128x256xf32> to vector<128xf32>
    %4 = vector.shape_cast %3 : vector<128xf32> to vector<128x1xf32>
    %cst_5 = arith.constant 2.560000e+02 : f32
    %5 = vector.broadcast %cst_5 : f32 to vector<128x1xf32>
    %6 = arith.divf %4, %5 : vector<128x1xf32>
    %7 = vector.broadcast %6 : vector<128x1xf32> to vector<128x256xf32>
    %8 = arith.subf %0, %7 : vector<128x256xf32>
    %9 = arith.mulf %8, %8 : vector<128x256xf32>
    %cst_6 = arith.constant dense<0.000000e+00> : vector<128xf32>
    %10 = vector.multi_reduction <add>, %9, %cst_6 [1] : vector<128x256xf32> to vector<128xf32>
    %11 = vector.shape_cast %10 : vector<128xf32> to vector<128x1xf32>
    %cst_7 = arith.constant 2.560000e+02 : f32
    %12 = vector.broadcast %cst_7 : f32 to vector<128x1xf32>
    %13 = arith.divf %11, %12 : vector<128x1xf32>
    %cst_8 = arith.constant 9.99999974E-6 : f32
    %14 = vector.broadcast %cst_8 : f32 to vector<128x1xf32>
    %15 = arith.addf %13, %14 : vector<128x1xf32>
    %16 = math.rsqrt %15 : vector<128x1xf32>
    %17 = vector.broadcast %16 : vector<128x1xf32> to vector<128x256xf32>
    %18 = arith.mulf %8, %17 : vector<128x256xf32>
    %19 = vector.broadcast %1 : vector<1x256xf32> to vector<128x256xf32>
    %20 = arith.mulf %18, %19 : vector<128x256xf32>
    %21 = vector.broadcast %2 : vector<1x256xf32> to vector<128x256xf32>
    %22 = arith.addf %20, %21 : vector<128x256xf32>
    %c0_9 = arith.constant 0 : index
    %c0_10 = arith.constant 0 : index
    %23 = vector.load %arg4[%c0_9, %c0_10] : memref<256x256xf32, #tpu.memory_space<vmem>>, vector<256x256xf32>
    %cst_11 = arith.constant dense<0.000000e+00> : vector<128x256xf32>
    %24 = tpu.matmul %22, %23, %cst_11 {dimension_numbers = #tpu.dot_dimension_numbers<[1], [0], [0], [1], [0, 0, 1, 1], [], []>} : vector<128x256xf32>, vector<256x256xf32>, vector<128x256xf32> -> vector<128x256xf32>
    %c0_12 = arith.constant 0 : index
    %c0_13 = arith.constant 0 : index
    %25 = vector.load %arg5[%c0_12, %c0_13] : memref<1x256xf32, #tpu.memory_space<vmem>>, vector<1x256xf32>
    %26 = vector.broadcast %25 : vector<1x256xf32> to vector<128x256xf32>
    %27 = arith.addf %24, %26 : vector<128x256xf32>
    %cst_14 = arith.constant 1.702000e+00 : f32
    %28 = vector.broadcast %cst_14 : f32 to vector<128x256xf32>
    %29 = arith.mulf %28, %27 : vector<128x256xf32>
    %30 = arith.negf %29 : vector<128x256xf32>
    %31 = math.exp %30 : vector<128x256xf32>
    %cst_15 = arith.constant 1.000000e+00 : f32
    %32 = vector.broadcast %cst_15 : f32 to vector<128x256xf32>
    %33 = arith.addf %32, %31 : vector<128x256xf32>
    %34 = arith.divf %32, %33 : vector<128x256xf32>
    %35 = arith.mulf %27, %34 : vector<128x256xf32>
    %c0_16 = arith.constant 0 : index
    %c0_17 = arith.constant 0 : index
    %36 = vector.load %arg6[%c0_16, %c0_17] : memref<256x256xf32, #tpu.memory_space<vmem>>, vector<256x256xf32>
    %cst_18 = arith.constant dense<0.000000e+00> : vector<128x256xf32>
    %37 = tpu.matmul %35, %36, %cst_18 {dimension_numbers = #tpu.dot_dimension_numbers<[1], [0], [0], [1], [0, 0, 1, 1], [], []>} : vector<128x256xf32>, vector<256x256xf32>, vector<128x256xf32> -> vector<128x256xf32>
    %c0_19 = arith.constant 0 : index
    %c0_20 = arith.constant 0 : index
    %38 = vector.load %arg7[%c0_19, %c0_20] : memref<1x256xf32, #tpu.memory_space<vmem>>, vector<1x256xf32>
    %39 = vector.broadcast %38 : vector<1x256xf32> to vector<128x256xf32>
    %40 = arith.addf %37, %39 : vector<128x256xf32>
    %c0_21 = arith.constant 0 : index
    %c0_22 = arith.constant 0 : index
    %41 = vector.load %arg1[%c0_21, %c0_22] : memref<128x256xf32, #tpu.memory_space<vmem>>, vector<128x256xf32>
    %42 = arith.addf %40, %41 : vector<128x256xf32>
    %c0_23 = arith.constant 0 : index
    %c0_24 = arith.constant 0 : index
    %43 = vector.load %arg8[%c0_23, %c0_24] : memref<128x256xf32, #tpu.memory_space<vmem>>, vector<128x256xf32>
    tpu.vector_store %arg8[%c0_23, %c0_24], %42 {strides = array<i32>} : memref<128x256xf32, #tpu.memory_space<vmem>>, vector<128x256xf32>,
    return
  }
  func.func @transform_0(%arg0: i32) -> (i32, i32) {
    %c0_i32 = arith.constant 0 : i32
    %c0_i32_0 = arith.constant 0 : i32
    return %arg0, %c0_i32 : i32, i32
  }
  func.func @transform_1(%arg0: i32) -> (i32, i32) {
    %c0_i32 = arith.constant 0 : i32
    %c0_i32_0 = arith.constant 0 : i32
    %c0_i32_1 = arith.constant 0 : i32
    return %c0_i32, %c0_i32_0 : i32, i32
  }
  func.func @transform_2(%arg0: i32) -> (i32, i32) {
    %c0_i32 = arith.constant 0 : i32
    %c0_i32_0 = arith.constant 0 : i32
    %c0_i32_1 = arith.constant 0 : i32
    return %c0_i32, %c0_i32_0 : i32, i32
  }
  func.func @transform_3(%arg0: i32) -> (i32, i32) {
    %c0_i32 = arith.constant 0 : i32
    %c0_i32_0 = arith.constant 0 : i32
    %c0_i32_1 = arith.constant 0 : i32
    return %c0_i32, %c0_i32_0 : i32, i32
  }
  func.func @transform_4(%arg0: i32) -> (i32, i32) {
    %c0_i32 = arith.constant 0 : i32
    %c0_i32_0 = arith.constant 0 : i32
    %c0_i32_1 = arith.constant 0 : i32
    return %c0_i32, %c0_i32_0 : i32, i32
  }
  func.func @transform_5(%arg0: i32) -> (i32, i32) {
    %c0_i32 = arith.constant 0 : i32
    %c0_i32_0 = arith.constant 0 : i32
    %c0_i32_1 = arith.constant 0 : i32
    return %c0_i32, %c0_i32_0 : i32, i32
  }
  func.func @transform_6(%arg0: i32) -> (i32, i32) {
    %c0_i32 = arith.constant 0 : i32
    %c0_i32_0 = arith.constant 0 : i32
    %c0_i32_1 = arith.constant 0 : i32
    return %c0_i32, %c0_i32_0 : i32, i32
  }
  func.func @transform_7(%arg0: i32) -> (i32, i32) {
    %c0_i32 = arith.constant 0 : i32
    %c0_i32_0 = arith.constant 0 : i32
    return %arg0, %c0_i32 : i32, i32
  }
}

module attributes {stable_mosaic.version = 11 : i64} {
  func.func @_mlplayer_fused_kernel(%arg0: i32, %arg1: memref<128x256xf32, #tpu.memory_space<vmem>>, %arg2: memref<1x256xf32, #tpu.memory_space<vmem>>, %arg3: memref<1x256xf32, #tpu.memory_space<vmem>>, %arg4: memref<256x256xf32, #tpu.memory_space<vmem>>, %arg5: memref<1x256xf32, #tpu.memory_space<vmem>>, %arg6: memref<256x256xf32, #tpu.memory_space<vmem>>, %arg7: memref<1x256xf32, #tpu.memory_space<vmem>>, %arg8: memref<128x256xf32, #tpu.memory_space<vmem>>) attributes {dimension_semantics = [#tpu.dimension_semantics<parallel>], iteration_bounds = array<i64: 2>, scalar_prefetch = 0 : i64, scratch_operands = 0 : i64, tpu.core_type = #tpu.core_type<tc>, window_params = [{transform_indices = @transform_0, window_bounds = array<i64: 128, 256>}, {pipeline_mode = #tpu.pipeline_mode<synchronous>, transform_indices = @transform_1, window_bounds = array<i64: 1, 256>}, {pipeline_mode = #tpu.pipeline_mode<synchronous>, transform_indices = @transform_2, window_bounds = array<i64: 1, 256>}, {pipeline_mode = #tpu.pipeline_mode<synchronous>, transform_indices = @transform_3, window_bounds = array<i64: 256, 256>}, {pipeline_mode = #tpu.pipeline_mode<synchronous>, transform_indices = @transform_4, window_bounds = array<i64: 1, 256>}, {pipeline_mode = #tpu.pipeline_mode<synchronous>, transform_indices = @transform_5, window_bounds = array<i64: 256, 256>}, {pipeline_mode = #tpu.pipeline_mode<synchronous>, transform_indices = @transform_6, window_bounds = array<i64: 1, 256>}, {transform_indices = @transform_7, window_bounds = array<i64: 128, 256>}]} {
    %c0 = arith.constant 0 : index
    %c0_0 = arith.constant 0 : index
    %0 = vector.load %arg1[%c0, %c0_0] : memref<128x256xf32, #tpu.memory_space<vmem>>, vector<128x256xf32>
    %c0_1 = arith.constant 0 : index
    %c0_2 = arith.constant 0 : index
    %1 = vector.load %arg2[%c0_1, %c0_2] : memref<1x256xf32, #tpu.memory_space<vmem>>, vector<1x256xf32>
    %c0_3 = arith.constant 0 : index
    %c0_4 = arith.constant 0 : index
    %2 = vector.load %arg3[%c0_3, %c0_4] : memref<1x256xf32, #tpu.memory_space<vmem>>, vector<1x256xf32>
    %cst = arith.constant dense<0.000000e+00> : vector<128xf32>
    %3 = vector.multi_reduction <add>, %0, %cst [1] : vector<128x256xf32> to vector<128xf32>
    %4 = vector.shape_cast %3 : vector<128xf32> to vector<128x1xf32>
    %cst_5 = arith.constant 2.560000e+02 : f32
    %5 = vector.broadcast %cst_5 : f32 to vector<128x1xf32>
    %6 = arith.divf %4, %5 : vector<128x1xf32>
    %7 = vector.broadcast %6 : vector<128x1xf32> to vector<128x256xf32>
    %8 = arith.subf %0, %7 : vector<128x256xf32>
    %9 = arith.mulf %8, %8 : vector<128x256xf32>
    %cst_6 = arith.constant dense<0.000000e+00> : vector<128xf32>
    %10 = vector.multi_reduction <add>, %9, %cst_6 [1] : vector<128x256xf32> to vector<128xf32>
    %11 = vector.shape_cast %10 : vector<128xf32> to vector<128x1xf32>
    %cst_7 = arith.constant 2.560000e+02 : f32
    %12 = vector.broadcast %cst_7 : f32 to vector<128x1xf32>
    %13 = arith.divf %11, %12 : vector<128x1xf32>
    %cst_8 = arith.constant 9.99999974E-6 : f32
    %14 = vector.broadcast %cst_8 : f32 to vector<128x1xf32>
    %15 = arith.addf %13, %14 : vector<128x1xf32>
    %16 = math.rsqrt %15 : vector<128x1xf32>
    %17 = vector.broadcast %16 : vector<128x1xf32> to vector<128x256xf32>
    %18 = arith.mulf %8, %17 : vector<128x256xf32>
    %19 = vector.broadcast %1 : vector<1x256xf32> to vector<128x256xf32>
    %20 = arith.mulf %18, %19 : vector<128x256xf32>
    %21 = vector.broadcast %2 : vector<1x256xf32> to vector<128x256xf32>
    %22 = arith.addf %20, %21 : vector<128x256xf32>
    %c0_9 = arith.constant 0 : index
    %c0_10 = arith.constant 0 : index
    %23 = vector.load %arg4[%c0_9, %c0_10] : memref<256x256xf32, #tpu.memory_space<vmem>>, vector<256x256xf32>
    %cst_11 = arith.constant dense<0.000000e+00> : vector<128x256xf32>
    %24 = tpu.matmul %22, %23, %cst_11 {dimension_numbers = #tpu.dot_dimension_numbers<[1], [0], [0], [1], [0, 0, 1, 1], [], []>} : vector<128x256xf32>, vector<256x256xf32>, vector<128x256xf32> -> vector<128x256xf32>
    %c0_12 = arith.constant 0 : index
    %c0_13 = arith.constant 0 : index
    %25 = vector.load %arg5[%c0_12, %c0_13] : memref<1x256xf32, #tpu.memory_space<vmem>>, vector<1x256xf32>
    %26 = vector.broadcast %25 : vector<1x256xf32> to vector<128x256xf32>
    %27 = arith.addf %24, %26 : vector<128x256xf32>
    %cst_14 = arith.constant 1.702000e+00 : f32
    %28 = vector.broadcast %cst_14 : f32 to vector<128x256xf32>
    %29 = arith.mulf %28, %27 : vector<128x256xf32>
    %30 = arith.negf %29 : vector<128x256xf32>
    %31 = math.exp %30 : vector<128x256xf32>
    %cst_15 = arith.constant 1.000000e+00 : f32
    %32 = vector.broadcast %cst_15 : f32 to vector<128x256xf32>
    %33 = arith.addf %32, %31 : vector<128x256xf32>
    %34 = arith.divf %32, %33 : vector<128x256xf32>
    %35 = arith.mulf %27, %34 : vector<128x256xf32>
    %c0_16 = arith.constant 0 : index
    %c0_17 = arith.constant 0 : index
    %36 = vector.load %arg6[%c0_16, %c0_17] : memref<256x256xf32, #tpu.memory_space<vmem>>, vector<256x256xf32>
    %cst_18 = arith.constant dense<0.000000e+00> : vector<128x256xf32>
    %37 = tpu.matmul %35, %36, %cst_18 {dimension_numbers = #tpu.dot_dimension_numbers<[1], [0], [0], [1], [0, 0, 1, 1], [], []>} : vector<128x256xf32>, vector<256x256xf32>, vector<128x256xf32> -> vector<128x256xf32>
    %c0_19 = arith.constant 0 : index
    %c0_20 = arith.constant 0 : index
    %38 = vector.load %arg7[%c0_19, %c0_20] : memref<1x256xf32, #tpu.memory_space<vmem>>, vector<1x256xf32>
    %39 = vector.broadcast %38 : vector<1x256xf32> to vector<128x256xf32>
    %40 = arith.addf %37, %39 : vector<128x256xf32>
    %c0_21 = arith.constant 0 : index
    %c0_22 = arith.constant 0 : index
    %41 = vector.load %arg1[%c0_21, %c0_22] : memref<128x256xf32, #tpu.memory_space<vmem>>, vector<128x256xf32>
    %42 = arith.addf %40, %41 : vector<128x256xf32>
    %c0_23 = arith.constant 0 : index
    %c0_24 = arith.constant 0 : index
    %43 = vector.load %arg8[%c0_23, %c0_24] : memref<128x256xf32, #tpu.memory_space<vmem>>, vector<128x256xf32>
    tpu.vector_store %arg8[%c0_23, %c0_24], %42 {strides = array<i32>} : memref<128x256xf32, #tpu.memory_space<vmem>>, vector<128x256xf32>,
    return
  }
  func.func @transform_0(%arg0: i32) -> (i32, i32) {
    %c0_i32 = arith.constant 0 : i32
    %c0_i32_0 = arith.constant 0 : i32
    return %arg0, %c0_i32 : i32, i32
  }
  func.func @transform_1(%arg0: i32) -> (i32, i32) {
    %c0_i32 = arith.constant 0 : i32
    %c0_i32_0 = arith.constant 0 : i32
    %c0_i32_1 = arith.constant 0 : i32
    return %c0_i32, %c0_i32_0 : i32, i32
  }
  func.func @transform_2(%arg0: i32) -> (i32, i32) {
    %c0_i32 = arith.constant 0 : i32
    %c0_i32_0 = arith.constant 0 : i32
    %c0_i32_1 = arith.constant 0 : i32
    return %c0_i32, %c0_i32_0 : i32, i32
  }
  func.func @transform_3(%arg0: i32) -> (i32, i32) {
    %c0_i32 = arith.constant 0 : i32
    %c0_i32_0 = arith.constant 0 : i32
    %c0_i32_1 = arith.constant 0 : i32
    return %c0_i32, %c0_i32_0 : i32, i32
  }
  func.func @transform_4(%arg0: i32) -> (i32, i32) {
    %c0_i32 = arith.constant 0 : i32
    %c0_i32_0 = arith.constant 0 : i32
    %c0_i32_1 = arith.constant 0 : i32
    return %c0_i32, %c0_i32_0 : i32, i32
  }
  func.func @transform_5(%arg0: i32) -> (i32, i32) {
    %c0_i32 = arith.constant 0 : i32
    %c0_i32_0 = arith.constant 0 : i32
    %c0_i32_1 = arith.constant 0 : i32
    return %c0_i32, %c0_i32_0 : i32, i32
  }
  func.func @transform_6(%arg0: i32) -> (i32, i32) {
    %c0_i32 = arith.constant 0 : i32
    %c0_i32_0 = arith.constant 0 : i32
    %c0_i32_1 = arith.constant 0 : i32
    return %c0_i32, %c0_i32_0 : i32, i32
  }
  func.func @transform_7(%arg0: i32) -> (i32, i32) {
    %c0_i32 = arith.constant 0 : i32
    %c0_i32_0 = arith.constant 0 : i32
    return %arg0, %c0_i32 : i32, i32
  }
}

</mosaic_0001>

<bundles_post_ra>
// kernel: tpu_custom_call.1
= control target key start
LH: loop header
LB: loop body
LE: loop exit
PB: predicated region body
PF: predicated region fallthrough
CT: control target
= control target key end

     0   :  { %s3131_s0 = inlined_call_operand.hbm [shape: f32[200,256], index: 0, kind: input, shape index: {}]   ;;  %s3132_s1 = inlined_call_operand.hbm [shape: f32[1,256], index: 1, kind: input, shape index: {}]   ;;  %s3133_s2 = inlined_call_operand.vmem [shape: f32[1,256], index: 2, kind: input, shape index: {}]   ;;  %s3134_s3 = inlined_call_operand.hbm [shape: f32[256,256], index: 3, kind: input, shape index: {}]   ;;  %s3135_s4 = inlined_call_operand.vmem [shape: f32[1,256], index: 4, kind: input, shape index: {}]   ;;  %s3136_s5 = inlined_call_operand.hbm [shape: f32[256,256], index: 5, kind: input, shape index: {}]   ;;  %s3137_s6 = inlined_call_operand.vmem [shape: f32[1,256], index: 6, kind: input, shape index: {}]   ;;  %s3138_s7 = inlined_call_operand.hbm [shape: f32[200,256], index: 7, kind: output, shape index: {}]  }
   0x1   :  { %3142 = sst [smem:[#allocation15_spill]] %s3132_s1 }
   0x2   :  { %3143 = sst [smem:[#allocation16_spill]] %s3134_s3 }
   0x3   :  { %12 = vsyncpa [#allocation3], 0 }
   0x4   :  { %14 = vsyncpa [#allocation3 + $0x1], 0 }
   0x5   :  { %15 = vsyncpa [#allocation6], 0 }
   0x6   :  { %16 = vsyncpa [#allocation9], 0 }
   0x7   :  { %17 = vsyncpa [#allocation4], 0 }
   0x8   :  { %19 = vsyncpa [#allocation4 + $0x1], 0  ;;  %s2221_s24 = smov 0   ;;  %s2223_s25 = smov 0  }
   0x9   :  { %s2225_s26 = smov 0   ;;  %s2227_s27 = smov 0  }
   0xa LB: > { %s2242_s28 = sadd.s32 4294967295, %s2168_s27   ;;  %s1654_s29 = sadd.s32 4294967294, %s2168_s27   ;;  %s2168_s27 = sphi %s2227_s27, %s3164_s27   ;;  %s2164_s26 = sphi %s2225_s26, %s3163_s26   ;;  %s2160_s25 = sphi %s2223_s25, %s3162_s25   ;;  %s2156_s24 = sphi %s2221_s24, %s3161_s24  }
   0xb   : > { %s2246_s30 = sadd.s32 1, %s2168_s27   ;;  %s32_s8 = sadd.s32 1, %s2164_s26 }
   0xc   : > { %s29_s9 = ssub.s32 %s2168_s27, %s2246_s30  ;;  %p39_p0 = scmp.ne.s32.totalorder %s2164_s26, %s2160_s25 }
   0xd   : > { %p30_p1 = scmp.eq.s32.totalorder %s29_s9, 0  ;;  %p40_p2 = scmp.eq.s32.totalorder %s2168_s27, 0 }
   0xe   : > { %p45_p3 = scmp.ne.s32.totalorder %s2160_s25, %s2156_s24  ;;  %p3139_p4 = scmp.eq.s32.totalorder %s2242_s28, 0 }
   0xf   : > { %s2258_s10 = scalar_select %p30_p1, %s2164_s26, %s32_s8  }
  0x10   : > { %p2260_p5 = por %p40_p2, %p39_p0  ;;  %p2266_p6 = por %p3139_p4, %p45_p3 }
  0x11   : > { %p195_p7 = scmp.eq.s32.totalorder %s2242_s28, 1  ;;  %p201_p8 = scmp.eq.s32.totalorder %s1654_s29, 1 }
  0x12   : > { %s3144_s11 = scalar_select %p2260_p5, 1, 0 }
  0x13   : > { %s3145_s12 = scalar_select %p2266_p6, 1, 0 }
  0x14   : > { %p1655_p9 = scmp.ge.s32.totalorder %s2168_s27, 1  ;;  %p208_p10 = scmp.lt.s32.totalorder %s2168_s27, 3 }
  0x15   : > { %p2273_p11 = por %p195_p7, %p39_p0  ;;  %p2277_p12 = por %p201_p8, %p45_p3 }
  0x16   : > { %p2281_p13 = pnand %p1655_p9, %p208_p10  ;;  %s2170_s16 = smov [#allocation5]  }
  0x17   : > { %s3146_s13 = scalar_select %p2273_p11, 1, 0 }
  0x18   : > { %s3147_s14 = scalar_select %p2277_p12, 1, 0 }
  0x19   : > { %s3148_s15 = scalar_select %p2281_p13, 1, 0 }
  0x1a   : > { %p1738_p1 = pneg %p2281_p13  ;;  %s221_s17 = sshll.u32 %s2170_s16, 4  ;;  %s222_s17 = int_to_ptr.vmem [resolvable:$true] %s221_s17 }
  0x1b   : > { %s2171_s18 = smov [#allocation7]   ;;  %s2003_s21 = scalar_lea.vmem %s222_s17, 32 }
  0x1c   : > { %s234_s19 = sshll.u32 %s2171_s18, 4  ;;  %p2289_p0 = pnand %p1738_p1, %p3139_p4  ;;  %s235_s19 = int_to_ptr.vmem [resolvable:$true] %s234_s19 }
  0x1d   : > { %p2004_p3 = scmp.ne.s32.totalorder %s222_s17, %s2003_s21  ;;  %p2011_p9 = scmp.lt.s32.totalorder %s222_s17, %s222_s17 }
  0x1e   : > { %p1994_p2 = pneg %p2289_p0  ;;  %p2012_p10 = scmp.lt.s32.totalorder %s2003_s21, %s2003_s21 }
  0x20   : > { %p2006_p7 = pnand %p2004_p3, %p1994_p2  ;;  %p2013_p12 = por %p2012_p10, %p2011_p9 }
  0x22   : > { %p2007_p8 = pneg %p2006_p7 }
  0x24   : > { %p2014_p11 = pnand %p2013_p12, %p2007_p8 }
  0x26   : > { %2017 = shalt.err (!%p2014_p11)
}
  0x27   : > { %s3150_s1 = sld [smem:[#allocation15_spill]]  ;;  %s2029_s29 = scalar_lea.vmem %s235_s19, 8192 }
  0x28   : > { %p2030_p1 = scmp.ne.s32.totalorder %s235_s19, %s2029_s29  ;;  %p2037_p3 = scmp.lt.s32.totalorder %s235_s19, %s235_s19 }
  0x29   : > { %p2038_p7 = scmp.lt.s32.totalorder %s2029_s29, %s2029_s29 }
  0x2a   : > { %p2032_p4 = pnand %p2030_p1, %p1994_p2 }
  0x2b   : > { %p2039_p13 = por %p2038_p7, %p2037_p3 }
  0x2c   : > { %p2033_p6 = pneg %p2032_p4 }
  0x2d   : > { %1741 = dma.hbm_to_vmem [thread:$0]  (!%p2289_p0), %s3150_s1, 32, %s222_s17, [#allocation6]  }
  0x2e   : > { %p2040_p5 = pnand %p2039_p13, %p2033_p6 }
  0x30   : > { %2043 = shalt.err (!%p2040_p5)
}
  0x31   : > { %s2172_s8 = smov 256   ;;  %s2173_s9 = smov 16  }
  0x32   : > { %s3151_s3 = sld [smem:[#allocation16_spill]]  ;;  %s2174_s17 = smov [#allocation8]  }
  0x33   : > { %s250_s21 = sshll.u32 %s2174_s17, 4  ;;  %s251_s21 = int_to_ptr.vmem [resolvable:$true] %s250_s21 }
  0x34   : > { %s2055_s22 = scalar_lea.vmem %s251_s21, 8192  ;;  %p2063_p6 = scmp.lt.s32.totalorder %s251_s21, %s251_s21 }
  0x35   : > { %p2056_p11 = scmp.ne.s32.totalorder %s251_s21, %s2055_s22  ;;  %p2064_p5 = scmp.lt.s32.totalorder %s2055_s22, %s2055_s22 }
  0x37   : > { %p2058_p4 = pnand %p2056_p11, %p1994_p2  ;;  %p2065_p13 = por %p2064_p5, %p2063_p6 }
  0x38   : > { %1744 = dma.hbm_to_vmem [thread:$0]  (!%p2289_p0), %s3151_s3, 8192, %s235_s19, [#allocation6], %s2172_s8, %s2172_s8, %s2173_s9  }
  0x39   : > { %p2059_p12 = pneg %p2058_p4 }
  0x3b   : > { %p2066_p8 = pnand %p2065_p13, %p2059_p12 }
  0x3d   : > { %2069 = shalt.err (!%p2066_p8)
}
  0x3e   : > { %1747 = dma.hbm_to_vmem [thread:$0]  (!%p2289_p0), %s3136_s5, 8192, %s251_s21, [#allocation9], %s2172_s8, %s2172_s8, %s2173_s9  }
  0x3f   : > { %p1659_p9 = scmp.ge.s32.totalorder %s2168_s27, 2 }
  0x40   : > { %p3152_p10 = scmp.ne.s32.totalorder (!%p1659_p9), %s3144_s11, 0 }
  0x41   : > { %263 = sbr.rel (%p1659_p9) target bundleno = 102 (0x66), region = 40 }
  0x46   : > { %266 = sbr.rel (!%p3152_p10) target bundleno = 102 (0x66), region = 44  ;;  %s267_s19 = sand.u32 (%p3152_p10), 1, %s2164_s26  }
  0x47   : > { %s1661_s16 = sshll.u32 (%p3152_p10), %s2168_s27, 4  ;;  %s1660_s18 = sshll.u32 (%p3152_p10), %s267_s19, 8 }
  0x48   : > { %s273_s17 = ssub.s32 (%p3152_p10), 25, %s1661_s16  ;;  %s2329_s9 = scalar_lea.sflag (%p3152_p10), [#allocation3], %s267_s19 }
  0x49   : > { %p274_p2 = scmp.lt.s32.totalorder (%p3152_p10), %s273_s17, 16  ;;  %s271_s21 = scalar_lea.vmem (%p3152_p10), [#allocation2], %s1660_s18 }
  0x4b   : > { %s3166_s17 = smov (!%p274_p2, %s273_s17), 16 }
  0x4c   : > { %s2326_s20 = sshll.u32 %s3166_s17, 8 }
  0x4d   : > { %s279_s8 = ssub.s32 4096, %s2326_s20 }
  0x4e   : > { %280 = vsyncadd %s2329_s9, %s279_s8  ;;  %p1664_p0 = scmp.ne.s32.totalorder %s2326_s20, 0  ;;  %s1720_s11 = sshll.u32 %s2168_s27, 12 }
  0x4f   : > { %s2337_s29 = scalar_lea.hbm %s3131_s0, %s1720_s11  ;;  %s286_s16 = sshll.u32 %s271_s21, 4  ;;  %s2339_s16 = int_to_ptr.vmem [resolvable:$true] %s286_s16 }
  0x50   : > { %s2070_s19 = scalar_lea.hbm %s2337_s29, %s2326_s20  ;;  %s2074_s8 = scalar_lea.hbm %s3131_s0, 6400 }
  0x51   : > { %p2071_p1 = scmp.ne.s32.totalorder %s2337_s29, %s2070_s19  ;;  %p2075_p11 = scmp.lt.s32.totalorder %s2337_s29, %s3131_s0 }
  0x52   : > { %p2076_p4 = scmp.lt.s32.totalorder %s2074_s8, %s2070_s19 }
  0x53   : > { %p2072_p3 = pnand %p2071_p1, %p1664_p0 }
  0x54   : > { %p2077_p12 = por %p2076_p4, %p2075_p11 }
  0x55   : > { %p2073_p7 = pneg %p2072_p3 }
  0x57   : > { %p2078_p6 = pnand %p2077_p12, %p2073_p7 }
  0x59   : > { %2081 = shalt.err (!%p2078_p6)
}
  0x5a   : > { %s2082_s21 = scalar_lea.vmem %s2339_s16, %s2326_s20  ;;  %s2175_s11 = smov [#allocation2]  }
  0x5b   : > { %p2083_p5 = scmp.ne.s32.totalorder %s2339_s16, %s2082_s21  ;;  %s2086_s22 = sshll.u32 %s2175_s11, 4  ;;  %s2087_s22 = int_to_ptr.vmem [resolvable:$false] %s2086_s22 }
  0x5c   : > { %s2088_s23 = scalar_lea.vmem %s2087_s22, 8192  ;;  %p2089_p10 = scmp.lt.s32.totalorder %s2339_s16, %s2087_s22 }
  0x5d   : > { %p2084_p13 = pnand %p2083_p5, %p1664_p0  ;;  %p2090_p2 = scmp.lt.s32.totalorder %s2088_s23, %s2082_s21 }
  0x5f   : > { %p2085_p8 = pneg %p2084_p13  ;;  %p2091_p1 = por %p2090_p2, %p2089_p10 }
  0x61   : > { %p2092_p3 = pnand %p2091_p1, %p2085_p8 }
  0x63   : > { %2095 = shalt.err (!%p2092_p3)
}
  0x64   : > { %s2176_s1 = smov 256   ;;  %s2177_s3 = smov 16  }
  0x65   : > { %292 = dma.hbm_to_vmem [thread:$0]  (%p1664_p0), %s2337_s29, %s2326_s20, %s2339_s16, %s2329_s9, %s2176_s1, %s2176_s1, %s2177_s3  }
  0x66 PF: > { %p3153_p7 = scmp.ne.s32.totalorder %s3148_s15, 0 }
  0x67   : > { %s2368_s19 = sand.u32 (!%p3153_p7), 1, %s2160_s25   ;;  %p3154_p11 = scmp.ne.s32.totalorder (!%p3153_p7), %s3145_s12, 0 }
  0x68   : > { %298 = sbr.rel (%p3153_p7) target bundleno = 951 (0x3b7), region = 48  ;;  %s1670_s18 = sshll.u32 (!%p3153_p7), %s2368_s19, 8 }
  0x69   : > { %s301_s17 = scalar_lea.sflag (!%p3153_p7), [#allocation3], %s2368_s19  ;;  %s2374_s8 = scalar_lea.vmem (!%p3153_p7), [#allocation2], %s1670_s18 }
  0x6d   : > { %2139 = dma.done.wait (%p3154_p11), %s301_s17, 4096  }
  0x6e   : > { %2141 = vsyncadd (%p3154_p11), %s301_s17, 4294963200  ;;  %p3155_p0 = scmp.eq.s32.totalorder %s2242_s28, 0 }
  0x70   : > { %2143 = dma.done.wait (%p3155_p0), [#allocation6], 8224   ;;  %p3156_p4 = pmov %p3155_p0 }
  0x71   : > { %p3157_p12 = pmov %p3155_p0 }
  0x72   : > { %2145 = vsyncadd (%p3156_p4), [#allocation6], 4294959072 }
  0x73   : > { %2147 = dma.done.wait (%p3157_p12), [#allocation9], 8192   ;;  %p3158_p6 = pmov %p3155_p0 }
  0x74   : > { %v2389_v0 = vld [vmem:[%s2374_s8] sm:$0xff]  ;;  %v2392_v1 = vld [vmem:[%s2374_s8 + $0x8] sm:$0xff]  ;;  %v2403_v5 = vld [vmem:[%s2374_s8 + $0x10] sm:$0xff]  ;;  %s2974_s21 = scalar_lea.vmem [#allocation10], %s1670_s18  ;;  %s1531_s11 = scalar_lea.sflag [#allocation4], %s2368_s19 }
  0x75   : > { %2149 = vsyncadd (%p3158_p6), [#allocation9], 4294959104  ;;  %v2395_v2 = vld [vmem:[%s2374_s8 + $0x20] sm:$0xff]  ;;  %v393_v3 = vadd.f32 %v2392_v1, %v2389_v0  ;;  %v2400_v4 = vld [vmem:[%s2374_s8 + $0x28] sm:$0xff]  ;;  %p3159_p5 = scmp.ne.s32.totalorder %s3146_s13, 0 }
  0x76   : > { %v2406_v6 = vld [vmem:[%s2374_s8 + $0x18] sm:$0xff]  ;;  %v399_v7 = vadd.f32 %v2400_v4, %v2395_v2  ;;  %v2411_v8 = vld [vmem:[%s2374_s8 + $0x30] sm:$0xff]  ;;  %v2421_v12 = vld [vmem:[%s2374_s8 + $0x40] sm:$0xff]  ;;  %s1708_s22 = sshll.u32 (%p3159_p5), %s2242_s28, 4 }
  0x77   : > { %v2414_v9 = vld [vmem:[%s2374_s8 + $0x38] sm:$0xff]  ;;  %394 = vadd.xlane.f32.xlu0 %v393_v3  ;;  %v396_v10 = vadd.f32 %v2406_v6, %v2403_v5  ;;  %v2424_v13 = vld [vmem:[%s2374_s8 + $0x48] sm:$0xff]  ;;  %v2427_v14 = vld [vmem:[%s2374_s8 + $0x50] sm:$0xff]  ;;  %s1539_s23 = ssub.s32 (%p3159_p5), 25, %s1708_s22 }
  0x78   : > { %400 = vadd.xlane.f32.xlu1 %v399_v7  ;;  %v402_v11 = vadd.f32 %v2414_v9, %v2411_v8  ;;  %v2430_v15 = vld [vmem:[%s2374_s8 + $0x58] sm:$0xff]  ;;  %v405_v16 = vadd.f32 %v2424_v13, %v2421_v12  ;;  %v2437_v18 = vld [vmem:[%s2374_s8 + $0x60] sm:$0xff]  ;;  %v2440_v19 = vld [vmem:[%s2374_s8 + $0x68] sm:$0xff]  ;;  %p1540_p13 = scmp.lt.s32.totalorder (%p3159_p5), %s1539_s23, 16 }
  0x79   : > { %v408_v17 = vadd.f32 %v2430_v15, %v2427_v14  ;;  %v2443_v20 = vld [vmem:[%s2374_s8 + $0x70] sm:$0xff]  ;;  %v2446_v21 = vld [vmem:[%s2374_s8 + $0x78] sm:$0xff]  ;;  %v411_v22 = vadd.f32 %v2440_v19, %v2437_v18  ;;  %v2453_v24 = vld [vmem:[%s2374_s8 + $0x80] sm:$0xff] }
  0x7a   : > { %v414_v23 = vadd.f32 %v2446_v21, %v2443_v20  ;;  %v2456_v25 = vld [vmem:[%s2374_s8 + $0x88] sm:$0xff]  ;;  %v2459_v26 = vld [vmem:[%s2374_s8 + $0x90] sm:$0xff]  ;;  %v2462_v27 = vld [vmem:[%s2374_s8 + $0x98] sm:$0xff] }
  0x7b   : > { %397 = vadd.xlane.f32.xlu0 %v396_v10  ;;  %v417_v28 = vadd.f32 %v2456_v25, %v2453_v24  ;;  %v420_v29 = vadd.f32 %v2462_v27, %v2459_v26  ;;  %v2469_v30 = vld [vmem:[%s2374_s8 + $0xa0] sm:$0xff]  ;;  %v2472_v31 = vld [vmem:[%s2374_s8 + $0xa8] sm:$0xff]  ;;  %v2475_v32 = vld [vmem:[%s2374_s8 + $0xb0] sm:$0xff] }
  0x7c   : > { %403 = vadd.xlane.f32.xlu1 %v402_v11  ;;  %v2478_v33 = vld [vmem:[%s2374_s8 + $0xb8] sm:$0xff]  ;;  %v423_v34 = vadd.f32 %v2472_v31, %v2469_v30  ;;  %v2485_v36 = vld [vmem:[%s2374_s8 + $0xc0] sm:$0xff]  ;;  %v2488_v37 = vld [vmem:[%s2374_s8 + $0xc8] sm:$0xff] }
  0x7d   : > { %v426_v35 = vadd.f32 %v2478_v33, %v2475_v32  ;;  %v2491_v38 = vld [vmem:[%s2374_s8 + $0xd0] sm:$0xff]  ;;  %v2494_v39 = vld [vmem:[%s2374_s8 + $0xd8] sm:$0xff]  ;;  %v429_v40 = vadd.f32 %v2488_v37, %v2485_v36  ;;  %v2501_v42 = vld [vmem:[%s2374_s8 + $0xe0] sm:$0xff] }
  0x7e   : > { %v432_v41 = vadd.f32 %v2494_v39, %v2491_v38  ;;  %v2504_v43 = vld [vmem:[%s2374_s8 + $0xe8] sm:$0xff]  ;;  %v2507_v44 = vld [vmem:[%s2374_s8 + $0xf0] sm:$0xff]  ;;  %v2510_v45 = vld [vmem:[%s2374_s8 + $0xf8] sm:$0xff] }
  0x7f   : > { %406 = vadd.xlane.f32.xlu0 %v405_v16  ;;  %v435_v46 = vadd.f32 %v2504_v43, %v2501_v42  ;;  %v438_v47 = vadd.f32 %v2510_v45, %v2507_v44  ;;  %v767_v48 = vld [vmem:[#allocation7 + $0xf8] sm:$0xff]  ;;  %v766_v49 = vld [vmem:[#allocation7 + $0xf0] sm:$0xff]  ;;  %v765_v50 = vld [vmem:[#allocation7 + $0xe8] sm:$0xff] }
  0x80   : > { %409 = vadd.xlane.f32.xlu1 %v408_v17  ;;  %812 = vmatprep.subr.mxu0 %v767_v48  ;;  %v764_v51 = vld [vmem:[#allocation7 + $0xe0] sm:$0xff]  ;;  %v763_v52 = vld [vmem:[#allocation7 + $0xd8] sm:$0xff]  ;;  %v762_v53 = vld [vmem:[#allocation7 + $0xd0] sm:$0xff] }
  0x81   : > { %813 = vmatpush1.msra.mxu0 %v766_v49  ;;  %v761_v54 = vld [vmem:[#allocation7 + $0xc8] sm:$0xff]  ;;  %v760_v55 = vld [vmem:[#allocation7 + $0xc0] sm:$0xff]  ;;  %v759_v56 = vld [vmem:[#allocation7 + $0xb8] sm:$0xff] }
  0x82   : > { %814 = vmatprep.subr.mxu0 %v765_v50  ;;  %v758_v57 = vld [vmem:[#allocation7 + $0xb0] sm:$0xff]  ;;  %v757_v58 = vld [vmem:[#allocation7 + $0xa8] sm:$0xff]  ;;  %v756_v59 = vld [vmem:[#allocation7 + $0xa0] sm:$0xff] }
  0x83   : > { %412 = vadd.xlane.f32.xlu0 %v411_v22  ;;  %815 = vmatpush1.msra.mxu0 %v764_v51  ;;  %v755_v60 = vld [vmem:[#allocation7 + $0x98] sm:$0xff]  ;;  %v754_v61 = vld [vmem:[#allocation7 + $0x90] sm:$0xff]  ;;  %v753_v62 = vld [vmem:[#allocation7 + $0x88] sm:$0xff] }
  0x84   : > { %415 = vadd.xlane.f32.xlu1 %v414_v23  ;;  %816 = vmatprep.subr.mxu0 %v763_v52  ;;  %v752_v63 = vld [vmem:[#allocation7 + $0x80] sm:$0xff]  ;;  %v751_v3 = vld [vmem:[#allocation7 + $0x78] sm:$0xff]  ;;  %v750_v7 = vld [vmem:[#allocation7 + $0x70] sm:$0xff] }
  0x85   : > { %817 = vmatpush1.msra.mxu0 %v762_v53  ;;  %v749_v10 = vld [vmem:[#allocation7 + $0x68] sm:$0xff]  ;;  %v748_v11 = vld [vmem:[#allocation7 + $0x60] sm:$0xff]  ;;  %v747_v16 = vld [vmem:[#allocation7 + $0x58] sm:$0xff] }
  0x86   : > { %818 = vmatprep.subr.mxu0 %v761_v54  ;;  %v746_v17 = vld [vmem:[#allocation7 + $0x50] sm:$0xff]  ;;  %v745_v22 = vld [vmem:[#allocation7 + $0x48] sm:$0xff]  ;;  %v744_v23 = vld [vmem:[#allocation7 + $0x40] sm:$0xff] }
  0x87   : > { %418 = vadd.xlane.f32.xlu0 %v417_v28  ;;  %819 = vmatpush1.msra.mxu0 %v760_v55  ;;  %v743_v28 = vld [vmem:[#allocation7 + $0x38] sm:$0xff]  ;;  %v798_v49 = vld [vmem:[#allocation7 + $0x1f0] sm:$0xff]  ;;  %v797_v50 = vld [vmem:[#allocation7 + $0x1e8] sm:$0xff] }
  0x88   : > { %421 = vadd.xlane.f32.xlu1 %v420_v29  ;;  %820 = vmatprep.subr.mxu0 %v759_v56  ;;  %v742_v29 = vld [vmem:[#allocation7 + $0x30] sm:$0xff]  ;;  %v799_v48 = vld [vmem:[#allocation7 + $0x1f8] sm:$0xff]  ;;  %v796_v51 = vld [vmem:[#allocation7 + $0x1e0] sm:$0xff] }
  0x89   : > { %821 = vmatpush1.msra.mxu0 %v758_v57  ;;  %v795_v52 = vld [vmem:[#allocation7 + $0x1d8] sm:$0xff]  ;;  %v794_v53 = vld [vmem:[#allocation7 + $0x1d0] sm:$0xff]  ;;  %v793_v54 = vld [vmem:[#allocation7 + $0x1c8] sm:$0xff] }
  0x8a   : > { %822 = vmatprep.subr.mxu0 %v757_v58 }
  0x8b   : > { %424 = vadd.xlane.f32.xlu0 %v423_v34  ;;  %823 = vmatpush1.msra.mxu0 %v756_v59  ;;  %v741_v34 = vld [vmem:[#allocation7 + $0x28] sm:$0xff] }
  0x8c   : > { %427 = vadd.xlane.f32.xlu1 %v426_v35  ;;  %824 = vmatprep.subr.mxu0 %v755_v60  ;;  %v740_v35 = vld [vmem:[#allocation7 + $0x20] sm:$0xff] }
  0x8d   : > { %825 = vmatpush1.msra.mxu0 %v754_v61 }
  0x8e   : > { %826 = vmatprep.subr.mxu0 %v753_v62 }
  0x8f   : > { %430 = vadd.xlane.f32.xlu0 %v429_v40  ;;  %827 = vmatpush1.msra.mxu0 %v752_v63  ;;  %v739_v40 = vld [vmem:[#allocation7 + $0x18] sm:$0xff] }
  0x90   : > { %433 = vadd.xlane.f32.xlu1 %v432_v41  ;;  %828 = vmatprep.subr.mxu0 %v751_v3  ;;  %v738_v41 = vld [vmem:[#allocation7 + $0x10] sm:$0xff] }
  0x91   : > { %829 = vmatpush1.msra.mxu0 %v750_v7 }
  0x92   : > { %830 = vmatprep.subr.mxu0 %v749_v10 }
  0x93   : > { %436 = vadd.xlane.f32.xlu0 %v435_v46  ;;  %831 = vmatpush1.msra.mxu0 %v748_v11  ;;  %v737_v46 = vld [vmem:[#allocation7 + $0x8] sm:$0xff] }
  0x94   : > { %439 = vadd.xlane.f32.xlu1 %v438_v47  ;;  %832 = vmatprep.subr.mxu0 %v747_v16  ;;  %v736_v47 = vld [vmem:[#allocation7] sm:$0xff] }
  0x95   : > { %833 = vmatpush1.msra.mxu0 %v746_v17 }
  0x96   : > { %834 = vmatprep.subr.mxu0 %v745_v22 }
  0x97   : > { %835 = vmatpush1.msra.mxu0 %v744_v23 }
  0x98   : > { %836 = vmatprep.subr.mxu0 %v743_v28 }
  0x99   : > { %837 = vmatpush1.msra.mxu0 %v742_v29 }
  0x9a   : > { %838 = vmatprep.subr.mxu0 %v741_v34 }
  0x9b   : > { %839 = vmatpush1.msra.mxu0 %v740_v35 }
  0x9c   : > { %840 = vmatprep.subr.mxu0 %v739_v40 }
  0x9d   : > { %841 = vmatpush1.msra.mxu0 %v738_v41 }
  0x9e   : > { %842 = vmatprep.subr.mxu0 %v737_v46 }
  0x9f   : > { %843 = vmatpush1.msra.mxu0 %v736_v47 }
  0xa0   : > { %844 = vmatprep.subr.mxu0 %v799_v48 }
  0xa1   : > { %845 = vmatpush2.msra.mxu0 %v798_v49 }
  0xa2   : > { %846 = vmatprep.subr.mxu0 %v797_v50 }
  0xa3   : > { %847 = vmatpush2.msra.mxu0 %v796_v51 }
  0xa4   : > { %848 = vmatprep.subr.mxu0 %v795_v52 }
  0xa5   : > { %849 = vmatpush2.msra.mxu0 %v794_v53 }
  0xa6   : > { %850 = vmatprep.subr.mxu0 %v793_v54 }
 0x100   : > { %v395_v55 = vpop.xlane.xlu0 %394 }
 0x101   : > { %v442_v56 = vmul.f32 0.00390625, %v395_v55  ;;  %v401_v57 = vpop.xlane.xlu1 %400 }
 0x102   : > { %v444_v58 = vmul.f32 0.00390625, %v401_v57 }
 0x103   : > { %v2517_v59 = vsub.f32 %v2389_v0, %v442_v56  ;;  %v2520_v60 = vsub.f32 %v2392_v1, %v442_v56 }
 0x104   : > { %v2523_v61 = vsub.f32 %v2395_v2, %v444_v58  ;;  %v2526_v62 = vsub.f32 %v2400_v4, %v444_v58  ;;  %v398_v63 = vpop.xlane.xlu0 %397 }
 0x105   : > { %v443_v3 = vmul.f32 0.00390625, %v398_v63  ;;  %v404_v7 = vpop.xlane.xlu1 %403  ;;  %v490_v10 = vmul.f32 %v2517_v59, %v2517_v59  ;;  %v491_v11 = vmul.f32 %v2520_v60, %v2520_v60 }
 0x106   : > { %v445_v0 = vmul.f32 0.00390625, %v404_v7  ;;  %v494_v1 = vmul.f32 %v2523_v61, %v2523_v61  ;;  %v495_v2 = vmul.f32 %v2526_v62, %v2526_v62 }
 0x107   : > { %v2537_v16 = vsub.f32 %v2403_v5, %v443_v3  ;;  %v2540_v4 = vsub.f32 %v2406_v6, %v443_v3  ;;  %v522_v17 = vadd.f32 %v491_v11, %v490_v10 }
 0x108   : > { %v2543_v22 = vsub.f32 %v2411_v8, %v445_v0  ;;  %v2546_v23 = vsub.f32 %v2414_v9, %v445_v0  ;;  %v407_v28 = vpop.xlane.xlu0 %406  ;;  %v528_v35 = vadd.f32 %v495_v2, %v494_v1  ;;  %v792_v1 = vld [vmem:[#allocation7 + $0x1c0] sm:$0xff] }
 0x109   : > { %v446_v29 = vmul.f32 0.00390625, %v407_v28  ;;  %523 = vadd.xlane.f32.xlu0 %v522_v17  ;;  %v410_v34 = vpop.xlane.xlu1 %409  ;;  %v492_v40 = vmul.f32 %v2537_v16, %v2537_v16  ;;  %v493_v5 = vmul.f32 %v2540_v4, %v2540_v4  ;;  %851 = vmatpush2.msra.mxu0 %v792_v1 }
 0x10a   : > { %v447_v6 = vmul.f32 0.00390625, %v410_v34  ;;  %v496_v41 = vmul.f32 %v2543_v22, %v2543_v22  ;;  %v497_v8 = vmul.f32 %v2546_v23, %v2546_v23 }
 0x10b   : > { %v2557_v9 = vsub.f32 %v2421_v12, %v446_v29  ;;  %v2560_v46 = vsub.f32 %v2424_v13, %v446_v29  ;;  %v525_v47 = vadd.f32 %v493_v5, %v492_v40  ;;  %v791_v29 = vld [vmem:[#allocation7 + $0x1b8] sm:$0xff]  ;;  %v790_v5 = vld [vmem:[#allocation7 + $0x1b0] sm:$0xff] }
 0x10c   : > { %v2563_v48 = vsub.f32 %v2427_v14, %v447_v6  ;;  %v2566_v49 = vsub.f32 %v2430_v15, %v447_v6  ;;  %v413_v50 = vpop.xlane.xlu0 %412  ;;  %v531_v53 = vadd.f32 %v497_v8, %v496_v41  ;;  %852 = vmatprep.subr.mxu0 %v791_v29 }
 0x10d   : > { %v448_v51 = vmul.f32 0.00390625, %v413_v50  ;;  %529 = vadd.xlane.f32.xlu0 %v528_v35  ;;  %526 = vadd.xlane.f32.xlu1 %v525_v47  ;;  %v416_v52 = vpop.xlane.xlu1 %415  ;;  %v498_v12 = vmul.f32 %v2557_v9, %v2557_v9  ;;  %v499_v13 = vmul.f32 %v2560_v46, %v2560_v46  ;;  %v789_v47 = vld [vmem:[#allocation7 + $0x1a8] sm:$0xff] }
 0x10e   : > { %v449_v54 = vmul.f32 0.00390625, %v416_v52  ;;  %v500_v14 = vmul.f32 %v2563_v48, %v2563_v48  ;;  %v501_v15 = vmul.f32 %v2566_v49, %v2566_v49  ;;  %853 = vmatpush2.msra.mxu0 %v790_v5 }
 0x10f   : > { %v2577_v55 = vsub.f32 %v2437_v18, %v448_v51  ;;  %v2580_v56 = vsub.f32 %v2440_v19, %v448_v51  ;;  %v534_v57 = vadd.f32 %v499_v13, %v498_v12  ;;  %854 = vmatprep.subr.mxu0 %v789_v47  ;;  %v788_v12 = vld [vmem:[#allocation7 + $0x1a0] sm:$0xff] }
 0x110   : > { %v2583_v58 = vsub.f32 %v2443_v20, %v449_v54  ;;  %v2586_v63 = vsub.f32 %v2446_v21, %v449_v54  ;;  %v419_v3 = vpop.xlane.xlu0 %418  ;;  %v537_v11 = vadd.f32 %v501_v15, %v500_v14  ;;  %855 = vmatpush2.msra.mxu0 %v788_v12  ;;  %v787_v15 = vld [vmem:[#allocation7 + $0x198] sm:$0xff]  ;;  %v780_v12 = vld [vmem:[#allocation7 + $0x160] sm:$0xff] }
 0x111   : > { %v450_v7 = vmul.f32 0.00390625, %v419_v3  ;;  %532 = vadd.xlane.f32.xlu1 %v531_v53  ;;  %535 = vadd.xlane.f32.xlu0 %v534_v57  ;;  %v422_v10 = vpop.xlane.xlu1 %421  ;;  %v502_v18 = vmul.f32 %v2577_v55, %v2577_v55  ;;  %v503_v19 = vmul.f32 %v2580_v56, %v2580_v56 }
 0x112   : > { %v451_v0 = vmul.f32 0.00390625, %v422_v10  ;;  %v504_v20 = vmul.f32 %v2583_v58, %v2583_v58  ;;  %v505_v21 = vmul.f32 %v2586_v63, %v2586_v63  ;;  %v786_v10 = vld [vmem:[#allocation7 + $0x190] sm:$0xff]  ;;  %856 = vmatprep.subr.mxu0 %v787_v15  ;;  %v779_v15 = vld [vmem:[#allocation7 + $0x158] sm:$0xff] }
 0x113   : > { %v2597_v2 = vsub.f32 %v2453_v24, %v450_v7  ;;  %v2600_v17 = vsub.f32 %v2456_v25, %v450_v7  ;;  %v540_v28 = vadd.f32 %v503_v19, %v502_v18  ;;  %v785_v18 = vld [vmem:[#allocation7 + $0x188] sm:$0xff]  ;;  %857 = vmatpush2.msra.mxu0 %v786_v10  ;;  %v775_v10 = vld [vmem:[#allocation7 + $0x138] sm:$0xff] }
 0x114   : > { %v2603_v34 = vsub.f32 %v2459_v26, %v451_v0  ;;  %v2606_v35 = vsub.f32 %v2462_v27, %v451_v0  ;;  %v425_v40 = vpop.xlane.xlu0 %424  ;;  %v543_v41 = vadd.f32 %v505_v21, %v504_v20  ;;  %v784_v21 = vld [vmem:[#allocation7 + $0x180] sm:$0xff]  ;;  %858 = vmatprep.subr.mxu0 %v785_v18  ;;  %v771_v18 = vld [vmem:[#allocation7 + $0x118] sm:$0xff] }
 0x115   : > { %v452_v6 = vmul.f32 0.00390625, %v425_v40  ;;  %538 = vadd.xlane.f32.xlu1 %v537_v11  ;;  %541 = vadd.xlane.f32.xlu0 %v540_v28  ;;  %v428_v24 = vpop.xlane.xlu1 %427  ;;  %v506_v25 = vmul.f32 %v2597_v2, %v2597_v2  ;;  %v507_v8 = vmul.f32 %v2600_v17, %v2600_v17  ;;  %v783_v40 = vld [vmem:[#allocation7 + $0x178] sm:$0xff] }
 0x116   : > { %v453_v26 = vmul.f32 0.00390625, %v428_v24  ;;  %v508_v27 = vmul.f32 %v2603_v34, %v2603_v34  ;;  %v509_v50 = vmul.f32 %v2606_v35, %v2606_v35  ;;  %859 = vmatpush2.msra.mxu0 %v784_v21  ;;  %v769_v21 = vld [vmem:[#allocation7 + $0x108] sm:$0xff] }
 0x117   : > { %v2617_v51 = vsub.f32 %v2469_v30, %v452_v6  ;;  %v2620_v52 = vsub.f32 %v2472_v31, %v452_v6  ;;  %v546_v53 = vadd.f32 %v507_v8, %v506_v25  ;;  %860 = vmatprep.subr.mxu0 %v783_v40  ;;  %v1260_v40 = vld [vmem:[#allocation8 + $0xf8] sm:$0xff] }
 0x118   : > { %v2623_v13 = vsub.f32 %v2475_v32, %v453_v26  ;;  %v2626_v54 = vsub.f32 %v2478_v33, %v453_v26  ;;  %v431_v14 = vpop.xlane.xlu0 %430  ;;  %v549_v3 = vadd.f32 %v509_v50, %v508_v27  ;;  %v781_v27 = vld [vmem:[#allocation7 + $0x168] sm:$0xff]  ;;  %1305 = vmatprep.subr.mxu1 %v1260_v40 }
 0x119   : > { %v454_v57 = vmul.f32 0.00390625, %v431_v14  ;;  %544 = vadd.xlane.f32.xlu1 %v543_v41  ;;  %547 = vadd.xlane.f32.xlu0 %v546_v53  ;;  %v434_v30 = vpop.xlane.xlu1 %433  ;;  %v510_v31 = vmul.f32 %v2617_v51, %v2617_v51  ;;  %v511_v7 = vmul.f32 %v2620_v52, %v2620_v52  ;;  %v782_v41 = vld [vmem:[#allocation7 + $0x170] sm:$0xff] }
 0x11a   : > { %v455_v32 = vmul.f32 0.00390625, %v434_v30  ;;  %v512_v33 = vmul.f32 %v2623_v13, %v2623_v13  ;;  %v513_v11 = vmul.f32 %v2626_v54, %v2626_v54  ;;  %861 = vmatpush2.msra.mxu0 %v782_v41  ;;  %v778_v30 = vld [vmem:[#allocation7 + $0x150] sm:$0xff]  ;;  %v1254_v41 = vld [vmem:[#allocation8 + $0xc8] sm:$0xff] }
 0x11b   : > { %v2637_v19 = vsub.f32 %v2485_v36, %v454_v57  ;;  %v2640_v0 = vsub.f32 %v2488_v37, %v454_v57  ;;  %v552_v20 = vadd.f32 %v511_v7, %v510_v31  ;;  %862 = vmatprep.subr.mxu0 %v781_v27  ;;  %v776_v7 = vld [vmem:[#allocation7 + $0x140] sm:$0xff] }
 0x11c   : > { %v2643_v1 = vsub.f32 %v2491_v38, %v455_v32  ;;  %v2646_v28 = vsub.f32 %v2494_v39, %v455_v32  ;;  %v437_v29 = vpop.xlane.xlu0 %436  ;;  %v555_v6 = vadd.f32 %v513_v11, %v512_v33  ;;  %863 = vmatpush2.msra.mxu0 %v780_v12  ;;  %v774_v32 = vld [vmem:[#allocation7 + $0x130] sm:$0xff]  ;;  %v773_v33 = vld [vmem:[#allocation7 + $0x128] sm:$0xff]  ;;  %v772_v11 = vld [vmem:[#allocation7 + $0x120] sm:$0xff] }
 0x11d   : > { %v456_v5 = vmul.f32 0.00390625, %v437_v29  ;;  %550 = vadd.xlane.f32.xlu1 %v549_v3  ;;  %553 = vadd.xlane.f32.xlu0 %v552_v20  ;;  %v440_v36 = vpop.xlane.xlu1 %439  ;;  %v514_v37 = vmul.f32 %v2637_v19, %v2637_v19  ;;  %v515_v24 = vmul.f32 %v2640_v0, %v2640_v0  ;;  %v777_v3 = vld [vmem:[#allocation7 + $0x148] sm:$0xff]  ;;  %v770_v20 = vld [vmem:[#allocation7 + $0x110] sm:$0xff]  ;;  %v768_v29 = vld [vmem:[#allocation7 + $0x100] sm:$0xff] }
 0x11e   : > { %v457_v38 = vmul.f32 0.00390625, %v440_v36  ;;  %v516_v39 = vmul.f32 %v2643_v1, %v2643_v1  ;;  %v517_v25 = vmul.f32 %v2646_v28, %v2646_v28  ;;  %864 = vmatprep.subr.mxu0 %v779_v15  ;;  %v1258_v36 = vld [vmem:[#allocation8 + $0xe8] sm:$0xff]  ;;  %v1249_v27 = vld [vmem:[#allocation8 + $0xa0] sm:$0xff]  ;;  %v1248_v12 = vld [vmem:[#allocation8 + $0x98] sm:$0xff] }
 0x11f   : > { %v2657_v8 = vsub.f32 %v2501_v42, %v456_v5  ;;  %v2660_v47 = vsub.f32 %v2504_v43, %v456_v5  ;;  %v558_v26 = vadd.f32 %v515_v24, %v514_v37  ;;  %865 = vmatpush2.msra.mxu0 %v778_v30  ;;  %v1259_v5 = vld [vmem:[#allocation8 + $0xf0] sm:$0xff]  ;;  %v1256_v37 = vld [vmem:[#allocation8 + $0xd8] sm:$0xff] }
 0x120   : > { %v2663_v50 = vsub.f32 %v2507_v44, %v457_v38  ;;  %v2666_v53 = vsub.f32 %v2510_v45, %v457_v38  ;;  %v561_v14 = vadd.f32 %v517_v25, %v516_v39  ;;  %866 = vmatprep.subr.mxu0 %v777_v3  ;;  %1306 = vmatpush1.msra.mxu1 %v1259_v5  ;;  %v1255_v24 = vld [vmem:[#allocation8 + $0xd0] sm:$0xff]  ;;  %v1253_v38 = vld [vmem:[#allocation8 + $0xc0] sm:$0xff]  ;;  %v1252_v39 = vld [vmem:[#allocation8 + $0xb8] sm:$0xff] }
 0x121   : > { %556 = vadd.xlane.f32.xlu1 %v555_v6  ;;  %559 = vadd.xlane.f32.xlu0 %v558_v26  ;;  %v518_v42 = vmul.f32 %v2657_v8, %v2657_v8  ;;  %v519_v43 = vmul.f32 %v2660_v47, %v2660_v47  ;;  %v1257_v6 = vld [vmem:[#allocation8 + $0xe0] sm:$0xff]  ;;  %v1251_v25 = vld [vmem:[#allocation8 + $0xb0] sm:$0xff]  ;;  %v1250_v26 = vld [vmem:[#allocation8 + $0xa8] sm:$0xff] }
 0x122   : > { %v520_v57 = vmul.f32 %v2663_v50, %v2663_v50  ;;  %v521_v44 = vmul.f32 %v2666_v53, %v2666_v53  ;;  %867 = vmatpush2.msra.mxu0 %v776_v7  ;;  %1307 = vmatprep.subr.mxu1 %v1258_v36  ;;  %v1244_v15 = vld [vmem:[#allocation8 + $0x78] sm:$0xff]  ;;  %v1239_v3 = vld [vmem:[#allocation8 + $0x50] sm:$0xff] }
 0x123   : > { %v564_v45 = vadd.f32 %v519_v43, %v518_v42  ;;  %868 = vmatprep.subr.mxu0 %v775_v10  ;;  %1308 = vmatpush1.msra.mxu1 %v1257_v6  ;;  %v1246_v42 = vld [vmem:[#allocation8 + $0x88] sm:$0xff]  ;;  %v1245_v43 = vld [vmem:[#allocation8 + $0x80] sm:$0xff]  ;;  %v1240_v30 = vld [vmem:[#allocation8 + $0x58] sm:$0xff] }
 0x124   : > { %v567_v31 = vadd.f32 %v521_v44, %v520_v57  ;;  %869 = vmatpush2.msra.mxu0 %v774_v32  ;;  %1309 = vmatprep.subr.mxu1 %v1256_v37  ;;  %v1243_v57 = vld [vmem:[#allocation8 + $0x70] sm:$0xff]  ;;  %v1242_v44 = vld [vmem:[#allocation8 + $0x68] sm:$0xff] }
 0x125   : > { %562 = vadd.xlane.f32.xlu1 %v561_v14  ;;  %565 = vadd.xlane.f32.xlu0 %v564_v45  ;;  %v1247_v14 = vld [vmem:[#allocation8 + $0x90] sm:$0xff]  ;;  %v1241_v45 = vld [vmem:[#allocation8 + $0x60] sm:$0xff] }
 0x126   : > { %870 = vmatprep.subr.mxu0 %v773_v33  ;;  %1310 = vmatpush1.msra.mxu1 %v1255_v24 }
 0x127   : > { %871 = vmatpush2.msra.mxu0 %v772_v11  ;;  %1311 = vmatprep.subr.mxu1 %v1254_v41 }
 0x128   : > { %872 = vmatprep.subr.mxu0 %v771_v18  ;;  %1312 = vmatpush1.msra.mxu1 %v1253_v38 }
 0x129   : > { %568 = vadd.xlane.f32.xlu1 %v567_v31  ;;  %873 = vmatpush2.msra.mxu0 %v770_v20  ;;  %v651_v20 = vlaneseq }
 0x12a   : > { %874 = vmatprep.subr.mxu0 %v769_v21  ;;  %1313 = vmatprep.subr.mxu1 %v1252_v39 }
 0x12b   : > { %875 = vmatpush2.msra.mxu0 %v768_v29  ;;  %1314 = vmatpush1.msra.mxu1 %v1251_v25  ;;  %v652_v37 = vshrl.u32 %v651_v20, 7 }
 0x12c   : > { %1315 = vmatprep.subr.mxu1 %v1250_v26 }
 0x12d   : > { %1316 = vmatpush1.msra.mxu1 %v1249_v27  ;;  %v2676_v27 = vsub.s32 1, %v652_v37 }
 0x12e   : > { %1317 = vmatprep.subr.mxu1 %v1248_v12  ;;  %v391_v12 = vld [vmem:[#allocation5] sm:$0x3] }
 0x12f   : > { %1318 = vmatpush1.msra.mxu1 %v1247_v14  ;;  %v2678_v14 = vsub.s32 0, %v652_v37 }
 0x130   : > { %1319 = vmatprep.subr.mxu1 %v1246_v42 }
 0x131   : > { %1320 = vmatpush1.msra.mxu1 %v1245_v43 }
 0x132   : > { %1321 = vmatprep.subr.mxu1 %v1244_v15  ;;  %v392_v15 = vld [vmem:[%s3133_s2] sm:$0x3] }
 0x133   : > { %1322 = vmatpush1.msra.mxu1 %v1243_v57 }
 0x134   : > { %1323 = vmatprep.subr.mxu1 %v1242_v44 }
 0x135   : > { %1324 = vmatpush1.msra.mxu1 %v1241_v45  ;;  %v2684_v45 = vrot.slane %v391_v12, %v2676_v27 }
 0x136   : > { %1325 = vmatprep.subr.mxu1 %v1240_v30 }
 0x137   : > { %1326 = vmatpush1.msra.mxu1 %v1239_v3 }
 0x192   : > { %v524_v31 = vpop.xlane.xlu0 %523 }
 0x193   : > { %v570_v7 = vmul.f32 0.00390625, %v524_v31  ;;  %v2687_v31 = vrot.slane %v391_v12, %v2678_v14 }
 0x195   : > { %v586_v10 = vadd.f32 1e-05, %v570_v7 }
 0x196   : > { %v527_v32 = vpop.xlane.xlu1 %526  ;;  %v530_v33 = vpop.xlane.xlu0 %529 }
 0x197   : > { %1800 = vrsqrt.f32 %v586_v10  ;;  %v571_v11 = vmul.f32 0.00390625, %v527_v32  ;;  %v572_v18 = vmul.f32 0.00390625, %v530_v33  ;;  %v2691_v10 = vrot.slane %v392_v15, %v2676_v27 }
 0x199   : > { %v587_v21 = vadd.f32 1e-05, %v571_v11  ;;  %v588_v29 = vadd.f32 1e-05, %v572_v18  ;;  %v2695_v11 = vrot.slane %v392_v15, %v2678_v14 }
 0x19a   : > { %v533_v40 = vpop.xlane.xlu1 %532  ;;  %v536_v5 = vpop.xlane.xlu0 %535 }
 0x19b   : > { %1802 = vrsqrt.f32 %v587_v21  ;;  %v573_v36 = vmul.f32 0.00390625, %v533_v40  ;;  %v574_v6 = vmul.f32 0.00390625, %v536_v5 }
 0x19c   : > { %1804 = vrsqrt.f32 %v588_v29 }
 0x19d   : > { %v589_v24 = vadd.f32 1e-05, %v573_v36  ;;  %v590_v41 = vadd.f32 1e-05, %v574_v6 }
 0x19e   : > { %v539_v38 = vpop.xlane.xlu1 %538  ;;  %v542_v39 = vpop.xlane.xlu0 %541 }
 0x19f   : > { %1806 = vrsqrt.f32 %v589_v24  ;;  %v575_v25 = vmul.f32 0.00390625, %v539_v38  ;;  %v576_v26 = vmul.f32 0.00390625, %v542_v39 }
 0x1a0   : > { %1808 = vrsqrt.f32 %v590_v41 }
 0x1a1   : > { %v591_v42 = vadd.f32 1e-05, %v575_v25  ;;  %v592_v57 = vadd.f32 1e-05, %v576_v26 }
 0x1a2   : > { %v545_v43 = vpop.xlane.xlu1 %544  ;;  %v548_v3 = vpop.xlane.xlu0 %547 }
 0x1a3   : > { %1810 = vrsqrt.f32 %v591_v42  ;;  %v577_v44 = vmul.f32 0.00390625, %v545_v43  ;;  %v578_v20 = vmul.f32 0.00390625, %v548_v3 }
 0x1a4   : > { %v1801_v30 = vpop.eup %1800  ;;  %1812 = vrsqrt.f32 %v592_v57 }
 0x1a5   : > { %v619_v7 = vmul.f32 %v1801_v30, %v2520_v60  ;;  %v618_v32 = vmul.f32 %v1801_v30, %v2517_v59  ;;  %v593_v18 = vadd.f32 1e-05, %v577_v44  ;;  %v594_v39 = vadd.f32 1e-05, %v578_v20 }
 0x1a6   : > { %v551_v33 = vpop.xlane.xlu1 %550  ;;  %v554_v37 = vpop.xlane.xlu0 %553 }
 0x1a7   : > { %v662_v21 = vmul.f32 %v2684_v45, %v619_v7  ;;  %v661_v40 = vmul.f32 %v2687_v31, %v618_v32  ;;  %v579_v36 = vmul.f32 0.00390625, %v551_v33  ;;  %1814 = vrsqrt.f32 %v593_v18 }
 0x1a8   : > { %v1803_v29 = vpop.eup %1802  ;;  %v580_v43 = vmul.f32 0.00390625, %v554_v37  ;;  %1816 = vrsqrt.f32 %v594_v39 }
 0x1a9   : > { %v1805_v5 = vpop.eup %1804  ;;  %v705_v60 = vadd.f32 %v2691_v10, %v662_v21  ;;  %v621_v6 = vmul.f32 %v1803_v29, %v2540_v4  ;;  %v704_v59 = vadd.f32 %v2695_v11, %v661_v40  ;;  %v620_v24 = vmul.f32 %v1803_v29, %v2537_v16 }
 0x1aa   : > { %v623_v41 = vmul.f32 %v1805_v5, %v2526_v62  ;;  %v622_v38 = vmul.f32 %v1805_v5, %v2523_v61  ;;  %v595_v62 = vadd.f32 1e-05, %v579_v36  ;;  %v557_v32 = vpop.xlane.xlu1 %556  ;;  %v596_v18 = vadd.f32 1e-05, %v580_v43 }
 0x1ab   : > { %876 = vmatprep.mubr.f32.mxu0 %v705_v60  ;;  %v664_v25 = vmul.f32 %v2684_v45, %v621_v6  ;;  %v663_v12 = vmul.f32 %v2687_v31, %v620_v24  ;;  %v581_v29 = vmul.f32 0.00390625, %v557_v32 }
 0x1ac   : > { %v1807_v26 = vpop.eup %1806  ;;  %877 = vmatmul.mubr.f32.vlgmr.msra.gmra.mxu0 %v704_v59  ;;  %v666_v4 = vmul.f32 %v2684_v45, %v623_v41  ;;  %v665_v57 = vmul.f32 %v2687_v31, %v622_v38  ;;  %1818 = vrsqrt.f32 %v595_v62 }
 0x1ad   : > { %v1809_v42 = vpop.eup %1808  ;;  %v707_v15 = vadd.f32 %v2691_v10, %v664_v25  ;;  %v625_v16 = vmul.f32 %v1807_v26, %v2546_v23  ;;  %v706_v61 = vadd.f32 %v2695_v11, %v663_v12  ;;  %v624_v44 = vmul.f32 %v1807_v26, %v2543_v22  ;;  %v560_v23 = vpop.xlane.xlu0 %559 }
 0x1ae   : > { %v709_v30 = vadd.f32 %v2691_v10, %v666_v4  ;;  %v627_v33 = vmul.f32 %v1809_v42, %v2560_v46  ;;  %v708_v20 = vadd.f32 %v2695_v11, %v665_v57  ;;  %v626_v22 = vmul.f32 %v1809_v42, %v2557_v9  ;;  %v563_v9 = vpop.xlane.xlu1 %562 }
 0x1af   : > { %882 = vmatprep.mubr.f32.mxu0 %v707_v15  ;;  %v668_v3 = vmul.f32 %v2684_v45, %v625_v16  ;;  %v667_v21 = vmul.f32 %v2687_v31, %v624_v44  ;;  %v582_v46 = vmul.f32 0.00390625, %v560_v23  ;;  %1820 = vrsqrt.f32 %v596_v18 }
 0x1b0   : > { %v1811_v7 = vpop.eup %1810  ;;  %883 = vmatmul.mubr.f32.gmra.mxu0 %v706_v61  ;;  %v670_v5 = vmul.f32 %v2684_v45, %v627_v33  ;;  %v669_v37 = vmul.f32 %v2687_v31, %v626_v22  ;;  %v597_v24 = vadd.f32 1e-05, %v581_v29  ;;  %v583_v26 = vmul.f32 0.00390625, %v563_v9 }
 0x1b1   : > { %888 = vmatprep.mubr.f32.mxu0 %v709_v30  ;;  %v711_v40 = vadd.f32 %v2691_v10, %v668_v3  ;;  %v629_v36 = vmul.f32 %v1811_v7, %v2566_v49  ;;  %v1813_v60 = vpop.eup %1812  ;;  %v710_v6 = vadd.f32 %v2695_v11, %v667_v21  ;;  %v628_v59 = vmul.f32 %v1811_v7, %v2563_v48  ;;  %v566_v12 = vpop.xlane.xlu0 %565 }
 0x1b2   : > { %v713_v41 = vadd.f32 %v2691_v10, %v670_v5  ;;  %v631_v39 = vmul.f32 %v1813_v60, %v2580_v56  ;;  %v598_v25 = vadd.f32 1e-05, %v582_v46  ;;  %v712_v4 = vadd.f32 %v2695_v11, %v669_v37 }
 0x1b3   : > { %v672_v38 = vmul.f32 %v2684_v45, %v629_v36  ;;  %v671_v42 = vmul.f32 %v2687_v31, %v628_v59  ;;  %v630_v48 = vmul.f32 %v1813_v60, %v2577_v55  ;;  %1822 = vrsqrt.f32 %v597_v24 }
 0x1b4   : > { %889 = vmatmul.mubr.f32.gmra.mxu0 %v708_v20  ;;  %v1815_v49 = vpop.eup %1814  ;;  %v674_v15 = vmul.f32 %v2684_v45, %v631_v39  ;;  %v584_v62 = vmul.f32 0.00390625, %v566_v12  ;;  %v599_v61 = vadd.f32 1e-05, %v583_v26  ;;  %1824 = vrsqrt.f32 %v598_v25 }
 0x1b5   : > { %894 = vmatprep.mubr.f32.mxu0 %v711_v40  ;;  %v715_v43 = vadd.f32 %v2691_v10, %v672_v38  ;;  %v633_v16 = vmul.f32 %v1815_v49, %v2586_v63  ;;  %v1817_v56 = vpop.eup %1816  ;;  %v714_v57 = vadd.f32 %v2695_v11, %v671_v42  ;;  %v673_v44 = vmul.f32 %v2687_v31, %v630_v48  ;;  %v569_v63 = vpop.xlane.xlu1 %568 }
 0x1b6   : > { %v632_v30 = vmul.f32 %v1815_v49, %v2583_v58  ;;  %v717_v55 = vadd.f32 %v2691_v10, %v674_v15  ;;  %v635_v32 = vmul.f32 %v1817_v56, %v2600_v17  ;;  %v600_v33 = vadd.f32 1e-05, %v584_v62 }
 0x1b7   : > { %v676_v7 = vmul.f32 %v2684_v45, %v633_v16  ;;  %1826 = vrsqrt.f32 %v599_v61  ;;  %v716_v18 = vadd.f32 %v2695_v11, %v673_v44  ;;  %v634_v20 = vmul.f32 %v1817_v56, %v2597_v2 }
 0x1b8   : > { %895 = vmatmul.mubr.f32.gmra.mxu0 %v710_v6  ;;  %v675_v23 = vmul.f32 %v2687_v31, %v632_v30  ;;  %v585_v21 = vmul.f32 0.00390625, %v569_v63  ;;  %v678_v29 = vmul.f32 %v2684_v45, %v635_v32  ;;  %1828 = vrsqrt.f32 %v600_v33 }
 0x1b9   : > { %900 = vmatprep.mubr.f32.mxu0 %v713_v41  ;;  %v1819_v3 = vpop.eup %1818  ;;  %v719_v22 = vadd.f32 %v2691_v10, %v676_v7  ;;  %v677_v5 = vmul.f32 %v2687_v31, %v634_v20  ;;  %v1238_v20 = vld [vmem:[#allocation8 + $0x48] sm:$0xff] }
 0x1ba   : > { %v637_v40 = vmul.f32 %v1819_v3, %v2606_v35  ;;  %v718_v17 = vadd.f32 %v2695_v11, %v675_v23  ;;  %v636_v36 = vmul.f32 %v1819_v3, %v2603_v34  ;;  %v601_v60 = vadd.f32 1e-05, %v585_v21  ;;  %1327 = vmatprep.subr.mxu1 %v1238_v20  ;;  %v1234_v21 = vld [vmem:[#allocation8 + $0x28] sm:$0xff] }
 0x1bb   : > { %v721_v2 = vadd.f32 %v2691_v10, %v678_v29  ;;  %v720_v35 = vadd.f32 %v2695_v11, %v677_v5  ;;  %v1230_v29 = vld [vmem:[#allocation8 + $0x8] sm:$0xff] }
 0x1bc   : > { %901 = vmatmul.mubr.f32.gmra.mxu0 %v712_v4  ;;  %v1821_v58 = vpop.eup %1820  ;;  %v680_v46 = vmul.f32 %v2684_v45, %v637_v40  ;;  %v679_v59 = vmul.f32 %v2687_v31, %v636_v36  ;;  %1830 = vrsqrt.f32 %v601_v60  ;;  %v1292_v40 = vld [vmem:[#allocation8 + $0x1f8] sm:$0xff]  ;;  %v1290_v5 = vld [vmem:[#allocation8 + $0x1e8] sm:$0xff]  ;;  %v1289_v36 = vld [vmem:[#allocation8 + $0x1e0] sm:$0xff] }
 0x1bd   : > { %906 = vmatprep.mubr.f32.mxu0 %v715_v43  ;;  %v639_v6 = vmul.f32 %v1821_v58, %v2620_v52  ;;  %v638_v24 = vmul.f32 %v1821_v58, %v2617_v51  ;;  %v1236_v58 = vld [vmem:[#allocation8 + $0x38] sm:$0xff] }
 0x1be   : > { %v723_v9 = vadd.f32 %v2691_v10, %v680_v46  ;;  %v722_v52 = vadd.f32 %v2695_v11, %v679_v59  ;;  %v1288_v60 = vld [vmem:[#allocation8 + $0x1d8] sm:$0xff]  ;;  %v1286_v46 = vld [vmem:[#allocation8 + $0x1c8] sm:$0xff] }
 0x1bf   : > { %v682_v34 = vmul.f32 %v2684_v45, %v639_v6  ;;  %v681_v39 = vmul.f32 %v2687_v31, %v638_v24  ;;  %v1285_v6 = vld [vmem:[#allocation8 + $0x1c0] sm:$0xff]  ;;  %v1282_v59 = vld [vmem:[#allocation8 + $0x1a8] sm:$0xff] }
 0x1c0   : > { %907 = vmatmul.mubr.f32.gmra.mxu0 %v714_v57  ;;  %v1823_v37 = vpop.eup %1822  ;;  %v1281_v24 = vld [vmem:[#allocation8 + $0x1a0] sm:$0xff] }
 0x1c1   : > { %912 = vmatprep.mubr.f32.mxu0 %v717_v55  ;;  %v641_v41 = vmul.f32 %v1823_v37, %v2626_v54  ;;  %v1825_v38 = vpop.eup %1824  ;;  %v640_v49 = vmul.f32 %v1823_v37, %v2623_v13  ;;  %v725_v26 = vadd.f32 %v2691_v10, %v682_v34  ;;  %v724_v54 = vadd.f32 %v2695_v11, %v681_v39  ;;  %v1284_v37 = vld [vmem:[#allocation8 + $0x1b8] sm:$0xff]  ;;  %v1279_v34 = vld [vmem:[#allocation8 + $0x190] sm:$0xff] }
 0x1c2   : > { %v643_v12 = vmul.f32 %v1825_v38, %v2640_v0  ;;  %v642_v42 = vmul.f32 %v1825_v38, %v2637_v19  ;;  %v1277_v38 = vld [vmem:[#allocation8 + $0x180] sm:$0xff]  ;;  %v1275_v39 = vld [vmem:[#allocation8 + $0x170] sm:$0xff] }
 0x1c3   : > { %v684_v51 = vmul.f32 %v2684_v45, %v641_v41  ;;  %v683_v4 = vmul.f32 %v2687_v31, %v640_v49  ;;  %v1278_v41 = vld [vmem:[#allocation8 + $0x188] sm:$0xff] }
 0x1c4   : > { %913 = vmatmul.mubr.f32.gmra.mxu0 %v716_v18  ;;  %v1827_v25 = vpop.eup %1826  ;;  %v686_v13 = vmul.f32 %v2684_v45, %v643_v12  ;;  %v685_v0 = vmul.f32 %v2687_v31, %v642_v42  ;;  %v1274_v49 = vld [vmem:[#allocation8 + $0x168] sm:$0xff]  ;;  %v1267_v42 = vld [vmem:[#allocation8 + $0x130] sm:$0xff] }
 0x1c5   : > { %918 = vmatprep.mubr.f32.mxu0 %v719_v22  ;;  %v1829_v48 = vpop.eup %1828  ;;  %v727_v43 = vadd.f32 %v2691_v10, %v684_v51  ;;  %v645_v15 = vmul.f32 %v1827_v25, %v2646_v28  ;;  %v726_v16 = vadd.f32 %v2695_v11, %v683_v4  ;;  %v644_v56 = vmul.f32 %v1827_v25, %v2643_v1  ;;  %v1233_v22 = vld [vmem:[#allocation8 + $0x20] sm:$0xff]  ;;  %v1271_v51 = vld [vmem:[#allocation8 + $0x150] sm:$0xff]  ;;  %v1270_v12 = vld [vmem:[#allocation8 + $0x148] sm:$0xff] }
 0x1c6   : > { %v729_v62 = vadd.f32 %v2691_v10, %v686_v13  ;;  %v647_v19 = vmul.f32 %v1829_v48, %v2660_v47  ;;  %v728_v44 = vadd.f32 %v2695_v11, %v685_v0  ;;  %v646_v30 = vmul.f32 %v1829_v48, %v2657_v8  ;;  %v1273_v25 = vld [vmem:[#allocation8 + $0x160] sm:$0xff]  ;;  %v1268_v4 = vld [vmem:[#allocation8 + $0x138] sm:$0xff]  ;;  %v1266_v48 = vld [vmem:[#allocation8 + $0x128] sm:$0xff] }
 0x1c7   : > { %v688_v61 = vmul.f32 %v2684_v45, %v645_v15  ;;  %v687_v28 = vmul.f32 %v2687_v31, %v644_v56  ;;  %v1264_v13 = vld [vmem:[#allocation8 + $0x118] sm:$0xff]  ;;  %v1263_v15 = vld [vmem:[#allocation8 + $0x110] sm:$0xff]  ;;  %v1261_v0 = vld [vmem:[#allocation8 + $0x100] sm:$0xff] }
 0x1c8   : > { %919 = vmatmul.mubr.f32.gmra.mxu0 %v718_v17  ;;  %v690_v55 = vmul.f32 %v2684_v45, %v647_v19  ;;  %v689_v47 = vmul.f32 %v2687_v31, %v646_v30  ;;  %v1291_v17 = vld [vmem:[#allocation8 + $0x1f0] sm:$0xff]  ;;  %v800_v56 = vld [vmem:[%s3135_s4] sm:$0x3] }
 0x1c9   : > { %924 = vmatprep.mubr.f32.mxu0 %v721_v2  ;;  %v1831_v57 = vpop.eup %1830  ;;  %v731_v3 = vadd.f32 %v2691_v10, %v688_v61  ;;  %v730_v7 = vadd.f32 %v2695_v11, %v687_v28  ;;  %v1287_v2 = vld [vmem:[#allocation8 + $0x1d0] sm:$0xff]  ;;  %v2798_v61 = vrot.slane %v800_v56, %v2676_v27 }
 0x1ca   : > { %v649_v1 = vmul.f32 %v1831_v57, %v2666_v53  ;;  %v648_v32 = vmul.f32 %v1831_v57, %v2663_v50  ;;  %v733_v63 = vadd.f32 %v2691_v10, %v690_v55  ;;  %v732_v8 = vadd.f32 %v2695_v11, %v689_v47  ;;  %v1237_v50 = vld [vmem:[#allocation8 + $0x40] sm:$0xff] }
 0x1cb   : > { %1328 = vmatpush1.msra.mxu1 %v1237_v50 }
 0x1cc   : > { %925 = vmatmul.mubr.f32.gmra.mxu0 %v720_v35  ;;  %v692_v33 = vmul.f32 %v2684_v45, %v649_v1  ;;  %v691_v18 = vmul.f32 %v2687_v31, %v648_v32  ;;  %1329 = vmatprep.subr.mxu1 %v1236_v58  ;;  %v1235_v45 = vld [vmem:[#allocation8 + $0x30] sm:$0xff]  ;;  %v1232_v31 = vld [vmem:[#allocation8 + $0x18] sm:$0xff] }
 0x1cd   : > { %930 = vmatprep.mubr.f32.mxu0 %v723_v9  ;;  %1330 = vmatpush1.msra.mxu1 %v1235_v45  ;;  %v1283_v35 = vld [vmem:[#allocation8 + $0x1b0] sm:$0xff]  ;;  %v1280_v9 = vld [vmem:[#allocation8 + $0x198] sm:$0xff] }
 0x1ce   : > { %v735_v53 = vadd.f32 %v2691_v10, %v692_v33  ;;  %v734_v23 = vadd.f32 %v2695_v11, %v691_v18  ;;  %1331 = vmatprep.subr.mxu1 %v1234_v21  ;;  %v1231_v10 = vld [vmem:[#allocation8 + $0x10] sm:$0xff]  ;;  %v1229_v11 = vld [vmem:[#allocation8] sm:$0xff] }
 0x1cf   : > { %1332 = vmatpush1.msra.mxu1 %v1233_v22 }
 0x1d0   : > { %931 = vmatmul.mubr.f32.gmra.mxu0 %v722_v52  ;;  %1333 = vmatprep.subr.mxu1 %v1232_v31  ;;  %v1276_v52 = vld [vmem:[#allocation8 + $0x178] sm:$0xff] }
 0x1d1   : > { %936 = vmatprep.mubr.f32.mxu0 %v725_v26  ;;  %1334 = vmatpush1.msra.mxu1 %v1231_v10  ;;  %v1272_v26 = vld [vmem:[#allocation8 + $0x158] sm:$0xff] }
 0x1d2   : > { %1335 = vmatprep.subr.mxu1 %v1230_v29 }
 0x1d3   : > { %1336 = vmatpush1.msra.mxu1 %v1229_v11 }
 0x1d4   : > { %937 = vmatmul.mubr.f32.gmra.mxu0 %v724_v54  ;;  %1337 = vmatprep.subr.mxu1 %v1292_v40  ;;  %v1269_v54 = vld [vmem:[#allocation8 + $0x140] sm:$0xff] }
 0x1d5   : > { %942 = vmatprep.mubr.f32.mxu0 %v727_v43  ;;  %1338 = vmatpush2.msra.mxu1 %v1291_v17  ;;  %v1265_v43 = vld [vmem:[#allocation8 + $0x120] sm:$0xff] }
 0x1d6   : > { %1339 = vmatprep.subr.mxu1 %v1290_v5 }
 0x1d7   : > { %1340 = vmatpush2.msra.mxu1 %v1289_v36 }
 0x1d8   : > { %943 = vmatmul.mubr.f32.gmra.mxu0 %v726_v16  ;;  %1341 = vmatprep.subr.mxu1 %v1288_v60  ;;  %v1262_v16 = vld [vmem:[#allocation8 + $0x108] sm:$0xff] }
 0x1d9   : > { %948 = vmatprep.mubr.f32.mxu0 %v729_v62  ;;  %1342 = vmatpush2.msra.mxu1 %v1287_v2  ;;  %v2795_v62 = vrot.slane %v800_v56, %v2678_v14 }
 0x1da   : > { %1343 = vmatprep.subr.mxu1 %v1286_v46 }
 0x1db   : > { %1344 = vmatpush2.msra.mxu1 %v1285_v6 }
 0x1dc   : > { %949 = vmatmul.mubr.f32.gmra.mxu0 %v728_v44  ;;  %1345 = vmatprep.subr.mxu1 %v1284_v37 }
 0x1dd   : > { %954 = vmatprep.mubr.f32.mxu0 %v731_v3  ;;  %1346 = vmatpush2.msra.mxu1 %v1283_v35 }
 0x1de   : > { %1347 = vmatprep.subr.mxu1 %v1282_v59 }
 0x1df   : > { %1348 = vmatpush2.msra.mxu1 %v1281_v24 }
 0x1e0   : > { %955 = vmatmul.mubr.f32.gmra.mxu0 %v730_v7  ;;  %1349 = vmatprep.subr.mxu1 %v1280_v9 }
 0x1e1   : > { %960 = vmatprep.mubr.f32.mxu0 %v733_v63  ;;  %1350 = vmatpush2.msra.mxu1 %v1279_v34 }
 0x1e2   : > { %1351 = vmatprep.subr.mxu1 %v1278_v41 }
 0x1e3   : > { %1352 = vmatpush2.msra.mxu1 %v1277_v38 }
 0x1e4   : > { %961 = vmatmul.mubr.f32.gmra.mxu0 %v732_v8  ;;  %1353 = vmatprep.subr.mxu1 %v1276_v52 }
 0x1e5   : > { %966 = vmatprep.mubr.f32.mxu0 %v735_v53  ;;  %1354 = vmatpush2.msra.mxu1 %v1275_v39 }
 0x1e6   : > { %1355 = vmatprep.subr.mxu1 %v1274_v49 }
 0x1e7   : > { %1356 = vmatpush2.msra.mxu1 %v1273_v25 }
 0x1e8   : > { %967 = vmatmul.mubr.f32.gmra.mxu0 %v734_v23  ;;  %1357 = vmatprep.subr.mxu1 %v1272_v26 }
 0x1e9   : > { %1358 = vmatpush2.msra.mxu1 %v1271_v51 }
 0x1ea   : > { %1359 = vmatprep.subr.mxu1 %v1270_v12 }
 0x1eb   : > { %1360 = vmatpush2.msra.mxu1 %v1269_v54 }
 0x1ec   : > { %1361 = vmatprep.subr.mxu1 %v1268_v4 }
 0x1ed   : > { %1362 = vmatpush2.msra.mxu1 %v1267_v42 }
 0x1ee   : > { %1363 = vmatprep.subr.mxu1 %v1266_v48 }
 0x1ef   : > { %1364 = vmatpush2.msra.mxu1 %v1265_v43 }
 0x1f0   : > { %1365 = vmatprep.subr.mxu1 %v1264_v13 }
 0x1f1   : > { %1366 = vmatpush2.msra.mxu1 %v1263_v15 }
 0x1f2   : > { %1367 = vmatprep.subr.mxu1 %v1262_v16 }
 0x1f3   : > { %1368 = vmatpush2.msra.mxu1 %v1261_v0 }
 0x26c   : > { %v878_v19 = vpop.f32.mrf.mxu0 }
 0x26d   : > { %v2801_v57 = vadd.f32 %v878_v19, %v2795_v62 }
 0x26e   : > { %v880_v44 = vpop.f32.mrf.mxu0 }
 0x26f   : > { %v1675_v28 = vmul.f32 -1.702, %v2801_v57  ;;  %v2805_v30 = vadd.f32 %v880_v44, %v2798_v61 }
 0x270   : > { %v884_v3 = vpop.f32.mrf.mxu0 }
 0x271   : > { %v1037_v55 = vmul.f32 1.442695, %v1675_v28  ;;  %v1676_v1 = vmul.f32 -1.702, %v2805_v30  ;;  %v2809_v7 = vadd.f32 %v884_v3, %v2795_v62 }
 0x272   : > { %v886_v47 = vpop.f32.mrf.mxu0 }
 0x273   : > { %1832 = vpow2.f32 %v1037_v55  ;;  %v1039_v32 = vmul.f32 1.442695, %v1676_v1  ;;  %v1677_v63 = vmul.f32 -1.702, %v2809_v7  ;;  %v2813_v33 = vadd.f32 %v886_v47, %v2798_v61 }
 0x274   : > { %v890_v8 = vpop.f32.mrf.mxu0 }
 0x275   : > { %1834 = vpow2.f32 %v1039_v32  ;;  %v1041_v18 = vmul.f32 1.442695, %v1677_v63  ;;  %v1678_v53 = vmul.f32 -1.702, %v2813_v33  ;;  %v2817_v23 = vadd.f32 %v890_v8, %v2795_v62 }
 0x276   : > { %v892_v20 = vpop.f32.mrf.mxu0 }
 0x277   : > { %1836 = vpow2.f32 %v1041_v18  ;;  %v1043_v50 = vmul.f32 1.442695, %v1678_v53  ;;  %v1679_v58 = vmul.f32 -1.702, %v2817_v23  ;;  %v2821_v45 = vadd.f32 %v892_v20, %v2798_v61 }
 0x278   : > { %v896_v21 = vpop.f32.mrf.mxu0 }
 0x279   : > { %1838 = vpow2.f32 %v1043_v50  ;;  %v1045_v22 = vmul.f32 1.442695, %v1679_v58  ;;  %v1680_v31 = vmul.f32 -1.702, %v2821_v45  ;;  %v2825_v10 = vadd.f32 %v896_v21, %v2795_v62 }
 0x27a   : > { %v898_v29 = vpop.f32.mrf.mxu0 }
 0x27b   : > { %1840 = vpow2.f32 %v1045_v22  ;;  %v1047_v11 = vmul.f32 1.442695, %v1680_v31  ;;  %v1681_v40 = vmul.f32 -1.702, %v2825_v10  ;;  %v2829_v17 = vadd.f32 %v898_v29, %v2798_v61 }
 0x27c   : > { %v902_v5 = vpop.f32.mrf.mxu0 }
 0x27d   : > { %1842 = vpow2.f32 %v1047_v11  ;;  %v1049_v36 = vmul.f32 1.442695, %v1681_v40  ;;  %v1682_v60 = vmul.f32 -1.702, %v2829_v17  ;;  %v2833_v2 = vadd.f32 %v902_v5, %v2795_v62 }
 0x27e   : > { %v904_v46 = vpop.f32.mrf.mxu0 }
 0x27f   : > { %1844 = vpow2.f32 %v1049_v36  ;;  %v1051_v6 = vmul.f32 1.442695, %v1682_v60  ;;  %v1683_v37 = vmul.f32 -1.702, %v2833_v2  ;;  %v2837_v35 = vadd.f32 %v904_v46, %v2798_v61 }
 0x280   : > { %v1833_v59 = vpop.eup %1832  ;;  %v908_v24 = vpop.f32.mrf.mxu0 }
 0x281   : > { %v1101_v9 = vadd.f32 1.0, %v1833_v59  ;;  %1846 = vpow2.f32 %v1051_v6  ;;  %v1053_v34 = vmul.f32 1.442695, %v1683_v37  ;;  %v1684_v41 = vmul.f32 -1.702, %v2837_v35 }
 0x282   : > { %v1835_v38 = vpop.eup %1834  ;;  %v2841_v52 = vadd.f32 %v908_v24, %v2795_v62  ;;  %v910_v39 = vpop.f32.mrf.mxu0 }
 0x283   : > { %1848 = vrcp.f32 %v1101_v9  ;;  %v1102_v49 = vadd.f32 1.0, %v1835_v38  ;;  %v1055_v25 = vmul.f32 1.442695, %v1684_v41  ;;  %v2844_v26 = vadd.f32 %v910_v39, %v2798_v61 }
 0x284   : > { %v1837_v51 = vpop.eup %1836  ;;  %1850 = vpow2.f32 %v1053_v34  ;;  %v1685_v12 = vmul.f32 -1.702, %v2841_v52  ;;  %v914_v54 = vpop.f32.mrf.mxu0 }
 0x285   : > { %1852 = vrcp.f32 %v1102_v49  ;;  %v1103_v4 = vadd.f32 1.0, %v1837_v51  ;;  %v1686_v42 = vmul.f32 -1.702, %v2844_v26  ;;  %v2849_v48 = vadd.f32 %v914_v54, %v2795_v62 }
 0x286   : > { %v1839_v43 = vpop.eup %1838  ;;  %1854 = vpow2.f32 %v1055_v25  ;;  %v1057_v13 = vmul.f32 1.442695, %v1685_v12  ;;  %v916_v15 = vpop.f32.mrf.mxu0 }
 0x287   : > { %1856 = vrcp.f32 %v1103_v4  ;;  %v1104_v16 = vadd.f32 1.0, %v1839_v43  ;;  %v1059_v0 = vmul.f32 1.442695, %v1686_v42  ;;  %v1687_v56 = vmul.f32 -1.702, %v2849_v48 }
 0x288   : > { %v1841_v19 = vpop.eup %1840  ;;  %1858 = vpow2.f32 %v1057_v13  ;;  %v2853_v44 = vadd.f32 %v916_v15, %v2798_v61  ;;  %v920_v28 = vpop.f32.mrf.mxu0 }
 0x289   : > { %1860 = vrcp.f32 %v1104_v16  ;;  %v1105_v3 = vadd.f32 1.0, %v1841_v19  ;;  %v1061_v55 = vmul.f32 1.442695, %v1687_v56  ;;  %v2856_v1 = vadd.f32 %v920_v28, %v2795_v62 }
 0x28a   : > { %v1843_v47 = vpop.eup %1842  ;;  %1862 = vpow2.f32 %v1059_v0  ;;  %v1688_v32 = vmul.f32 -1.702, %v2853_v44  ;;  %v922_v63 = vpop.f32.mrf.mxu0 }
 0x28b   : > { %1864 = vrcp.f32 %v1105_v3  ;;  %v1106_v8 = vadd.f32 1.0, %v1843_v47  ;;  %v1689_v18 = vmul.f32 -1.702, %v2856_v1  ;;  %v2861_v53 = vadd.f32 %v922_v63, %v2798_v61 }
 0x28c   : > { %v1845_v20 = vpop.eup %1844  ;;  %1866 = vpow2.f32 %v1061_v55  ;;  %v1063_v50 = vmul.f32 1.442695, %v1688_v32  ;;  %v926_v58 = vpop.f32.mrf.mxu0 }
 0x28d   : > { %1868 = vrcp.f32 %v1106_v8  ;;  %v1107_v21 = vadd.f32 1.0, %v1845_v20  ;;  %v1065_v22 = vmul.f32 1.442695, %v1689_v18  ;;  %v1690_v31 = vmul.f32 -1.702, %v2861_v53 }
 0x28e   : > { %v1847_v29 = vpop.eup %1846  ;;  %1870 = vpow2.f32 %v1063_v50  ;;  %v2865_v11 = vadd.f32 %v926_v58, %v2795_v62  ;;  %v928_v40 = vpop.f32.mrf.mxu0 }
 0x28f   : > { %1872 = vrcp.f32 %v1107_v21  ;;  %v1108_v5 = vadd.f32 1.0, %v1847_v29  ;;  %v1067_v36 = vmul.f32 1.442695, %v1690_v31  ;;  %v2868_v60 = vadd.f32 %v928_v40, %v2798_v61 }
 0x290   : > { %v1849_v46 = vpop.eup %1848  ;;  %1874 = vpow2.f32 %v1065_v22  ;;  %v1691_v6 = vmul.f32 -1.702, %v2865_v11  ;;  %v932_v37 = vpop.f32.mrf.mxu0 }
 0x291   : > { %v1851_v59 = vpop.eup %1850  ;;  %1876 = vrcp.f32 %v1108_v5  ;;  %v1692_v24 = vmul.f32 -1.702, %v2868_v60  ;;  %v2873_v9 = vadd.f32 %v932_v37, %v2795_v62  ;;  %v1197_v42 = vmul.f32 %v1849_v46, %v2801_v57 }
 0x292   : > { %v1853_v34 = vpop.eup %1852  ;;  %v1109_v41 = vadd.f32 1.0, %v1851_v59  ;;  %1878 = vpow2.f32 %v1067_v36  ;;  %v1069_v38 = vmul.f32 1.442695, %v1691_v6  ;;  %v934_v39 = vpop.f32.mrf.mxu0 }
 0x293   : > { %v1855_v49 = vpop.eup %1854  ;;  %v1071_v25 = vmul.f32 1.442695, %v1692_v24  ;;  %v1693_v51 = vmul.f32 -1.702, %v2873_v9  ;;  %v2877_v12 = vadd.f32 %v934_v39, %v2798_v61  ;;  %v1198_v54 = vmul.f32 %v1853_v34, %v2805_v30 }
 0x294   : > { %v1857_v4 = vpop.eup %1856  ;;  %1880 = vrcp.f32 %v1109_v41  ;;  %v1110_v43 = vadd.f32 1.0, %v1855_v49  ;;  %v938_v13 = vpop.f32.mrf.mxu0 }
 0x295   : > { %v1859_v15 = vpop.eup %1858  ;;  %1882 = vpow2.f32 %v1069_v38  ;;  %v1073_v16 = vmul.f32 1.442695, %v1693_v51  ;;  %v1694_v0 = vmul.f32 -1.702, %v2877_v12  ;;  %1369 = vmatprep.mubr.f32.mxu1 %v1198_v54  ;;  %v2883_v28 = vadd.f32 %v938_v13, %v2795_v62 }
 0x296   : > { %v1861_v56 = vpop.eup %1860  ;;  %1884 = vrcp.f32 %v1110_v43  ;;  %v1111_v19 = vadd.f32 1.0, %v1859_v15  ;;  %v940_v3 = vpop.f32.mrf.mxu0  ;;  %1370 = vmatmul.mubr.f32.vlgmr.msra.gmra.mxu1 %v1197_v42  ;;  %v1199_v63 = vmul.f32 %v1857_v4, %v2809_v7 }
 0x297   : > { %v1863_v30 = vpop.eup %1862  ;;  %v1200_v57 = vmul.f32 %v1861_v56, %v2813_v33  ;;  %1886 = vpow2.f32 %v1071_v25  ;;  %v1075_v55 = vmul.f32 1.442695, %v1694_v0  ;;  %v2887_v47 = vadd.f32 %v940_v3, %v2798_v61 }
 0x298   : > { %v1865_v32 = vpop.eup %1864  ;;  %1888 = vrcp.f32 %v1111_v19  ;;  %v1112_v8 = vadd.f32 1.0, %v1863_v30  ;;  %v1695_v18 = vmul.f32 -1.702, %v2883_v28  ;;  %v944_v20 = vpop.f32.mrf.mxu0 }
 0x299   : > { %v1867_v50 = vpop.eup %1866  ;;  %1890 = vpow2.f32 %v1073_v16  ;;  %v1696_v58 = vmul.f32 -1.702, %v2887_v47  ;;  %v2893_v21 = vadd.f32 %v944_v20, %v2795_v62  ;;  %1375 = vmatprep.mubr.f32.mxu1 %v1200_v57  ;;  %v1201_v6 = vmul.f32 %v1865_v32, %v2817_v23 }
 0x29a   : > { %v1869_v33 = vpop.eup %1868  ;;  %1892 = vrcp.f32 %v1112_v8  ;;  %v1113_v22 = vadd.f32 1.0, %v1867_v50  ;;  %v1077_v31 = vmul.f32 1.442695, %v1695_v18  ;;  %v946_v29 = vpop.f32.mrf.mxu0  ;;  %1376 = vmatmul.mubr.f32.gmra.mxu1 %v1199_v63 }
 0x29b   : > { %v1871_v7 = vpop.eup %1870  ;;  %v1202_v40 = vmul.f32 %v1869_v33, %v2821_v45  ;;  %1894 = vpow2.f32 %v1075_v55  ;;  %v1079_v5 = vmul.f32 1.442695, %v1696_v58  ;;  %v1697_v36 = vmul.f32 -1.702, %v2893_v21 }
 0x29c   : > { %v1873_v46 = vpop.eup %1872  ;;  %1896 = vrcp.f32 %v1113_v22  ;;  %v1114_v37 = vadd.f32 1.0, %v1871_v7  ;;  %v2899_v59 = vadd.f32 %v946_v29, %v2798_v61  ;;  %v950_v24 = vpop.f32.mrf.mxu0 }
 0x29d   : > { %v1875_v34 = vpop.eup %1874  ;;  %1898 = vpow2.f32 %v1077_v31  ;;  %v1081_v41 = vmul.f32 1.442695, %v1697_v36  ;;  %v2902_v38 = vadd.f32 %v950_v24, %v2795_v62  ;;  %1381 = vmatprep.mubr.f32.mxu1 %v1202_v40  ;;  %v1203_v42 = vmul.f32 %v1873_v46, %v2825_v10 }
 0x29e   : > { %v1877_v45 = vpop.eup %1876  ;;  %1900 = vrcp.f32 %v1114_v37  ;;  %v1115_v39 = vadd.f32 1.0, %v1875_v34  ;;  %v1698_v49 = vmul.f32 -1.702, %v2899_v59  ;;  %v952_v25 = vpop.f32.mrf.mxu0  ;;  %1382 = vmatmul.mubr.f32.gmra.mxu1 %v1201_v6 }
 0x29f   : > { %v1879_v23 = vpop.eup %1878  ;;  %v1204_v51 = vmul.f32 %v1877_v45, %v2829_v17  ;;  %1902 = vpow2.f32 %v1079_v5  ;;  %v1699_v54 = vmul.f32 -1.702, %v2902_v38  ;;  %v2908_v4 = vadd.f32 %v952_v25, %v2798_v61 }
 0x2a0   : > { %1904 = vrcp.f32 %v1115_v39  ;;  %v1116_v43 = vadd.f32 1.0, %v1879_v23  ;;  %v1083_v13 = vmul.f32 1.442695, %v1698_v49  ;;  %v956_v15 = vpop.f32.mrf.mxu0 }
 0x2a1   : > { %v1881_v16 = vpop.eup %1880  ;;  %1906 = vpow2.f32 %v1081_v41  ;;  %v1085_v0 = vmul.f32 1.442695, %v1699_v54  ;;  %v1700_v56 = vmul.f32 -1.702, %v2908_v4  ;;  %v2913_v19 = vadd.f32 %v956_v15, %v2795_v62  ;;  %1387 = vmatprep.mubr.f32.mxu1 %v1204_v51 }
 0x2a2   : > { %v1883_v17 = vpop.eup %1882  ;;  %1908 = vrcp.f32 %v1116_v43  ;;  %v958_v3 = vpop.f32.mrf.mxu0  ;;  %1388 = vmatmul.mubr.f32.gmra.mxu1 %v1203_v42  ;;  %v1205_v63 = vmul.f32 %v1881_v16, %v2833_v2 }
 0x2a3   : > { %v1885_v30 = vpop.eup %1884  ;;  %v1117_v57 = vadd.f32 1.0, %v1883_v17  ;;  %1910 = vpow2.f32 %v1083_v13  ;;  %v1087_v10 = vmul.f32 1.442695, %v1700_v56  ;;  %v1701_v55 = vmul.f32 -1.702, %v2913_v19 }
 0x2a4   : > { %v1887_v32 = vpop.eup %1886  ;;  %v1206_v8 = vmul.f32 %v1885_v30, %v2837_v35  ;;  %1912 = vpow2.f32 %v1085_v0  ;;  %v2919_v18 = vadd.f32 %v958_v3, %v2798_v61  ;;  %v962_v20 = vpop.f32.mrf.mxu0 }
 0x2a5   : > { %v1889_v50 = vpop.eup %1888  ;;  %1914 = vrcp.f32 %v1117_v57  ;;  %v1118_v58 = vadd.f32 1.0, %v1887_v32  ;;  %v1089_v33 = vmul.f32 1.442695, %v1701_v55  ;;  %v2922_v22 = vadd.f32 %v962_v20, %v2795_v62 }
 0x2a6   : > { %v1891_v31 = vpop.eup %1890  ;;  %1916 = vpow2.f32 %v1087_v10  ;;  %v1702_v29 = vmul.f32 -1.702, %v2919_v18  ;;  %1393 = vmatprep.mubr.f32.mxu1 %v1206_v8  ;;  %v964_v2 = vpop.f32.mrf.mxu0  ;;  %v1207_v46 = vmul.f32 %v1889_v50, %v2841_v52 }
 0x2a7   : > { %v1893_v7 = vpop.eup %1892  ;;  %1918 = vrcp.f32 %v1118_v58  ;;  %v1119_v35 = vadd.f32 1.0, %v1891_v31  ;;  %v1703_v40 = vmul.f32 -1.702, %v2922_v22  ;;  %v2927_v5 = vadd.f32 %v964_v2, %v2798_v61  ;;  %1394 = vmatmul.mubr.f32.gmra.mxu1 %v1205_v63 }
 0x2a8   : > { %v1895_v36 = vpop.eup %1894  ;;  %v1208_v6 = vmul.f32 %v1893_v7, %v2844_v26  ;;  %1920 = vpow2.f32 %v1089_v33  ;;  %v1091_v37 = vmul.f32 1.442695, %v1702_v29  ;;  %v968_v24 = vpop.f32.mrf.mxu0 }
 0x2a9   : > { %v1897_v34 = vpop.eup %1896  ;;  %1922 = vrcp.f32 %v1119_v35  ;;  %v1120_v41 = vadd.f32 1.0, %v1895_v36  ;;  %v1093_v45 = vmul.f32 1.442695, %v1703_v40  ;;  %v1704_v39 = vmul.f32 -1.702, %v2927_v5 }
 0x2aa   : > { %v1899_v49 = vpop.eup %1898  ;;  %1924 = vpow2.f32 %v1091_v37  ;;  %v2933_v25 = vadd.f32 %v968_v24, %v2795_v62  ;;  %1399 = vmatprep.mubr.f32.mxu1 %v1208_v6  ;;  %v970_v23 = vpop.f32.mrf.mxu0  ;;  %v1209_v62 = vmul.f32 %v1897_v34, %v2849_v48 }
 0x2ab   : > { %v1901_v51 = vpop.eup %1900  ;;  %1926 = vrcp.f32 %v1120_v41  ;;  %v1121_v52 = vadd.f32 1.0, %v1899_v49  ;;  %v1095_v26 = vmul.f32 1.442695, %v1704_v39  ;;  %v2936_v54 = vadd.f32 %v970_v23, %v2798_v61  ;;  %1400 = vmatmul.mubr.f32.gmra.mxu1 %v1207_v46 }
 0x2ac   : > { %v1903_v42 = vpop.eup %1902  ;;  %v1210_v43 = vmul.f32 %v1901_v51, %v2853_v44  ;;  %1928 = vpow2.f32 %v1093_v45  ;;  %v1705_v13 = vmul.f32 -1.702, %v2933_v25 }
 0x2ad   : > { %v1905_v15 = vpop.eup %1904  ;;  %1930 = vrcp.f32 %v1121_v52  ;;  %v1122_v16 = vadd.f32 1.0, %v1903_v42  ;;  %v1706_v0 = vmul.f32 -1.702, %v2936_v54 }
 0x2ae   : > { %v1907_v56 = vpop.eup %1906  ;;  %1932 = vpow2.f32 %v1095_v26  ;;  %v1097_v17 = vmul.f32 1.442695, %v1705_v13  ;;  %1405 = vmatprep.mubr.f32.mxu1 %v1210_v43  ;;  %v1211_v48 = vmul.f32 %v1905_v15, %v2856_v1 }
 0x2af   : > { %v1909_v61 = vpop.eup %1908  ;;  %1934 = vrcp.f32 %v1122_v16  ;;  %v1123_v3 = vadd.f32 1.0, %v1907_v56  ;;  %v1099_v30 = vmul.f32 1.442695, %v1706_v0  ;;  %1406 = vmatmul.mubr.f32.gmra.mxu1 %v1209_v62 }
 0x2b0   : > { %v1911_v44 = vpop.eup %1910  ;;  %v1212_v57 = vmul.f32 %v1909_v61, %v2861_v53  ;;  %1936 = vpow2.f32 %v1097_v17  ;;  %v1960_v61 = vld [vmem:[%s2374_s8] sm:$0xff] }
 0x2b1   : > { %v1913_v10 = vpop.eup %1912  ;;  %1938 = vrcp.f32 %v1123_v3  ;;  %v1124_v55 = vadd.f32 1.0, %v1911_v44 }
 0x2b2   : > { %v1915_v32 = vpop.eup %1914  ;;  %v1125_v63 = vadd.f32 1.0, %v1913_v10  ;;  %1940 = vpow2.f32 %v1099_v30  ;;  %1411 = vmatprep.mubr.f32.mxu1 %v1212_v57  ;;  %v1962_v10 = vld [vmem:[%s2374_s8 + $0x10] sm:$0xff] }
 0x2b3   : > { %v1917_v8 = vpop.eup %1916  ;;  %1942 = vrcp.f32 %v1124_v55  ;;  %1412 = vmatmul.mubr.f32.gmra.mxu1 %v1211_v48  ;;  %v1213_v31 = vmul.f32 %v1915_v32, %v2865_v11 }
 0x2b4   : > { %v1919_v20 = vpop.eup %1918  ;;  %v1126_v50 = vadd.f32 1.0, %v1917_v8  ;;  %1944 = vrcp.f32 %v1125_v63  ;;  %v1963_v63 = vld [vmem:[%s2374_s8 + $0x18] sm:$0xff] }
 0x2b5   : > { %v1921_v58 = vpop.eup %1920  ;;  %v1214_v33 = vmul.f32 %v1919_v20, %v2868_v60 }
 0x2b6   : > { %v1923_v53 = vpop.eup %1922  ;;  %1946 = vrcp.f32 %v1126_v50  ;;  %v1127_v1 = vadd.f32 1.0, %v1921_v58  ;;  %v1964_v58 = vld [vmem:[%s2374_s8 + $0x20] sm:$0xff] }
 0x2b7   : > { %v1925_v29 = vpop.eup %1924  ;;  %1417 = vmatprep.mubr.f32.mxu1 %v1214_v33  ;;  %v1215_v46 = vmul.f32 %v1923_v53, %v2873_v9 }
 0x2b8   : > { %v1927_v2 = vpop.eup %1926  ;;  %v1128_v7 = vadd.f32 1.0, %v1925_v29  ;;  %1418 = vmatmul.mubr.f32.gmra.mxu1 %v1213_v31  ;;  %1948 = vrcp.f32 %v1127_v1  ;;  %v1965_v1 = vld [vmem:[%s2374_s8 + $0x28] sm:$0xff] }
 0x2b9   : > { %v1929_v35 = vpop.eup %1928  ;;  %v1216_v40 = vmul.f32 %v1927_v2, %v2877_v12 }
 0x2ba   : > { %v1931_v36 = vpop.eup %1930  ;;  %1950 = vrcp.f32 %v1128_v7  ;;  %v1129_v60 = vadd.f32 1.0, %v1929_v35  ;;  %v1966_v35 = vld [vmem:[%s2374_s8 + $0x30] sm:$0xff] }
 0x2bb   : > { %v1933_v6 = vpop.eup %1932  ;;  %1423 = vmatprep.mubr.f32.mxu1 %v1216_v40  ;;  %v1217_v45 = vmul.f32 %v1931_v36, %v2883_v28 }
 0x2bc   : > { %v1935_v37 = vpop.eup %1934  ;;  %v1130_v11 = vadd.f32 1.0, %v1933_v6  ;;  %1424 = vmatmul.mubr.f32.gmra.mxu1 %v1215_v46  ;;  %1952 = vrcp.f32 %v1129_v60  ;;  %v1967_v46 = vld [vmem:[%s2374_s8 + $0x38] sm:$0xff] }
 0x2bd   : > { %v1937_v24 = vpop.eup %1936  ;;  %v1218_v34 = vmul.f32 %v1935_v37, %v2887_v47 }
 0x2be   : > { %v1939_v41 = vpop.eup %1938  ;;  %1954 = vrcp.f32 %v1130_v11  ;;  %v1131_v12 = vadd.f32 1.0, %v1937_v24  ;;  %v1968_v24 = vld [vmem:[%s2374_s8 + $0x40] sm:$0xff] }
 0x2bf   : > { %v1941_v39 = vpop.eup %1940  ;;  %1429 = vmatprep.mubr.f32.mxu1 %v1218_v34  ;;  %v1219_v52 = vmul.f32 %v1939_v41, %v2893_v21 }
 0x2c0   : > { %v1943_v49 = vpop.eup %1942  ;;  %v1132_v9 = vadd.f32 1.0, %v1941_v39  ;;  %1430 = vmatmul.mubr.f32.gmra.mxu1 %v1217_v45  ;;  %1956 = vrcp.f32 %v1131_v12  ;;  %v1969_v12 = vld [vmem:[%s2374_s8 + $0x48] sm:$0xff] }
 0x2c1   : > { %v1220_v23 = vmul.f32 %v1943_v49, %v2899_v59  ;;  %v1945_v51 = vpop.eup %1944 }
 0x2c2   : > { %1958 = vrcp.f32 %v1132_v9  ;;  %v1221_v42 = vmul.f32 %v1945_v51, %v2902_v38 }
 0x2c3   : > { %v1947_v26 = vpop.eup %1946  ;;  %1435 = vmatprep.mubr.f32.mxu1 %v1220_v23  ;;  %v1970_v23 = vld [vmem:[%s2374_s8 + $0x50] sm:$0xff] }
 0x2c4   : > { %v1222_v47 = vmul.f32 %v1947_v26, %v2908_v4  ;;  %1436 = vmatmul.mubr.f32.gmra.mxu1 %v1219_v52 }
 0x2c5   : > { %v1949_v28 = vpop.eup %1948 }
 0x2c6   : > { %1441 = vmatprep.mubr.f32.mxu1 %v1222_v47  ;;  %v1223_v59 = vmul.f32 %v1949_v28, %v2913_v19  ;;  %v1293_v19 = vld [vmem:[%s3137_s6] sm:$0x3]  ;;  %v1971_v47 = vld [vmem:[%s2374_s8 + $0x58] sm:$0xff] }
 0x2c7   : > { %v1951_v43 = vpop.eup %1950 }
 0x2c8   : > { %v1224_v13 = vmul.f32 %v1951_v43, %v2919_v18  ;;  %1442 = vmatmul.mubr.f32.gmra.mxu1 %v1221_v42 }
 0x2c9   : > { %v1953_v15 = vpop.eup %1952 }
 0x2ca   : > { %1447 = vmatprep.mubr.f32.mxu1 %v1224_v13  ;;  %v1225_v4 = vmul.f32 %v1953_v15, %v2922_v22  ;;  %v2967_v22 = vrot.slane %v1293_v19, %v2676_v27  ;;  %v1961_v27 = vld [vmem:[%s2374_s8 + $0x8] sm:$0xff]  ;;  %v1972_v13 = vld [vmem:[%s2374_s8 + $0x60] sm:$0xff] }
 0x2cb   : > { %v1955_v62 = vpop.eup %1954 }
 0x2cc   : > { %v1226_v21 = vmul.f32 %v1955_v62, %v2927_v5  ;;  %1448 = vmatmul.mubr.f32.gmra.mxu1 %v1223_v59  ;;  %v2964_v5 = vrot.slane %v1293_v19, %v2678_v14 }
 0x2cd   : > { %v1957_v16 = vpop.eup %1956 }
 0x2ce   : > { %1453 = vmatprep.mubr.f32.mxu1 %v1226_v21  ;;  %v1227_v18 = vmul.f32 %v1957_v16, %v2933_v25  ;;  %v1973_v21 = vld [vmem:[%s2374_s8 + $0x68] sm:$0xff] }
 0x2cf   : > { %v1959_v0 = vpop.eup %1958 }
 0x2d0   : > { %v1228_v38 = vmul.f32 %v1959_v0, %v2936_v54  ;;  %1454 = vmatmul.mubr.f32.gmra.mxu1 %v1225_v4 }
 0x2d2   : > { %1459 = vmatprep.mubr.f32.mxu1 %v1228_v38  ;;  %v1974_v38 = vld [vmem:[%s2374_s8 + $0x70] sm:$0xff] }
 0x2d4   : > { %1460 = vmatmul.mubr.f32.gmra.mxu1 %v1227_v18 }
 0x356   : > { %v1371_v56 = vpop.f32.mrf.mxu1 }
 0x357   : > { %v1372_v54 = vadd.f32 %v1371_v56, %v2964_v5  ;;  %v1975_v56 = vld [vmem:[%s2374_s8 + $0x78] sm:$0xff] }
 0x358   : > { %v1373_v17 = vpop.f32.mrf.mxu1 }
 0x359   : > { %v1466_v25 = vadd.f32 %v1960_v61, %v1372_v54  ;;  %v1374_v3 = vadd.f32 %v1373_v17, %v2967_v22 }
 0x35a   : > { %v1377_v30 = vpop.f32.mrf.mxu1 }
 0x35b   : > { %1498 = vst [vmem:[%s2974_s21] sm:$0xff] %v1466_v25  ;;  %v1467_v14 = vadd.f32 %v1961_v27, %v1374_v3  ;;  %v1378_v44 = vadd.f32 %v1377_v30, %v2964_v5  ;;  %v1976_v3 = vld [vmem:[%s2374_s8 + $0x80] sm:$0xff] }
 0x35c   : > { %v1379_v57 = vpop.f32.mrf.mxu1 }
 0x35d   : > { %1499 = vst [vmem:[%s2974_s21 + $0x8] sm:$0xff] %v1467_v14  ;;  %v1468_v48 = vadd.f32 %v1962_v10, %v1378_v44  ;;  %v1380_v55 = vadd.f32 %v1379_v57, %v2967_v22  ;;  %v1977_v44 = vld [vmem:[%s2374_s8 + $0x88] sm:$0xff] }
 0x35e   : > { %v1383_v32 = vpop.f32.mrf.mxu1 }
 0x35f   : > { %1500 = vst [vmem:[%s2974_s21 + $0x10] sm:$0xff] %v1468_v48  ;;  %v1469_v8 = vadd.f32 %v1963_v63, %v1380_v55  ;;  %v1384_v20 = vadd.f32 %v1383_v32, %v2964_v5  ;;  %v1978_v55 = vld [vmem:[%s2374_s8 + $0x90] sm:$0xff] }
 0x360   : > { %v1385_v50 = vpop.f32.mrf.mxu1 }
 0x361   : > { %1501 = vst [vmem:[%s2974_s21 + $0x18] sm:$0xff] %v1469_v8  ;;  %v1470_v33 = vadd.f32 %v1964_v58, %v1384_v20  ;;  %v1386_v53 = vadd.f32 %v1385_v50, %v2967_v22  ;;  %v1979_v20 = vld [vmem:[%s2374_s8 + $0x98] sm:$0xff] }
 0x362   : > { %v1389_v31 = vpop.f32.mrf.mxu1 }
 0x363   : > { %1502 = vst [vmem:[%s2974_s21 + $0x20] sm:$0xff] %v1470_v33  ;;  %v1471_v29 = vadd.f32 %v1965_v1, %v1386_v53  ;;  %v1390_v2 = vadd.f32 %v1389_v31, %v2964_v5  ;;  %v1980_v53 = vld [vmem:[%s2374_s8 + $0xa0] sm:$0xff] }
 0x364   : > { %v1391_v7 = vpop.f32.mrf.mxu1 }
 0x365   : > { %1503 = vst [vmem:[%s2974_s21 + $0x28] sm:$0xff] %v1471_v29  ;;  %v1472_v40 = vadd.f32 %v1966_v35, %v1390_v2  ;;  %v1392_v36 = vadd.f32 %v1391_v7, %v2967_v22  ;;  %v1981_v2 = vld [vmem:[%s2374_s8 + $0xa8] sm:$0xff] }
 0x367   : > { %1504 = vst [vmem:[%s2974_s21 + $0x30] sm:$0xff] %v1472_v40  ;;  %v1473_v60 = vadd.f32 %v1967_v46, %v1392_v36  ;;  %v1395_v6 = vpop.f32.mrf.mxu1  ;;  %v1982_v36 = vld [vmem:[%s2374_s8 + $0xb0] sm:$0xff] }
 0x368   : > { %v1396_v37 = vadd.f32 %v1395_v6, %v2964_v5 }
 0x369   : > { %1505 = vst [vmem:[%s2974_s21 + $0x38] sm:$0xff] %v1473_v60  ;;  %v1397_v11 = vpop.f32.mrf.mxu1 }
 0x36a   : > { %v1474_v34 = vadd.f32 %v1968_v24, %v1396_v37  ;;  %v1398_v41 = vadd.f32 %v1397_v11, %v2967_v22  ;;  %v1983_v37 = vld [vmem:[%s2374_s8 + $0xb8] sm:$0xff] }
 0x36b   : > { %v1401_v45 = vpop.f32.mrf.mxu1 }
 0x36c   : > { %1506 = vst [vmem:[%s2974_s21 + $0x40] sm:$0xff] %v1474_v34  ;;  %v1475_v39 = vadd.f32 %v1969_v12, %v1398_v41  ;;  %v1402_v49 = vadd.f32 %v1401_v45, %v2964_v5  ;;  %v1984_v41 = vld [vmem:[%s2374_s8 + $0xc0] sm:$0xff] }
 0x36d   : > { %v1403_v9 = vpop.f32.mrf.mxu1 }
 0x36e   : > { %1507 = vst [vmem:[%s2974_s21 + $0x48] sm:$0xff] %v1475_v39  ;;  %v1476_v51 = vadd.f32 %v1970_v23, %v1402_v49  ;;  %v1404_v52 = vadd.f32 %v1403_v9, %v2967_v22  ;;  %v1985_v49 = vld [vmem:[%s2374_s8 + $0xc8] sm:$0xff] }
 0x36f   : > { %v1407_v26 = vpop.f32.mrf.mxu1 }
 0x370   : > { %1508 = vst [vmem:[%s2974_s21 + $0x50] sm:$0xff] %v1476_v51  ;;  %v1477_v28 = vadd.f32 %v1971_v47, %v1404_v52  ;;  %v1408_v42 = vadd.f32 %v1407_v26, %v2964_v5  ;;  %v1986_v52 = vld [vmem:[%s2374_s8 + $0xd0] sm:$0xff] }
 0x371   : > { %v1409_v43 = vpop.f32.mrf.mxu1 }
 0x372   : > { %1509 = vst [vmem:[%s2974_s21 + $0x58] sm:$0xff] %v1477_v28  ;;  %v1478_v15 = vadd.f32 %v1972_v13, %v1408_v42  ;;  %v1410_v59 = vadd.f32 %v1409_v43, %v2967_v22  ;;  %v1987_v42 = vld [vmem:[%s2374_s8 + $0xd8] sm:$0xff] }
 0x373   : > { %v1413_v62 = vpop.f32.mrf.mxu1 }
 0x374   : > { %1510 = vst [vmem:[%s2974_s21 + $0x60] sm:$0xff] %v1478_v15  ;;  %v1479_v16 = vadd.f32 %v1973_v21, %v1410_v59  ;;  %v1414_v4 = vadd.f32 %v1413_v62, %v2964_v5  ;;  %v1988_v59 = vld [vmem:[%s2374_s8 + $0xe0] sm:$0xff] }
 0x375   : > { %v1415_v0 = vpop.f32.mrf.mxu1 }
 0x376   : > { %1511 = vst [vmem:[%s2974_s21 + $0x68] sm:$0xff] %v1479_v16  ;;  %v1480_v18 = vadd.f32 %v1974_v38, %v1414_v4  ;;  %v1416_v19 = vadd.f32 %v1415_v0, %v2967_v22  ;;  %v1989_v4 = vld [vmem:[%s2374_s8 + $0xe8] sm:$0xff] }
 0x378   : > { %1512 = vst [vmem:[%s2974_s21 + $0x70] sm:$0xff] %v1480_v18  ;;  %v1481_v54 = vadd.f32 %v1975_v56, %v1416_v19  ;;  %v1419_v17 = vpop.f32.mrf.mxu1  ;;  %v1990_v19 = vld [vmem:[%s2374_s8 + $0xf0] sm:$0xff] }
 0x379   : > { %v1420_v61 = vadd.f32 %v1419_v17, %v2964_v5  ;;  %v1991_v17 = vld [vmem:[%s2374_s8 + $0xf8] sm:$0xff] }
 0x37a   : > { %1513 = vst [vmem:[%s2974_s21 + $0x78] sm:$0xff] %v1481_v54  ;;  %v1421_v25 = vpop.f32.mrf.mxu1 }
 0x37b   : > { %v1482_v30 = vadd.f32 %v1976_v3, %v1420_v61  ;;  %v1422_v27 = vadd.f32 %v1421_v25, %v2967_v22 }
 0x37c   : > { %v1425_v14 = vpop.f32.mrf.mxu1 }
 0x37d   : > { %1514 = vst [vmem:[%s2974_s21 + $0x80] sm:$0xff] %v1482_v30  ;;  %v1483_v57 = vadd.f32 %v1977_v44, %v1422_v27  ;;  %v1426_v10 = vadd.f32 %v1425_v14, %v2964_v5 }
 0x37e   : > { %v1427_v48 = vpop.f32.mrf.mxu1 }
 0x37f   : > { %1515 = vst [vmem:[%s2974_s21 + $0x88] sm:$0xff] %v1483_v57  ;;  %v1484_v32 = vadd.f32 %v1978_v55, %v1426_v10  ;;  %v1428_v63 = vadd.f32 %v1427_v48, %v2967_v22 }
 0x380   : > { %v1431_v8 = vpop.f32.mrf.mxu1 }
 0x381   : > { %1516 = vst [vmem:[%s2974_s21 + $0x90] sm:$0xff] %v1484_v32  ;;  %v1485_v50 = vadd.f32 %v1979_v20, %v1428_v63  ;;  %v1432_v58 = vadd.f32 %v1431_v8, %v2964_v5 }
 0x382   : > { %v1433_v33 = vpop.f32.mrf.mxu1 }
 0x383   : > { %1517 = vst [vmem:[%s2974_s21 + $0x98] sm:$0xff] %v1485_v50  ;;  %v1486_v31 = vadd.f32 %v1980_v53, %v1432_v58  ;;  %v1434_v1 = vadd.f32 %v1433_v33, %v2967_v22 }
 0x384   : > { %v1437_v29 = vpop.f32.mrf.mxu1 }
 0x385   : > { %1518 = vst [vmem:[%s2974_s21 + $0xa0] sm:$0xff] %v1486_v31  ;;  %v1487_v7 = vadd.f32 %v1981_v2, %v1434_v1  ;;  %v1438_v35 = vadd.f32 %v1437_v29, %v2964_v5 }
 0x386   : > { %v1439_v40 = vpop.f32.mrf.mxu1 }
 0x387   : > { %1519 = vst [vmem:[%s2974_s21 + $0xa8] sm:$0xff] %v1487_v7  ;;  %v1488_v46 = vadd.f32 %v1982_v36, %v1438_v35  ;;  %v1440_v60 = vadd.f32 %v1439_v40, %v2967_v22 }
 0x388   : > { %v1443_v6 = vpop.f32.mrf.mxu1 }
 0x389   : > { %1520 = vst [vmem:[%s2974_s21 + $0xb0] sm:$0xff] %v1488_v46  ;;  %v1489_v11 = vadd.f32 %v1983_v37, %v1440_v60  ;;  %v1444_v24 = vadd.f32 %v1443_v6, %v2964_v5 }
 0x38a   : > { %v1445_v34 = vpop.f32.mrf.mxu1 }
 0x38b   : > { %1521 = vst [vmem:[%s2974_s21 + $0xb8] sm:$0xff] %v1489_v11  ;;  %v1490_v45 = vadd.f32 %v1984_v41, %v1444_v24  ;;  %v1446_v12 = vadd.f32 %v1445_v34, %v2967_v22 }
 0x38c   : > { %v1449_v39 = vpop.f32.mrf.mxu1 }
 0x38d   : > { %1522 = vst [vmem:[%s2974_s21 + $0xc0] sm:$0xff] %v1490_v45  ;;  %v1491_v9 = vadd.f32 %v1985_v49, %v1446_v12  ;;  %v1450_v23 = vadd.f32 %v1449_v39, %v2964_v5 }
 0x38e   : > { %v1451_v51 = vpop.f32.mrf.mxu1 }
 0x38f   : > { %1523 = vst [vmem:[%s2974_s21 + $0xc8] sm:$0xff] %v1491_v9  ;;  %v1492_v26 = vadd.f32 %v1986_v52, %v1450_v23  ;;  %v1452_v47 = vadd.f32 %v1451_v51, %v2967_v22 }
 0x390   : > { %v1455_v28 = vpop.f32.mrf.mxu1 }
 0x391   : > { %1524 = vst [vmem:[%s2974_s21 + $0xd0] sm:$0xff] %v1492_v26  ;;  %v1493_v43 = vadd.f32 %v1987_v42, %v1452_v47  ;;  %v1456_v13 = vadd.f32 %v1455_v28, %v2964_v5 }
 0x392   : > { %v1457_v15 = vpop.f32.mrf.mxu1 }
 0x393   : > { %1525 = vst [vmem:[%s2974_s21 + $0xd8] sm:$0xff] %v1493_v43  ;;  %v1494_v62 = vadd.f32 %v1988_v59, %v1456_v13  ;;  %v1458_v21 = vadd.f32 %v1457_v15, %v2967_v22 }
 0x394   : > { %v1461_v16 = vpop.f32.mrf.mxu1 }
 0x395   : > { %1526 = vst [vmem:[%s2974_s21 + $0xe0] sm:$0xff] %v1494_v62  ;;  %v1495_v0 = vadd.f32 %v1989_v4, %v1458_v21  ;;  %v1462_v38 = vadd.f32 %v1461_v16, %v2964_v5 }
 0x396   : > { %v1463_v18 = vpop.f32.mrf.mxu1 }
 0x397   : > { %1527 = vst [vmem:[%s2974_s21 + $0xe8] sm:$0xff] %v1495_v0  ;;  %v1496_v56 = vadd.f32 %v1990_v19, %v1462_v38  ;;  %v1464_v54 = vadd.f32 %v1463_v18, %v2967_v22  ;;  %1537 = sbr.rel (!%p3159_p5) target bundleno = 951 (0x3b7), region = 68 }
 0x399   : > { %1528 = vst [vmem:[%s2974_s21 + $0xf0] sm:$0xff] %v1496_v56  ;;  %v1497_v61 = vadd.f32 %v1991_v17, %v1464_v54 }
 0x39b   : > { %1529 = vst [vmem:[%s2974_s21 + $0xf8] sm:$0xff] %v1497_v61 }
 0x39c   : > { %s3168_s23 = smov (!%p1540_p13, %s1539_s23), 16 }
 0x39d   : > { %s3073_s1 = sshll.u32 %s3168_s23, 8 }
 0x39e   : > { %s1545_s3 = ssub.s32 4096, %s3073_s1 }
 0x39f   : > { %1546 = vsyncadd %s1531_s11, %s1545_s3  ;;  %p1711_p8 = scmp.ne.s32.totalorder %s3073_s1, 0  ;;  %s1723_s13 = sshll.u32 %s2242_s28, 12 }
 0x3a0   : > { %s3083_s8 = scalar_lea.hbm %s3138_s7, %s1723_s13  ;;  %s1552_s12 = sshll.u32 %s2974_s21, 4  ;;  %s3086_s12 = int_to_ptr.vmem [resolvable:$true] %s1552_s12 }
 0x3a1   : > { %s2096_s15 = scalar_lea.vmem %s3086_s12, %s3073_s1  ;;  %s2178_s20 = smov [#allocation10]  }
 0x3a2   : > { %p2097_p10 = scmp.ne.s32.totalorder %s3086_s12, %s2096_s15  ;;  %s2100_s9 = sshll.u32 %s2178_s20, 4  ;;  %s2101_s9 = int_to_ptr.vmem [resolvable:$false] %s2100_s9 }
 0x3a3   : > { %s2102_s28 = scalar_lea.vmem %s2101_s9, 8192  ;;  %p2103_p3 = scmp.lt.s32.totalorder %s3086_s12, %s2101_s9 }
 0x3a4   : > { %p2098_p2 = pnand %p2097_p10, %p1711_p8  ;;  %p2104_p7 = scmp.lt.s32.totalorder %s2102_s28, %s2096_s15 }
 0x3a6   : > { %p2099_p1 = pneg %p2098_p2  ;;  %p2105_p11 = por %p2104_p7, %p2103_p3 }
 0x3a8   : > { %p2106_p0 = pnand %p2105_p11, %p2099_p1 }
 0x3aa   : > { %2109 = shalt.err (!%p2106_p0)
}
 0x3ab   : > { %s2110_s29 = scalar_lea.hbm %s3083_s8, %s3073_s1  ;;  %s2114_s22 = scalar_lea.hbm %s3138_s7, 6400 }
 0x3ac   : > { %p2111_p4 = scmp.ne.s32.totalorder %s3083_s8, %s2110_s29  ;;  %p2115_p5 = scmp.lt.s32.totalorder %s3083_s8, %s3138_s7 }
 0x3ad   : > { %p2116_p13 = scmp.lt.s32.totalorder %s2114_s22, %s2110_s29 }
 0x3ae   : > { %p2112_p12 = pnand %p2111_p4, %p1711_p8 }
 0x3af   : > { %p2117_p10 = por %p2116_p13, %p2115_p5 }
 0x3b0   : > { %p2113_p6 = pneg %p2112_p12 }
 0x3b2   : > { %p2118_p2 = pnand %p2117_p10, %p2113_p6 }
 0x3b4   : > { %2121 = shalt.err (!%p2118_p2)
}
 0x3b5   : > { %s2179_s13 = smov 256   ;;  %s2180_s18 = smov 16  }
 0x3b6   : > { %1558 = dma.vmem_to_hbm [thread:$0]  (%p1711_p8), %s3086_s12, %s3073_s1, %s3083_s8, %s1531_s11, %s2179_s13, %s2179_s13, %s2180_s18  }
 0x3b7 PF: > { %s1567_s17 = sand.u32 1, %s2156_s24   ;;  %p3160_p1 = scmp.ne.s32.totalorder %s3147_s14, 0 }
 0x3b8   : > { %s1568_s15 = scalar_lea.sflag [#allocation4], %s1567_s17 }
 0x3b9   : > { %p1749_p3 = pnand %p1659_p9, %p3160_p1 }
 0x3bb   : > { %p1750_p7 = pneg %p1749_p3 }
 0x3bd   : > { %2151 = dma.done.wait (%p1750_p7), %s1568_s15, 4096  }
 0x3be   : > { %2153 = vsyncadd (%p1750_p7), %s1568_s15, 4294963200  ;;  %p22_p11 = scmp.ge.s32.totalorder %s2246_s30, 4   ;;  %s3161_s24 = smov %s2160_s25 }
 0x3bf   : > { %s3162_s25 = smov %s2164_s26  ;;  %s3163_s26 = smov %s2258_s10 }
 0x3c0   : > { %s3164_s27 = smov %s2246_s30  ;;  %24 = sbr.rel (!%p22_p11) target bundleno = 10 (0xa), region = 105 }
 0x3c5   :  { %1573 = vsyncpa [#allocation3], 1 }
 0x3c6   :  { %1575 = vsyncpa [#allocation3 + $0x1], 1 }
 0x3c7   :  { %1576 = vsyncpa [#allocation6], 1 }
 0x3c8   :  { %1577 = vsyncpa [#allocation9], 1 }
 0x3c9   :  { %1578 = vsyncpa [#allocation4], 1 }
 0x3ca   :  { %1580 = vsyncpa [#allocation4 + $0x1], 1 }

// kernel: tpu_custom_call.1
= control target key start
LH: loop header
LB: loop body
LE: loop exit
PB: predicated region body
PF: predicated region fallthrough
CT: control target
= control target key end

     0   :  { %s3131_s0 = inlined_call_operand.hbm [shape: f32[200,256], index: 0, kind: input, shape index: {}]   ;;  %s3132_s1 = inlined_call_operand.hbm [shape: f32[1,256], index: 1, kind: input, shape index: {}]   ;;  %s3133_s2 = inlined_call_operand.vmem [shape: f32[1,256], index: 2, kind: input, shape index: {}]   ;;  %s3134_s3 = inlined_call_operand.hbm [shape: f32[256,256], index: 3, kind: input, shape index: {}]   ;;  %s3135_s4 = inlined_call_operand.vmem [shape: f32[1,256], index: 4, kind: input, shape index: {}]   ;;  %s3136_s5 = inlined_call_operand.hbm [shape: f32[256,256], index: 5, kind: input, shape index: {}]   ;;  %s3137_s6 = inlined_call_operand.vmem [shape: f32[1,256], index: 6, kind: input, shape index: {}]   ;;  %s3138_s7 = inlined_call_operand.hbm [shape: f32[200,256], index: 7, kind: output, shape index: {}]  }
   0x1   :  { %3142 = sst [smem:[#allocation15_spill]] %s3132_s1 }
   0x2   :  { %3143 = sst [smem:[#allocation16_spill]] %s3134_s3 }
   0x3   :  { %12 = vsyncpa [#allocation3], 0 }
   0x4   :  { %14 = vsyncpa [#allocation3 + $0x1], 0 }
   0x5   :  { %15 = vsyncpa [#allocation6], 0 }
   0x6   :  { %16 = vsyncpa [#allocation9], 0 }
   0x7   :  { %17 = vsyncpa [#allocation4], 0 }
   0x8   :  { %19 = vsyncpa [#allocation4 + $0x1], 0  ;;  %s2221_s24 = smov 0   ;;  %s2223_s25 = smov 0  }
   0x9   :  { %s2225_s26 = smov 0   ;;  %s2227_s27 = smov 0  }
   0xa LB: > { %s2242_s28 = sadd.s32 4294967295, %s2168_s27   ;;  %s1654_s29 = sadd.s32 4294967294, %s2168_s27   ;;  %s2168_s27 = sphi %s2227_s27, %s3164_s27   ;;  %s2164_s26 = sphi %s2225_s26, %s3163_s26   ;;  %s2160_s25 = sphi %s2223_s25, %s3162_s25   ;;  %s2156_s24 = sphi %s2221_s24, %s3161_s24  }
   0xb   : > { %s2246_s30 = sadd.s32 1, %s2168_s27   ;;  %s32_s8 = sadd.s32 1, %s2164_s26 }
   0xc   : > { %s29_s9 = ssub.s32 %s2168_s27, %s2246_s30  ;;  %p39_p0 = scmp.ne.s32.totalorder %s2164_s26, %s2160_s25 }
   0xd   : > { %p30_p1 = scmp.eq.s32.totalorder %s29_s9, 0  ;;  %p40_p2 = scmp.eq.s32.totalorder %s2168_s27, 0 }
   0xe   : > { %p45_p3 = scmp.ne.s32.totalorder %s2160_s25, %s2156_s24  ;;  %p3139_p4 = scmp.eq.s32.totalorder %s2242_s28, 0 }
   0xf   : > { %s2258_s10 = scalar_select %p30_p1, %s2164_s26, %s32_s8  }
  0x10   : > { %p2260_p5 = por %p40_p2, %p39_p0  ;;  %p2266_p6 = por %p3139_p4, %p45_p3 }
  0x11   : > { %p195_p7 = scmp.eq.s32.totalorder %s2242_s28, 1  ;;  %p201_p8 = scmp.eq.s32.totalorder %s1654_s29, 1 }
  0x12   : > { %s3144_s11 = scalar_select %p2260_p5, 1, 0 }
  0x13   : > { %s3145_s12 = scalar_select %p2266_p6, 1, 0 }
  0x14   : > { %p1655_p9 = scmp.ge.s32.totalorder %s2168_s27, 1  ;;  %p208_p10 = scmp.lt.s32.totalorder %s2168_s27, 3 }
  0x15   : > { %p2273_p11 = por %p195_p7, %p39_p0  ;;  %p2277_p12 = por %p201_p8, %p45_p3 }
  0x16   : > { %p2281_p13 = pnand %p1655_p9, %p208_p10  ;;  %s2170_s16 = smov [#allocation5]  }
  0x17   : > { %s3146_s13 = scalar_select %p2273_p11, 1, 0 }
  0x18   : > { %s3147_s14 = scalar_select %p2277_p12, 1, 0 }
  0x19   : > { %s3148_s15 = scalar_select %p2281_p13, 1, 0 }
  0x1a   : > { %p1738_p1 = pneg %p2281_p13  ;;  %s221_s17 = sshll.u32 %s2170_s16, 4  ;;  %s222_s17 = int_to_ptr.vmem [resolvable:$true] %s221_s17 }
  0x1b   : > { %s2171_s18 = smov [#allocation7]   ;;  %s2003_s21 = scalar_lea.vmem %s222_s17, 32 }
  0x1c   : > { %s234_s19 = sshll.u32 %s2171_s18, 4  ;;  %p2289_p0 = pnand %p1738_p1, %p3139_p4  ;;  %s235_s19 = int_to_ptr.vmem [resolvable:$true] %s234_s19 }
  0x1d   : > { %p2004_p3 = scmp.ne.s32.totalorder %s222_s17, %s2003_s21  ;;  %p2011_p9 = scmp.lt.s32.totalorder %s222_s17, %s222_s17 }
  0x1e   : > { %p1994_p2 = pneg %p2289_p0  ;;  %p2012_p10 = scmp.lt.s32.totalorder %s2003_s21, %s2003_s21 }
  0x20   : > { %p2006_p7 = pnand %p2004_p3, %p1994_p2  ;;  %p2013_p12 = por %p2012_p10, %p2011_p9 }
  0x22   : > { %p2007_p8 = pneg %p2006_p7 }
  0x24   : > { %p2014_p11 = pnand %p2013_p12, %p2007_p8 }
  0x26   : > { %2017 = shalt.err (!%p2014_p11)
}
  0x27   : > { %s3150_s1 = sld [smem:[#allocation15_spill]]  ;;  %s2029_s29 = scalar_lea.vmem %s235_s19, 8192 }
  0x28   : > { %p2030_p1 = scmp.ne.s32.totalorder %s235_s19, %s2029_s29  ;;  %p2037_p3 = scmp.lt.s32.totalorder %s235_s19, %s235_s19 }
  0x29   : > { %p2038_p7 = scmp.lt.s32.totalorder %s2029_s29, %s2029_s29 }
  0x2a   : > { %p2032_p4 = pnand %p2030_p1, %p1994_p2 }
  0x2b   : > { %p2039_p13 = por %p2038_p7, %p2037_p3 }
  0x2c   : > { %p2033_p6 = pneg %p2032_p4 }
  0x2d   : > { %1741 = dma.hbm_to_vmem [thread:$0]  (!%p2289_p0), %s3150_s1, 32, %s222_s17, [#allocation6]  }
  0x2e   : > { %p2040_p5 = pnand %p2039_p13, %p2033_p6 }
  0x30   : > { %2043 = shalt.err (!%p2040_p5)
}
  0x31   : > { %s2172_s8 = smov 256   ;;  %s2173_s9 = smov 16  }
  0x32   : > { %s3151_s3 = sld [smem:[#allocation16_spill]]  ;;  %s2174_s17 = smov [#allocation8]  }
  0x33   : > { %s250_s21 = sshll.u32 %s2174_s17, 4  ;;  %s251_s21 = int_to_ptr.vmem [resolvable:$true] %s250_s21 }
  0x34   : > { %s2055_s22 = scalar_lea.vmem %s251_s21, 8192  ;;  %p2063_p6 = scmp.lt.s32.totalorder %s251_s21, %s251_s21 }
  0x35   : > { %p2056_p11 = scmp.ne.s32.totalorder %s251_s21, %s2055_s22  ;;  %p2064_p5 = scmp.lt.s32.totalorder %s2055_s22, %s2055_s22 }
  0x37   : > { %p2058_p4 = pnand %p2056_p11, %p1994_p2  ;;  %p2065_p13 = por %p2064_p5, %p2063_p6 }
  0x38   : > { %1744 = dma.hbm_to_vmem [thread:$0]  (!%p2289_p0), %s3151_s3, 8192, %s235_s19, [#allocation6], %s2172_s8, %s2172_s8, %s2173_s9  }
  0x39   : > { %p2059_p12 = pneg %p2058_p4 }
  0x3b   : > { %p2066_p8 = pnand %p2065_p13, %p2059_p12 }
  0x3d   : > { %2069 = shalt.err (!%p2066_p8)
}
  0x3e   : > { %1747 = dma.hbm_to_vmem [thread:$0]  (!%p2289_p0), %s3136_s5, 8192, %s251_s21, [#allocation9], %s2172_s8, %s2172_s8, %s2173_s9  }
  0x3f   : > { %p1659_p9 = scmp.ge.s32.totalorder %s2168_s27, 2 }
  0x40   : > { %p3152_p10 = scmp.ne.s32.totalorder (!%p1659_p9), %s3144_s11, 0 }
  0x41   : > { %263 = sbr.rel (%p1659_p9) target bundleno = 102 (0x66), region = 40 }
  0x46   : > { %266 = sbr.rel (!%p3152_p10) target bundleno = 102 (0x66), region = 44  ;;  %s267_s19 = sand.u32 (%p3152_p10), 1, %s2164_s26  }
  0x47   : > { %s1661_s16 = sshll.u32 (%p3152_p10), %s2168_s27, 4  ;;  %s1660_s18 = sshll.u32 (%p3152_p10), %s267_s19, 8 }
  0x48   : > { %s273_s17 = ssub.s32 (%p3152_p10), 25, %s1661_s16  ;;  %s2329_s9 = scalar_lea.sflag (%p3152_p10), [#allocation3], %s267_s19 }
  0x49   : > { %p274_p2 = scmp.lt.s32.totalorder (%p3152_p10), %s273_s17, 16  ;;  %s271_s21 = scalar_lea.vmem (%p3152_p10), [#allocation2], %s1660_s18 }
  0x4b   : > { %s3166_s17 = smov (!%p274_p2, %s273_s17), 16 }
  0x4c   : > { %s2326_s20 = sshll.u32 %s3166_s17, 8 }
  0x4d   : > { %s279_s8 = ssub.s32 4096, %s2326_s20 }
  0x4e   : > { %280 = vsyncadd %s2329_s9, %s279_s8  ;;  %p1664_p0 = scmp.ne.s32.totalorder %s2326_s20, 0  ;;  %s1720_s11 = sshll.u32 %s2168_s27, 12 }
  0x4f   : > { %s2337_s29 = scalar_lea.hbm %s3131_s0, %s1720_s11  ;;  %s286_s16 = sshll.u32 %s271_s21, 4  ;;  %s2339_s16 = int_to_ptr.vmem [resolvable:$true] %s286_s16 }
  0x50   : > { %s2070_s19 = scalar_lea.hbm %s2337_s29, %s2326_s20  ;;  %s2074_s8 = scalar_lea.hbm %s3131_s0, 6400 }
  0x51   : > { %p2071_p1 = scmp.ne.s32.totalorder %s2337_s29, %s2070_s19  ;;  %p2075_p11 = scmp.lt.s32.totalorder %s2337_s29, %s3131_s0 }
  0x52   : > { %p2076_p4 = scmp.lt.s32.totalorder %s2074_s8, %s2070_s19 }
  0x53   : > { %p2072_p3 = pnand %p2071_p1, %p1664_p0 }
  0x54   : > { %p2077_p12 = por %p2076_p4, %p2075_p11 }
  0x55   : > { %p2073_p7 = pneg %p2072_p3 }
  0x57   : > { %p2078_p6 = pnand %p2077_p12, %p2073_p7 }
  0x59   : > { %2081 = shalt.err (!%p2078_p6)
}
  0x5a   : > { %s2082_s21 = scalar_lea.vmem %s2339_s16, %s2326_s20  ;;  %s2175_s11 = smov [#allocation2]  }
  0x5b   : > { %p2083_p5 = scmp.ne.s32.totalorder %s2339_s16, %s2082_s21  ;;  %s2086_s22 = sshll.u32 %s2175_s11, 4  ;;  %s2087_s22 = int_to_ptr.vmem [resolvable:$false] %s2086_s22 }
  0x5c   : > { %s2088_s23 = scalar_lea.vmem %s2087_s22, 8192  ;;  %p2089_p10 = scmp.lt.s32.totalorder %s2339_s16, %s2087_s22 }
  0x5d   : > { %p2084_p13 = pnand %p2083_p5, %p1664_p0  ;;  %p2090_p2 = scmp.lt.s32.totalorder %s2088_s23, %s2082_s21 }
  0x5f   : > { %p2085_p8 = pneg %p2084_p13  ;;  %p2091_p1 = por %p2090_p2, %p2089_p10 }
  0x61   : > { %p2092_p3 = pnand %p2091_p1, %p2085_p8 }
  0x63   : > { %2095 = shalt.err (!%p2092_p3)
}
  0x64   : > { %s2176_s1 = smov 256   ;;  %s2177_s3 = smov 16  }
  0x65   : > { %292 = dma.hbm_to_vmem [thread:$0]  (%p1664_p0), %s2337_s29, %s2326_s20, %s2339_s16, %s2329_s9, %s2176_s1, %s2176_s1, %s2177_s3  }
  0x66 PF: > { %p3153_p7 = scmp.ne.s32.totalorder %s3148_s15, 0 }
  0x67   : > { %s2368_s19 = sand.u32 (!%p3153_p7), 1, %s2160_s25   ;;  %p3154_p11 = scmp.ne.s32.totalorder (!%p3153_p7), %s3145_s12, 0 }
  0x68   : > { %298 = sbr.rel (%p3153_p7) target bundleno = 951 (0x3b7), region = 48  ;;  %s1670_s18 = sshll.u32 (!%p3153_p7), %s2368_s19, 8 }
  0x69   : > { %s301_s17 = scalar_lea.sflag (!%p3153_p7), [#allocation3], %s2368_s19  ;;  %s2374_s8 = scalar_lea.vmem (!%p3153_p7), [#allocation2], %s1670_s18 }
  0x6d   : > { %2139 = dma.done.wait (%p3154_p11), %s301_s17, 4096  }
  0x6e   : > { %2141 = vsyncadd (%p3154_p11), %s301_s17, 4294963200  ;;  %p3155_p0 = scmp.eq.s32.totalorder %s2242_s28, 0 }
  0x70   : > { %2143 = dma.done.wait (%p3155_p0), [#allocation6], 8224   ;;  %p3156_p4 = pmov %p3155_p0 }
  0x71   : > { %p3157_p12 = pmov %p3155_p0 }
  0x72   : > { %2145 = vsyncadd (%p3156_p4), [#allocation6], 4294959072 }
  0x73   : > { %2147 = dma.done.wait (%p3157_p12), [#allocation9], 8192   ;;  %p3158_p6 = pmov %p3155_p0 }
  0x74   : > { %v2389_v0 = vld [vmem:[%s2374_s8] sm:$0xff]  ;;  %v2392_v1 = vld [vmem:[%s2374_s8 + $0x8] sm:$0xff]  ;;  %v2403_v5 = vld [vmem:[%s2374_s8 + $0x10] sm:$0xff]  ;;  %s2974_s21 = scalar_lea.vmem [#allocation10], %s1670_s18  ;;  %s1531_s11 = scalar_lea.sflag [#allocation4], %s2368_s19 }
  0x75   : > { %2149 = vsyncadd (%p3158_p6), [#allocation9], 4294959104  ;;  %v2395_v2 = vld [vmem:[%s2374_s8 + $0x20] sm:$0xff]  ;;  %v393_v3 = vadd.f32 %v2392_v1, %v2389_v0  ;;  %v2400_v4 = vld [vmem:[%s2374_s8 + $0x28] sm:$0xff]  ;;  %p3159_p5 = scmp.ne.s32.totalorder %s3146_s13, 0 }
  0x76   : > { %v2406_v6 = vld [vmem:[%s2374_s8 + $0x18] sm:$0xff]  ;;  %v399_v7 = vadd.f32 %v2400_v4, %v2395_v2  ;;  %v2411_v8 = vld [vmem:[%s2374_s8 + $0x30] sm:$0xff]  ;;  %v2421_v12 = vld [vmem:[%s2374_s8 + $0x40] sm:$0xff]  ;;  %s1708_s22 = sshll.u32 (%p3159_p5), %s2242_s28, 4 }
  0x77   : > { %v2414_v9 = vld [vmem:[%s2374_s8 + $0x38] sm:$0xff]  ;;  %394 = vadd.xlane.f32.xlu0 %v393_v3  ;;  %v396_v10 = vadd.f32 %v2406_v6, %v2403_v5  ;;  %v2424_v13 = vld [vmem:[%s2374_s8 + $0x48] sm:$0xff]  ;;  %v2427_v14 = vld [vmem:[%s2374_s8 + $0x50] sm:$0xff]  ;;  %s1539_s23 = ssub.s32 (%p3159_p5), 25, %s1708_s22 }
  0x78   : > { %400 = vadd.xlane.f32.xlu1 %v399_v7  ;;  %v402_v11 = vadd.f32 %v2414_v9, %v2411_v8  ;;  %v2430_v15 = vld [vmem:[%s2374_s8 + $0x58] sm:$0xff]  ;;  %v405_v16 = vadd.f32 %v2424_v13, %v2421_v12  ;;  %v2437_v18 = vld [vmem:[%s2374_s8 + $0x60] sm:$0xff]  ;;  %v2440_v19 = vld [vmem:[%s2374_s8 + $0x68] sm:$0xff]  ;;  %p1540_p13 = scmp.lt.s32.totalorder (%p3159_p5), %s1539_s23, 16 }
  0x79   : > { %v408_v17 = vadd.f32 %v2430_v15, %v2427_v14  ;;  %v2443_v20 = vld [vmem:[%s2374_s8 + $0x70] sm:$0xff]  ;;  %v2446_v21 = vld [vmem:[%s2374_s8 + $0x78] sm:$0xff]  ;;  %v411_v22 = vadd.f32 %v2440_v19, %v2437_v18  ;;  %v2453_v24 = vld [vmem:[%s2374_s8 + $0x80] sm:$0xff] }
  0x7a   : > { %v414_v23 = vadd.f32 %v2446_v21, %v2443_v20  ;;  %v2456_v25 = vld [vmem:[%s2374_s8 + $0x88] sm:$0xff]  ;;  %v2459_v26 = vld [vmem:[%s2374_s8 + $0x90] sm:$0xff]  ;;  %v2462_v27 = vld [vmem:[%s2374_s8 + $0x98] sm:$0xff] }
  0x7b   : > { %397 = vadd.xlane.f32.xlu0 %v396_v10  ;;  %v417_v28 = vadd.f32 %v2456_v25, %v2453_v24  ;;  %v420_v29 = vadd.f32 %v2462_v27, %v2459_v26  ;;  %v2469_v30 = vld [vmem:[%s2374_s8 + $0xa0] sm:$0xff]  ;;  %v2472_v31 = vld [vmem:[%s2374_s8 + $0xa8] sm:$0xff]  ;;  %v2475_v32 = vld [vmem:[%s2374_s8 + $0xb0] sm:$0xff] }
  0x7c   : > { %403 = vadd.xlane.f32.xlu1 %v402_v11  ;;  %v2478_v33 = vld [vmem:[%s2374_s8 + $0xb8] sm:$0xff]  ;;  %v423_v34 = vadd.f32 %v2472_v31, %v2469_v30  ;;  %v2485_v36 = vld [vmem:[%s2374_s8 + $0xc0] sm:$0xff]  ;;  %v2488_v37 = vld [vmem:[%s2374_s8 + $0xc8] sm:$0xff] }
  0x7d   : > { %v426_v35 = vadd.f32 %v2478_v33, %v2475_v32  ;;  %v2491_v38 = vld [vmem:[%s2374_s8 + $0xd0] sm:$0xff]  ;;  %v2494_v39 = vld [vmem:[%s2374_s8 + $0xd8] sm:$0xff]  ;;  %v429_v40 = vadd.f32 %v2488_v37, %v2485_v36  ;;  %v2501_v42 = vld [vmem:[%s2374_s8 + $0xe0] sm:$0xff] }
  0x7e   : > { %v432_v41 = vadd.f32 %v2494_v39, %v2491_v38  ;;  %v2504_v43 = vld [vmem:[%s2374_s8 + $0xe8] sm:$0xff]  ;;  %v2507_v44 = vld [vmem:[%s2374_s8 + $0xf0] sm:$0xff]  ;;  %v2510_v45 = vld [vmem:[%s2374_s8 + $0xf8] sm:$0xff] }
  0x7f   : > { %406 = vadd.xlane.f32.xlu0 %v405_v16  ;;  %v435_v46 = vadd.f32 %v2504_v43, %v2501_v42  ;;  %v438_v47 = vadd.f32 %v2510_v45, %v2507_v44  ;;  %v767_v48 = vld [vmem:[#allocation7 + $0xf8] sm:$0xff]  ;;  %v766_v49 = vld [vmem:[#allocation7 + $0xf0] sm:$0xff]  ;;  %v765_v50 = vld [vmem:[#allocation7 + $0xe8] sm:$0xff] }
  0x80   : > { %409 = vadd.xlane.f32.xlu1 %v408_v17  ;;  %812 = vmatprep.subr.mxu0 %v767_v48  ;;  %v764_v51 = vld [vmem:[#allocation7 + $0xe0] sm:$0xff]  ;;  %v763_v52 = vld [vmem:[#allocation7 + $0xd8] sm:$0xff]  ;;  %v762_v53 = vld [vmem:[#allocation7 + $0xd0] sm:$0xff] }
  0x81   : > { %813 = vmatpush1.msra.mxu0 %v766_v49  ;;  %v761_v54 = vld [vmem:[#allocation7 + $0xc8] sm:$0xff]  ;;  %v760_v55 = vld [vmem:[#allocation7 + $0xc0] sm:$0xff]  ;;  %v759_v56 = vld [vmem:[#allocation7 + $0xb8] sm:$0xff] }
  0x82   : > { %814 = vmatprep.subr.mxu0 %v765_v50  ;;  %v758_v57 = vld [vmem:[#allocation7 + $0xb0] sm:$0xff]  ;;  %v757_v58 = vld [vmem:[#allocation7 + $0xa8] sm:$0xff]  ;;  %v756_v59 = vld [vmem:[#allocation7 + $0xa0] sm:$0xff] }
  0x83   : > { %412 = vadd.xlane.f32.xlu0 %v411_v22  ;;  %815 = vmatpush1.msra.mxu0 %v764_v51  ;;  %v755_v60 = vld [vmem:[#allocation7 + $0x98] sm:$0xff]  ;;  %v754_v61 = vld [vmem:[#allocation7 + $0x90] sm:$0xff]  ;;  %v753_v62 = vld [vmem:[#allocation7 + $0x88] sm:$0xff] }
  0x84   : > { %415 = vadd.xlane.f32.xlu1 %v414_v23  ;;  %816 = vmatprep.subr.mxu0 %v763_v52  ;;  %v752_v63 = vld [vmem:[#allocation7 + $0x80] sm:$0xff]  ;;  %v751_v3 = vld [vmem:[#allocation7 + $0x78] sm:$0xff]  ;;  %v750_v7 = vld [vmem:[#allocation7 + $0x70] sm:$0xff] }
  0x85   : > { %817 = vmatpush1.msra.mxu0 %v762_v53  ;;  %v749_v10 = vld [vmem:[#allocation7 + $0x68] sm:$0xff]  ;;  %v748_v11 = vld [vmem:[#allocation7 + $0x60] sm:$0xff]  ;;  %v747_v16 = vld [vmem:[#allocation7 + $0x58] sm:$0xff] }
  0x86   : > { %818 = vmatprep.subr.mxu0 %v761_v54  ;;  %v746_v17 = vld [vmem:[#allocation7 + $0x50] sm:$0xff]  ;;  %v745_v22 = vld [vmem:[#allocation7 + $0x48] sm:$0xff]  ;;  %v744_v23 = vld [vmem:[#allocation7 + $0x40] sm:$0xff] }
  0x87   : > { %418 = vadd.xlane.f32.xlu0 %v417_v28  ;;  %819 = vmatpush1.msra.mxu0 %v760_v55  ;;  %v743_v28 = vld [vmem:[#allocation7 + $0x38] sm:$0xff]  ;;  %v798_v49 = vld [vmem:[#allocation7 + $0x1f0] sm:$0xff]  ;;  %v797_v50 = vld [vmem:[#allocation7 + $0x1e8] sm:$0xff] }
  0x88   : > { %421 = vadd.xlane.f32.xlu1 %v420_v29  ;;  %820 = vmatprep.subr.mxu0 %v759_v56  ;;  %v742_v29 = vld [vmem:[#allocation7 + $0x30] sm:$0xff]  ;;  %v799_v48 = vld [vmem:[#allocation7 + $0x1f8] sm:$0xff]  ;;  %v796_v51 = vld [vmem:[#allocation7 + $0x1e0] sm:$0xff] }
  0x89   : > { %821 = vmatpush1.msra.mxu0 %v758_v57  ;;  %v795_v52 = vld [vmem:[#allocation7 + $0x1d8] sm:$0xff]  ;;  %v794_v53 = vld [vmem:[#allocation7 + $0x1d0] sm:$0xff]  ;;  %v793_v54 = vld [vmem:[#allocation7 + $0x1c8] sm:$0xff] }
  0x8a   : > { %822 = vmatprep.subr.mxu0 %v757_v58 }
  0x8b   : > { %424 = vadd.xlane.f32.xlu0 %v423_v34  ;;  %823 = vmatpush1.msra.mxu0 %v756_v59  ;;  %v741_v34 = vld [vmem:[#allocation7 + $0x28] sm:$0xff] }
  0x8c   : > { %427 = vadd.xlane.f32.xlu1 %v426_v35  ;;  %824 = vmatprep.subr.mxu0 %v755_v60  ;;  %v740_v35 = vld [vmem:[#allocation7 + $0x20] sm:$0xff] }
  0x8d   : > { %825 = vmatpush1.msra.mxu0 %v754_v61 }
  0x8e   : > { %826 = vmatprep.subr.mxu0 %v753_v62 }
  0x8f   : > { %430 = vadd.xlane.f32.xlu0 %v429_v40  ;;  %827 = vmatpush1.msra.mxu0 %v752_v63  ;;  %v739_v40 = vld [vmem:[#allocation7 + $0x18] sm:$0xff] }
  0x90   : > { %433 = vadd.xlane.f32.xlu1 %v432_v41  ;;  %828 = vmatprep.subr.mxu0 %v751_v3  ;;  %v738_v41 = vld [vmem:[#allocation7 + $0x10] sm:$0xff] }
  0x91   : > { %829 = vmatpush1.msra.mxu0 %v750_v7 }
  0x92   : > { %830 = vmatprep.subr.mxu0 %v749_v10 }
  0x93   : > { %436 = vadd.xlane.f32.xlu0 %v435_v46  ;;  %831 = vmatpush1.msra.mxu0 %v748_v11  ;;  %v737_v46 = vld [vmem:[#allocation7 + $0x8] sm:$0xff] }
  0x94   : > { %439 = vadd.xlane.f32.xlu1 %v438_v47  ;;  %832 = vmatprep.subr.mxu0 %v747_v16  ;;  %v736_v47 = vld [vmem:[#allocation7] sm:$0xff] }
  0x95   : > { %833 = vmatpush1.msra.mxu0 %v746_v17 }
  0x96   : > { %834 = vmatprep.subr.mxu0 %v745_v22 }
  0x97   : > { %835 = vmatpush1.msra.mxu0 %v744_v23 }
  0x98   : > { %836 = vmatprep.subr.mxu0 %v743_v28 }
  0x99   : > { %837 = vmatpush1.msra.mxu0 %v742_v29 }
  0x9a   : > { %838 = vmatprep.subr.mxu0 %v741_v34 }
  0x9b   : > { %839 = vmatpush1.msra.mxu0 %v740_v35 }
  0x9c   : > { %840 = vmatprep.subr.mxu0 %v739_v40 }
  0x9d   : > { %841 = vmatpush1.msra.mxu0 %v738_v41 }
  0x9e   : > { %842 = vmatprep.subr.mxu0 %v737_v46 }
  0x9f   : > { %843 = vmatpush1.msra.mxu0 %v736_v47 }
  0xa0   : > { %844 = vmatprep.subr.mxu0 %v799_v48 }
  0xa1   : > { %845 = vmatpush2.msra.mxu0 %v798_v49 }
  0xa2   : > { %846 = vmatprep.subr.mxu0 %v797_v50 }
  0xa3   : > { %847 = vmatpush2.msra.mxu0 %v796_v51 }
  0xa4   : > { %848 = vmatprep.subr.mxu0 %v795_v52 }
  0xa5   : > { %849 = vmatpush2.msra.mxu0 %v794_v53 }
  0xa6   : > { %850 = vmatprep.subr.mxu0 %v793_v54 }
 0x100   : > { %v395_v55 = vpop.xlane.xlu0 %394 }
 0x101   : > { %v442_v56 = vmul.f32 0.00390625, %v395_v55  ;;  %v401_v57 = vpop.xlane.xlu1 %400 }
 0x102   : > { %v444_v58 = vmul.f32 0.00390625, %v401_v57 }
 0x103   : > { %v2517_v59 = vsub.f32 %v2389_v0, %v442_v56  ;;  %v2520_v60 = vsub.f32 %v2392_v1, %v442_v56 }
 0x104   : > { %v2523_v61 = vsub.f32 %v2395_v2, %v444_v58  ;;  %v2526_v62 = vsub.f32 %v2400_v4, %v444_v58  ;;  %v398_v63 = vpop.xlane.xlu0 %397 }
 0x105   : > { %v443_v3 = vmul.f32 0.00390625, %v398_v63  ;;  %v404_v7 = vpop.xlane.xlu1 %403  ;;  %v490_v10 = vmul.f32 %v2517_v59, %v2517_v59  ;;  %v491_v11 = vmul.f32 %v2520_v60, %v2520_v60 }
 0x106   : > { %v445_v0 = vmul.f32 0.00390625, %v404_v7  ;;  %v494_v1 = vmul.f32 %v2523_v61, %v2523_v61  ;;  %v495_v2 = vmul.f32 %v2526_v62, %v2526_v62 }
 0x107   : > { %v2537_v16 = vsub.f32 %v2403_v5, %v443_v3  ;;  %v2540_v4 = vsub.f32 %v2406_v6, %v443_v3  ;;  %v522_v17 = vadd.f32 %v491_v11, %v490_v10 }
 0x108   : > { %v2543_v22 = vsub.f32 %v2411_v8, %v445_v0  ;;  %v2546_v23 = vsub.f32 %v2414_v9, %v445_v0  ;;  %v407_v28 = vpop.xlane.xlu0 %406  ;;  %v528_v35 = vadd.f32 %v495_v2, %v494_v1  ;;  %v792_v1 = vld [vmem:[#allocation7 + $0x1c0] sm:$0xff] }
 0x109   : > { %v446_v29 = vmul.f32 0.00390625, %v407_v28  ;;  %523 = vadd.xlane.f32.xlu0 %v522_v17  ;;  %v410_v34 = vpop.xlane.xlu1 %409  ;;  %v492_v40 = vmul.f32 %v2537_v16, %v2537_v16  ;;  %v493_v5 = vmul.f32 %v2540_v4, %v2540_v4  ;;  %851 = vmatpush2.msra.mxu0 %v792_v1 }
 0x10a   : > { %v447_v6 = vmul.f32 0.00390625, %v410_v34  ;;  %v496_v41 = vmul.f32 %v2543_v22, %v2543_v22  ;;  %v497_v8 = vmul.f32 %v2546_v23, %v2546_v23 }
 0x10b   : > { %v2557_v9 = vsub.f32 %v2421_v12, %v446_v29  ;;  %v2560_v46 = vsub.f32 %v2424_v13, %v446_v29  ;;  %v525_v47 = vadd.f32 %v493_v5, %v492_v40  ;;  %v791_v29 = vld [vmem:[#allocation7 + $0x1b8] sm:$0xff]  ;;  %v790_v5 = vld [vmem:[#allocation7 + $0x1b0] sm:$0xff] }
 0x10c   : > { %v2563_v48 = vsub.f32 %v2427_v14, %v447_v6  ;;  %v2566_v49 = vsub.f32 %v2430_v15, %v447_v6  ;;  %v413_v50 = vpop.xlane.xlu0 %412  ;;  %v531_v53 = vadd.f32 %v497_v8, %v496_v41  ;;  %852 = vmatprep.subr.mxu0 %v791_v29 }
 0x10d   : > { %v448_v51 = vmul.f32 0.00390625, %v413_v50  ;;  %529 = vadd.xlane.f32.xlu0 %v528_v35  ;;  %526 = vadd.xlane.f32.xlu1 %v525_v47  ;;  %v416_v52 = vpop.xlane.xlu1 %415  ;;  %v498_v12 = vmul.f32 %v2557_v9, %v2557_v9  ;;  %v499_v13 = vmul.f32 %v2560_v46, %v2560_v46  ;;  %v789_v47 = vld [vmem:[#allocation7 + $0x1a8] sm:$0xff] }
 0x10e   : > { %v449_v54 = vmul.f32 0.00390625, %v416_v52  ;;  %v500_v14 = vmul.f32 %v2563_v48, %v2563_v48  ;;  %v501_v15 = vmul.f32 %v2566_v49, %v2566_v49  ;;  %853 = vmatpush2.msra.mxu0 %v790_v5 }
 0x10f   : > { %v2577_v55 = vsub.f32 %v2437_v18, %v448_v51  ;;  %v2580_v56 = vsub.f32 %v2440_v19, %v448_v51  ;;  %v534_v57 = vadd.f32 %v499_v13, %v498_v12  ;;  %854 = vmatprep.subr.mxu0 %v789_v47  ;;  %v788_v12 = vld [vmem:[#allocation7 + $0x1a0] sm:$0xff] }
 0x110   : > { %v2583_v58 = vsub.f32 %v2443_v20, %v449_v54  ;;  %v2586_v63 = vsub.f32 %v2446_v21, %v449_v54  ;;  %v419_v3 = vpop.xlane.xlu0 %418  ;;  %v537_v11 = vadd.f32 %v501_v15, %v500_v14  ;;  %855 = vmatpush2.msra.mxu0 %v788_v12  ;;  %v787_v15 = vld [vmem:[#allocation7 + $0x198] sm:$0xff]  ;;  %v780_v12 = vld [vmem:[#allocation7 + $0x160] sm:$0xff] }
 0x111   : > { %v450_v7 = vmul.f32 0.00390625, %v419_v3  ;;  %532 = vadd.xlane.f32.xlu1 %v531_v53  ;;  %535 = vadd.xlane.f32.xlu0 %v534_v57  ;;  %v422_v10 = vpop.xlane.xlu1 %421  ;;  %v502_v18 = vmul.f32 %v2577_v55, %v2577_v55  ;;  %v503_v19 = vmul.f32 %v2580_v56, %v2580_v56 }
 0x112   : > { %v451_v0 = vmul.f32 0.00390625, %v422_v10  ;;  %v504_v20 = vmul.f32 %v2583_v58, %v2583_v58  ;;  %v505_v21 = vmul.f32 %v2586_v63, %v2586_v63  ;;  %v786_v10 = vld [vmem:[#allocation7 + $0x190] sm:$0xff]  ;;  %856 = vmatprep.subr.mxu0 %v787_v15  ;;  %v779_v15 = vld [vmem:[#allocation7 + $0x158] sm:$0xff] }
 0x113   : > { %v2597_v2 = vsub.f32 %v2453_v24, %v450_v7  ;;  %v2600_v17 = vsub.f32 %v2456_v25, %v450_v7  ;;  %v540_v28 = vadd.f32 %v503_v19, %v502_v18  ;;  %v785_v18 = vld [vmem:[#allocation7 + $0x188] sm:$0xff]  ;;  %857 = vmatpush2.msra.mxu0 %v786_v10  ;;  %v775_v10 = vld [vmem:[#allocation7 + $0x138] sm:$0xff] }
 0x114   : > { %v2603_v34 = vsub.f32 %v2459_v26, %v451_v0  ;;  %v2606_v35 = vsub.f32 %v2462_v27, %v451_v0  ;;  %v425_v40 = vpop.xlane.xlu0 %424  ;;  %v543_v41 = vadd.f32 %v505_v21, %v504_v20  ;;  %v784_v21 = vld [vmem:[#allocation7 + $0x180] sm:$0xff]  ;;  %858 = vmatprep.subr.mxu0 %v785_v18  ;;  %v771_v18 = vld [vmem:[#allocation7 + $0x118] sm:$0xff] }
 0x115   : > { %v452_v6 = vmul.f32 0.00390625, %v425_v40  ;;  %538 = vadd.xlane.f32.xlu1 %v537_v11  ;;  %541 = vadd.xlane.f32.xlu0 %v540_v28  ;;  %v428_v24 = vpop.xlane.xlu1 %427  ;;  %v506_v25 = vmul.f32 %v2597_v2, %v2597_v2  ;;  %v507_v8 = vmul.f32 %v2600_v17, %v2600_v17  ;;  %v783_v40 = vld [vmem:[#allocation7 + $0x178] sm:$0xff] }
 0x116   : > { %v453_v26 = vmul.f32 0.00390625, %v428_v24  ;;  %v508_v27 = vmul.f32 %v2603_v34, %v2603_v34  ;;  %v509_v50 = vmul.f32 %v2606_v35, %v2606_v35  ;;  %859 = vmatpush2.msra.mxu0 %v784_v21  ;;  %v769_v21 = vld [vmem:[#allocation7 + $0x108] sm:$0xff] }
 0x117   : > { %v2617_v51 = vsub.f32 %v2469_v30, %v452_v6  ;;  %v2620_v52 = vsub.f32 %v2472_v31, %v452_v6  ;;  %v546_v53 = vadd.f32 %v507_v8, %v506_v25  ;;  %860 = vmatprep.subr.mxu0 %v783_v40  ;;  %v1260_v40 = vld [vmem:[#allocation8 + $0xf8] sm:$0xff] }
 0x118   : > { %v2623_v13 = vsub.f32 %v2475_v32, %v453_v26  ;;  %v2626_v54 = vsub.f32 %v2478_v33, %v453_v26  ;;  %v431_v14 = vpop.xlane.xlu0 %430  ;;  %v549_v3 = vadd.f32 %v509_v50, %v508_v27  ;;  %v781_v27 = vld [vmem:[#allocation7 + $0x168] sm:$0xff]  ;;  %1305 = vmatprep.subr.mxu1 %v1260_v40 }
 0x119   : > { %v454_v57 = vmul.f32 0.00390625, %v431_v14  ;;  %544 = vadd.xlane.f32.xlu1 %v543_v41  ;;  %547 = vadd.xlane.f32.xlu0 %v546_v53  ;;  %v434_v30 = vpop.xlane.xlu1 %433  ;;  %v510_v31 = vmul.f32 %v2617_v51, %v2617_v51  ;;  %v511_v7 = vmul.f32 %v2620_v52, %v2620_v52  ;;  %v782_v41 = vld [vmem:[#allocation7 + $0x170] sm:$0xff] }
 0x11a   : > { %v455_v32 = vmul.f32 0.00390625, %v434_v30  ;;  %v512_v33 = vmul.f32 %v2623_v13, %v2623_v13  ;;  %v513_v11 = vmul.f32 %v2626_v54, %v2626_v54  ;;  %861 = vmatpush2.msra.mxu0 %v782_v41  ;;  %v778_v30 = vld [vmem:[#allocation7 + $0x150] sm:$0xff]  ;;  %v1254_v41 = vld [vmem:[#allocation8 + $0xc8] sm:$0xff] }
 0x11b   : > { %v2637_v19 = vsub.f32 %v2485_v36, %v454_v57  ;;  %v2640_v0 = vsub.f32 %v2488_v37, %v454_v57  ;;  %v552_v20 = vadd.f32 %v511_v7, %v510_v31  ;;  %862 = vmatprep.subr.mxu0 %v781_v27  ;;  %v776_v7 = vld [vmem:[#allocation7 + $0x140] sm:$0xff] }
 0x11c   : > { %v2643_v1 = vsub.f32 %v2491_v38, %v455_v32  ;;  %v2646_v28 = vsub.f32 %v2494_v39, %v455_v32  ;;  %v437_v29 = vpop.xlane.xlu0 %436  ;;  %v555_v6 = vadd.f32 %v513_v11, %v512_v33  ;;  %863 = vmatpush2.msra.mxu0 %v780_v12  ;;  %v774_v32 = vld [vmem:[#allocation7 + $0x130] sm:$0xff]  ;;  %v773_v33 = vld [vmem:[#allocation7 + $0x128] sm:$0xff]  ;;  %v772_v11 = vld [vmem:[#allocation7 + $0x120] sm:$0xff] }
 0x11d   : > { %v456_v5 = vmul.f32 0.00390625, %v437_v29  ;;  %550 = vadd.xlane.f32.xlu1 %v549_v3  ;;  %553 = vadd.xlane.f32.xlu0 %v552_v20  ;;  %v440_v36 = vpop.xlane.xlu1 %439  ;;  %v514_v37 = vmul.f32 %v2637_v19, %v2637_v19  ;;  %v515_v24 = vmul.f32 %v2640_v0, %v2640_v0  ;;  %v777_v3 = vld [vmem:[#allocation7 + $0x148] sm:$0xff]  ;;  %v770_v20 = vld [vmem:[#allocation7 + $0x110] sm:$0xff]  ;;  %v768_v29 = vld [vmem:[#allocation7 + $0x100] sm:$0xff] }
 0x11e   : > { %v457_v38 = vmul.f32 0.00390625, %v440_v36  ;;  %v516_v39 = vmul.f32 %v2643_v1, %v2643_v1  ;;  %v517_v25 = vmul.f32 %v2646_v28, %v2646_v28  ;;  %864 = vmatprep.subr.mxu0 %v779_v15  ;;  %v1258_v36 = vld [vmem:[#allocation8 + $0xe8] sm:$0xff]  ;;  %v1249_v27 = vld [vmem:[#allocation8 + $0xa0] sm:$0xff]  ;;  %v1248_v12 = vld [vmem:[#allocation8 + $0x98] sm:$0xff] }
 0x11f   : > { %v2657_v8 = vsub.f32 %v2501_v42, %v456_v5  ;;  %v2660_v47 = vsub.f32 %v2504_v43, %v456_v5  ;;  %v558_v26 = vadd.f32 %v515_v24, %v514_v37  ;;  %865 = vmatpush2.msra.mxu0 %v778_v30  ;;  %v1259_v5 = vld [vmem:[#allocation8 + $0xf0] sm:$0xff]  ;;  %v1256_v37 = vld [vmem:[#allocation8 + $0xd8] sm:$0xff] }
 0x120   : > { %v2663_v50 = vsub.f32 %v2507_v44, %v457_v38  ;;  %v2666_v53 = vsub.f32 %v2510_v45, %v457_v38  ;;  %v561_v14 = vadd.f32 %v517_v25, %v516_v39  ;;  %866 = vmatprep.subr.mxu0 %v777_v3  ;;  %1306 = vmatpush1.msra.mxu1 %v1259_v5  ;;  %v1255_v24 = vld [vmem:[#allocation8 + $0xd0] sm:$0xff]  ;;  %v1253_v38 = vld [vmem:[#allocation8 + $0xc0] sm:$0xff]  ;;  %v1252_v39 = vld [vmem:[#allocation8 + $0xb8] sm:$0xff] }
 0x121   : > { %556 = vadd.xlane.f32.xlu1 %v555_v6  ;;  %559 = vadd.xlane.f32.xlu0 %v558_v26  ;;  %v518_v42 = vmul.f32 %v2657_v8, %v2657_v8  ;;  %v519_v43 = vmul.f32 %v2660_v47, %v2660_v47  ;;  %v1257_v6 = vld [vmem:[#allocation8 + $0xe0] sm:$0xff]  ;;  %v1251_v25 = vld [vmem:[#allocation8 + $0xb0] sm:$0xff]  ;;  %v1250_v26 = vld [vmem:[#allocation8 + $0xa8] sm:$0xff] }
 0x122   : > { %v520_v57 = vmul.f32 %v2663_v50, %v2663_v50  ;;  %v521_v44 = vmul.f32 %v2666_v53, %v2666_v53  ;;  %867 = vmatpush2.msra.mxu0 %v776_v7  ;;  %1307 = vmatprep.subr.mxu1 %v1258_v36  ;;  %v1244_v15 = vld [vmem:[#allocation8 + $0x78] sm:$0xff]  ;;  %v1239_v3 = vld [vmem:[#allocation8 + $0x50] sm:$0xff] }
 0x123   : > { %v564_v45 = vadd.f32 %v519_v43, %v518_v42  ;;  %868 = vmatprep.subr.mxu0 %v775_v10  ;;  %1308 = vmatpush1.msra.mxu1 %v1257_v6  ;;  %v1246_v42 = vld [vmem:[#allocation8 + $0x88] sm:$0xff]  ;;  %v1245_v43 = vld [vmem:[#allocation8 + $0x80] sm:$0xff]  ;;  %v1240_v30 = vld [vmem:[#allocation8 + $0x58] sm:$0xff] }
 0x124   : > { %v567_v31 = vadd.f32 %v521_v44, %v520_v57  ;;  %869 = vmatpush2.msra.mxu0 %v774_v32  ;;  %1309 = vmatprep.subr.mxu1 %v1256_v37  ;;  %v1243_v57 = vld [vmem:[#allocation8 + $0x70] sm:$0xff]  ;;  %v1242_v44 = vld [vmem:[#allocation8 + $0x68] sm:$0xff] }
 0x125   : > { %562 = vadd.xlane.f32.xlu1 %v561_v14  ;;  %565 = vadd.xlane.f32.xlu0 %v564_v45  ;;  %v1247_v14 = vld [vmem:[#allocation8 + $0x90] sm:$0xff]  ;;  %v1241_v45 = vld [vmem:[#allocation8 + $0x60] sm:$0xff] }
 0x126   : > { %870 = vmatprep.subr.mxu0 %v773_v33  ;;  %1310 = vmatpush1.msra.mxu1 %v1255_v24 }
 0x127   : > { %871 = vmatpush2.msra.mxu0 %v772_v11  ;;  %1311 = vmatprep.subr.mxu1 %v1254_v41 }
 0x128   : > { %872 = vmatprep.subr.mxu0 %v771_v18  ;;  %1312 = vmatpush1.msra.mxu1 %v1253_v38 }
 0x129   : > { %568 = vadd.xlane.f32.xlu1 %v567_v31  ;;  %873 = vmatpush2.msra.mxu0 %v770_v20  ;;  %v651_v20 = vlaneseq }
 0x12a   : > { %874 = vmatprep.subr.mxu0 %v769_v21  ;;  %1313 = vmatprep.subr.mxu1 %v1252_v39 }
 0x12b   : > { %875 = vmatpush2.msra.mxu0 %v768_v29  ;;  %1314 = vmatpush1.msra.mxu1 %v1251_v25  ;;  %v652_v37 = vshrl.u32 %v651_v20, 7 }
 0x12c   : > { %1315 = vmatprep.subr.mxu1 %v1250_v26 }
 0x12d   : > { %1316 = vmatpush1.msra.mxu1 %v1249_v27  ;;  %v2676_v27 = vsub.s32 1, %v652_v37 }
 0x12e   : > { %1317 = vmatprep.subr.mxu1 %v1248_v12  ;;  %v391_v12 = vld [vmem:[#allocation5] sm:$0x3] }
 0x12f   : > { %1318 = vmatpush1.msra.mxu1 %v1247_v14  ;;  %v2678_v14 = vsub.s32 0, %v652_v37 }
 0x130   : > { %1319 = vmatprep.subr.mxu1 %v1246_v42 }
 0x131   : > { %1320 = vmatpush1.msra.mxu1 %v1245_v43 }
 0x132   : > { %1321 = vmatprep.subr.mxu1 %v1244_v15  ;;  %v392_v15 = vld [vmem:[%s3133_s2] sm:$0x3] }
 0x133   : > { %1322 = vmatpush1.msra.mxu1 %v1243_v57 }
 0x134   : > { %1323 = vmatprep.subr.mxu1 %v1242_v44 }
 0x135   : > { %1324 = vmatpush1.msra.mxu1 %v1241_v45  ;;  %v2684_v45 = vrot.slane %v391_v12, %v2676_v27 }
 0x136   : > { %1325 = vmatprep.subr.mxu1 %v1240_v30 }
 0x137   : > { %1326 = vmatpush1.msra.mxu1 %v1239_v3 }
 0x192   : > { %v524_v31 = vpop.xlane.xlu0 %523 }
 0x193   : > { %v570_v7 = vmul.f32 0.00390625, %v524_v31  ;;  %v2687_v31 = vrot.slane %v391_v12, %v2678_v14 }
 0x195   : > { %v586_v10 = vadd.f32 1e-05, %v570_v7 }
 0x196   : > { %v527_v32 = vpop.xlane.xlu1 %526  ;;  %v530_v33 = vpop.xlane.xlu0 %529 }
 0x197   : > { %1800 = vrsqrt.f32 %v586_v10  ;;  %v571_v11 = vmul.f32 0.00390625, %v527_v32  ;;  %v572_v18 = vmul.f32 0.00390625, %v530_v33  ;;  %v2691_v10 = vrot.slane %v392_v15, %v2676_v27 }
 0x199   : > { %v587_v21 = vadd.f32 1e-05, %v571_v11  ;;  %v588_v29 = vadd.f32 1e-05, %v572_v18  ;;  %v2695_v11 = vrot.slane %v392_v15, %v2678_v14 }
 0x19a   : > { %v533_v40 = vpop.xlane.xlu1 %532  ;;  %v536_v5 = vpop.xlane.xlu0 %535 }
 0x19b   : > { %1802 = vrsqrt.f32 %v587_v21  ;;  %v573_v36 = vmul.f32 0.00390625, %v533_v40  ;;  %v574_v6 = vmul.f32 0.00390625, %v536_v5 }
 0x19c   : > { %1804 = vrsqrt.f32 %v588_v29 }
 0x19d   : > { %v589_v24 = vadd.f32 1e-05, %v573_v36  ;;  %v590_v41 = vadd.f32 1e-05, %v574_v6 }
 0x19e   : > { %v539_v38 = vpop.xlane.xlu1 %538  ;;  %v542_v39 = vpop.xlane.xlu0 %541 }
 0x19f   : > { %1806 = vrsqrt.f32 %v589_v24  ;;  %v575_v25 = vmul.f32 0.00390625, %v539_v38  ;;  %v576_v26 = vmul.f32 0.00390625, %v542_v39 }
 0x1a0   : > { %1808 = vrsqrt.f32 %v590_v41 }
 0x1a1   : > { %v591_v42 = vadd.f32 1e-05, %v575_v25  ;;  %v592_v57 = vadd.f32 1e-05, %v576_v26 }
 0x1a2   : > { %v545_v43 = vpop.xlane.xlu1 %544  ;;  %v548_v3 = vpop.xlane.xlu0 %547 }
 0x1a3   : > { %1810 = vrsqrt.f32 %v591_v42  ;;  %v577_v44 = vmul.f32 0.00390625, %v545_v43  ;;  %v578_v20 = vmul.f32 0.00390625, %v548_v3 }
 0x1a4   : > { %v1801_v30 = vpop.eup %1800  ;;  %1812 = vrsqrt.f32 %v592_v57 }
 0x1a5   : > { %v619_v7 = vmul.f32 %v1801_v30, %v2520_v60  ;;  %v618_v32 = vmul.f32 %v1801_v30, %v2517_v59  ;;  %v593_v18 = vadd.f32 1e-05, %v577_v44  ;;  %v594_v39 = vadd.f32 1e-05, %v578_v20 }
 0x1a6   : > { %v551_v33 = vpop.xlane.xlu1 %550  ;;  %v554_v37 = vpop.xlane.xlu0 %553 }
 0x1a7   : > { %v662_v21 = vmul.f32 %v2684_v45, %v619_v7  ;;  %v661_v40 = vmul.f32 %v2687_v31, %v618_v32  ;;  %v579_v36 = vmul.f32 0.00390625, %v551_v33  ;;  %1814 = vrsqrt.f32 %v593_v18 }
 0x1a8   : > { %v1803_v29 = vpop.eup %1802  ;;  %v580_v43 = vmul.f32 0.00390625, %v554_v37  ;;  %1816 = vrsqrt.f32 %v594_v39 }
 0x1a9   : > { %v1805_v5 = vpop.eup %1804  ;;  %v705_v60 = vadd.f32 %v2691_v10, %v662_v21  ;;  %v621_v6 = vmul.f32 %v1803_v29, %v2540_v4  ;;  %v704_v59 = vadd.f32 %v2695_v11, %v661_v40  ;;  %v620_v24 = vmul.f32 %v1803_v29, %v2537_v16 }
 0x1aa   : > { %v623_v41 = vmul.f32 %v1805_v5, %v2526_v62  ;;  %v622_v38 = vmul.f32 %v1805_v5, %v2523_v61  ;;  %v595_v62 = vadd.f32 1e-05, %v579_v36  ;;  %v557_v32 = vpop.xlane.xlu1 %556  ;;  %v596_v18 = vadd.f32 1e-05, %v580_v43 }
 0x1ab   : > { %876 = vmatprep.mubr.f32.mxu0 %v705_v60  ;;  %v664_v25 = vmul.f32 %v2684_v45, %v621_v6  ;;  %v663_v12 = vmul.f32 %v2687_v31, %v620_v24  ;;  %v581_v29 = vmul.f32 0.00390625, %v557_v32 }
 0x1ac   : > { %v1807_v26 = vpop.eup %1806  ;;  %877 = vmatmul.mubr.f32.vlgmr.msra.gmra.mxu0 %v704_v59  ;;  %v666_v4 = vmul.f32 %v2684_v45, %v623_v41  ;;  %v665_v57 = vmul.f32 %v2687_v31, %v622_v38  ;;  %1818 = vrsqrt.f32 %v595_v62 }
 0x1ad   : > { %v1809_v42 = vpop.eup %1808  ;;  %v707_v15 = vadd.f32 %v2691_v10, %v664_v25  ;;  %v625_v16 = vmul.f32 %v1807_v26, %v2546_v23  ;;  %v706_v61 = vadd.f32 %v2695_v11, %v663_v12  ;;  %v624_v44 = vmul.f32 %v1807_v26, %v2543_v22  ;;  %v560_v23 = vpop.xlane.xlu0 %559 }
 0x1ae   : > { %v709_v30 = vadd.f32 %v2691_v10, %v666_v4  ;;  %v627_v33 = vmul.f32 %v1809_v42, %v2560_v46  ;;  %v708_v20 = vadd.f32 %v2695_v11, %v665_v57  ;;  %v626_v22 = vmul.f32 %v1809_v42, %v2557_v9  ;;  %v563_v9 = vpop.xlane.xlu1 %562 }
 0x1af   : > { %882 = vmatprep.mubr.f32.mxu0 %v707_v15  ;;  %v668_v3 = vmul.f32 %v2684_v45, %v625_v16  ;;  %v667_v21 = vmul.f32 %v2687_v31, %v624_v44  ;;  %v582_v46 = vmul.f32 0.00390625, %v560_v23  ;;  %1820 = vrsqrt.f32 %v596_v18 }
 0x1b0   : > { %v1811_v7 = vpop.eup %1810  ;;  %883 = vmatmul.mubr.f32.gmra.mxu0 %v706_v61  ;;  %v670_v5 = vmul.f32 %v2684_v45, %v627_v33  ;;  %v669_v37 = vmul.f32 %v2687_v31, %v626_v22  ;;  %v597_v24 = vadd.f32 1e-05, %v581_v29  ;;  %v583_v26 = vmul.f32 0.00390625, %v563_v9 }
 0x1b1   : > { %888 = vmatprep.mubr.f32.mxu0 %v709_v30  ;;  %v711_v40 = vadd.f32 %v2691_v10, %v668_v3  ;;  %v629_v36 = vmul.f32 %v1811_v7, %v2566_v49  ;;  %v1813_v60 = vpop.eup %1812  ;;  %v710_v6 = vadd.f32 %v2695_v11, %v667_v21  ;;  %v628_v59 = vmul.f32 %v1811_v7, %v2563_v48  ;;  %v566_v12 = vpop.xlane.xlu0 %565 }
 0x1b2   : > { %v713_v41 = vadd.f32 %v2691_v10, %v670_v5  ;;  %v631_v39 = vmul.f32 %v1813_v60, %v2580_v56  ;;  %v598_v25 = vadd.f32 1e-05, %v582_v46  ;;  %v712_v4 = vadd.f32 %v2695_v11, %v669_v37 }
 0x1b3   : > { %v672_v38 = vmul.f32 %v2684_v45, %v629_v36  ;;  %v671_v42 = vmul.f32 %v2687_v31, %v628_v59  ;;  %v630_v48 = vmul.f32 %v1813_v60, %v2577_v55  ;;  %1822 = vrsqrt.f32 %v597_v24 }
 0x1b4   : > { %889 = vmatmul.mubr.f32.gmra.mxu0 %v708_v20  ;;  %v1815_v49 = vpop.eup %1814  ;;  %v674_v15 = vmul.f32 %v2684_v45, %v631_v39  ;;  %v584_v62 = vmul.f32 0.00390625, %v566_v12  ;;  %v599_v61 = vadd.f32 1e-05, %v583_v26  ;;  %1824 = vrsqrt.f32 %v598_v25 }
 0x1b5   : > { %894 = vmatprep.mubr.f32.mxu0 %v711_v40  ;;  %v715_v43 = vadd.f32 %v2691_v10, %v672_v38  ;;  %v633_v16 = vmul.f32 %v1815_v49, %v2586_v63  ;;  %v1817_v56 = vpop.eup %1816  ;;  %v714_v57 = vadd.f32 %v2695_v11, %v671_v42  ;;  %v673_v44 = vmul.f32 %v2687_v31, %v630_v48  ;;  %v569_v63 = vpop.xlane.xlu1 %568 }
 0x1b6   : > { %v632_v30 = vmul.f32 %v1815_v49, %v2583_v58  ;;  %v717_v55 = vadd.f32 %v2691_v10, %v674_v15  ;;  %v635_v32 = vmul.f32 %v1817_v56, %v2600_v17  ;;  %v600_v33 = vadd.f32 1e-05, %v584_v62 }
 0x1b7   : > { %v676_v7 = vmul.f32 %v2684_v45, %v633_v16  ;;  %1826 = vrsqrt.f32 %v599_v61  ;;  %v716_v18 = vadd.f32 %v2695_v11, %v673_v44  ;;  %v634_v20 = vmul.f32 %v1817_v56, %v2597_v2 }
 0x1b8   : > { %895 = vmatmul.mubr.f32.gmra.mxu0 %v710_v6  ;;  %v675_v23 = vmul.f32 %v2687_v31, %v632_v30  ;;  %v585_v21 = vmul.f32 0.00390625, %v569_v63  ;;  %v678_v29 = vmul.f32 %v2684_v45, %v635_v32  ;;  %1828 = vrsqrt.f32 %v600_v33 }
 0x1b9   : > { %900 = vmatprep.mubr.f32.mxu0 %v713_v41  ;;  %v1819_v3 = vpop.eup %1818  ;;  %v719_v22 = vadd.f32 %v2691_v10, %v676_v7  ;;  %v677_v5 = vmul.f32 %v2687_v31, %v634_v20  ;;  %v1238_v20 = vld [vmem:[#allocation8 + $0x48] sm:$0xff] }
 0x1ba   : > { %v637_v40 = vmul.f32 %v1819_v3, %v2606_v35  ;;  %v718_v17 = vadd.f32 %v2695_v11, %v675_v23  ;;  %v636_v36 = vmul.f32 %v1819_v3, %v2603_v34  ;;  %v601_v60 = vadd.f32 1e-05, %v585_v21  ;;  %1327 = vmatprep.subr.mxu1 %v1238_v20  ;;  %v1234_v21 = vld [vmem:[#allocation8 + $0x28] sm:$0xff] }
 0x1bb   : > { %v721_v2 = vadd.f32 %v2691_v10, %v678_v29  ;;  %v720_v35 = vadd.f32 %v2695_v11, %v677_v5  ;;  %v1230_v29 = vld [vmem:[#allocation8 + $0x8] sm:$0xff] }
 0x1bc   : > { %901 = vmatmul.mubr.f32.gmra.mxu0 %v712_v4  ;;  %v1821_v58 = vpop.eup %1820  ;;  %v680_v46 = vmul.f32 %v2684_v45, %v637_v40  ;;  %v679_v59 = vmul.f32 %v2687_v31, %v636_v36  ;;  %1830 = vrsqrt.f32 %v601_v60  ;;  %v1292_v40 = vld [vmem:[#allocation8 + $0x1f8] sm:$0xff]  ;;  %v1290_v5 = vld [vmem:[#allocation8 + $0x1e8] sm:$0xff]  ;;  %v1289_v36 = vld [vmem:[#allocation8 + $0x1e0] sm:$0xff] }
 0x1bd   : > { %906 = vmatprep.mubr.f32.mxu0 %v715_v43  ;;  %v639_v6 = vmul.f32 %v1821_v58, %v2620_v52  ;;  %v638_v24 = vmul.f32 %v1821_v58, %v2617_v51  ;;  %v1236_v58 = vld [vmem:[#allocation8 + $0x38] sm:$0xff] }
 0x1be   : > { %v723_v9 = vadd.f32 %v2691_v10, %v680_v46  ;;  %v722_v52 = vadd.f32 %v2695_v11, %v679_v59  ;;  %v1288_v60 = vld [vmem:[#allocation8 + $0x1d8] sm:$0xff]  ;;  %v1286_v46 = vld [vmem:[#allocation8 + $0x1c8] sm:$0xff] }
 0x1bf   : > { %v682_v34 = vmul.f32 %v2684_v45, %v639_v6  ;;  %v681_v39 = vmul.f32 %v2687_v31, %v638_v24  ;;  %v1285_v6 = vld [vmem:[#allocation8 + $0x1c0] sm:$0xff]  ;;  %v1282_v59 = vld [vmem:[#allocation8 + $0x1a8] sm:$0xff] }
 0x1c0   : > { %907 = vmatmul.mubr.f32.gmra.mxu0 %v714_v57  ;;  %v1823_v37 = vpop.eup %1822  ;;  %v1281_v24 = vld [vmem:[#allocation8 + $0x1a0] sm:$0xff] }
 0x1c1   : > { %912 = vmatprep.mubr.f32.mxu0 %v717_v55  ;;  %v641_v41 = vmul.f32 %v1823_v37, %v2626_v54  ;;  %v1825_v38 = vpop.eup %1824  ;;  %v640_v49 = vmul.f32 %v1823_v37, %v2623_v13  ;;  %v725_v26 = vadd.f32 %v2691_v10, %v682_v34  ;;  %v724_v54 = vadd.f32 %v2695_v11, %v681_v39  ;;  %v1284_v37 = vld [vmem:[#allocation8 + $0x1b8] sm:$0xff]  ;;  %v1279_v34 = vld [vmem:[#allocation8 + $0x190] sm:$0xff] }
 0x1c2   : > { %v643_v12 = vmul.f32 %v1825_v38, %v2640_v0  ;;  %v642_v42 = vmul.f32 %v1825_v38, %v2637_v19  ;;  %v1277_v38 = vld [vmem:[#allocation8 + $0x180] sm:$0xff]  ;;  %v1275_v39 = vld [vmem:[#allocation8 + $0x170] sm:$0xff] }
 0x1c3   : > { %v684_v51 = vmul.f32 %v2684_v45, %v641_v41  ;;  %v683_v4 = vmul.f32 %v2687_v31, %v640_v49  ;;  %v1278_v41 = vld [vmem:[#allocation8 + $0x188] sm:$0xff] }
 0x1c4   : > { %913 = vmatmul.mubr.f32.gmra.mxu0 %v716_v18  ;;  %v1827_v25 = vpop.eup %1826  ;;  %v686_v13 = vmul.f32 %v2684_v45, %v643_v12  ;;  %v685_v0 = vmul.f32 %v2687_v31, %v642_v42  ;;  %v1274_v49 = vld [vmem:[#allocation8 + $0x168] sm:$0xff]  ;;  %v1267_v42 = vld [vmem:[#allocation8 + $0x130] sm:$0xff] }
 0x1c5   : > { %918 = vmatprep.mubr.f32.mxu0 %v719_v22  ;;  %v1829_v48 = vpop.eup %1828  ;;  %v727_v43 = vadd.f32 %v2691_v10, %v684_v51  ;;  %v645_v15 = vmul.f32 %v1827_v25, %v2646_v28  ;;  %v726_v16 = vadd.f32 %v2695_v11, %v683_v4  ;;  %v644_v56 = vmul.f32 %v1827_v25, %v2643_v1  ;;  %v1233_v22 = vld [vmem:[#allocation8 + $0x20] sm:$0xff]  ;;  %v1271_v51 = vld [vmem:[#allocation8 + $0x150] sm:$0xff]  ;;  %v1270_v12 = vld [vmem:[#allocation8 + $0x148] sm:$0xff] }
 0x1c6   : > { %v729_v62 = vadd.f32 %v2691_v10, %v686_v13  ;;  %v647_v19 = vmul.f32 %v1829_v48, %v2660_v47  ;;  %v728_v44 = vadd.f32 %v2695_v11, %v685_v0  ;;  %v646_v30 = vmul.f32 %v1829_v48, %v2657_v8  ;;  %v1273_v25 = vld [vmem:[#allocation8 + $0x160] sm:$0xff]  ;;  %v1268_v4 = vld [vmem:[#allocation8 + $0x138] sm:$0xff]  ;;  %v1266_v48 = vld [vmem:[#allocation8 + $0x128] sm:$0xff] }
 0x1c7   : > { %v688_v61 = vmul.f32 %v2684_v45, %v645_v15  ;;  %v687_v28 = vmul.f32 %v2687_v31, %v644_v56  ;;  %v1264_v13 = vld [vmem:[#allocation8 + $0x118] sm:$0xff]  ;;  %v1263_v15 = vld [vmem:[#allocation8 + $0x110] sm:$0xff]  ;;  %v1261_v0 = vld [vmem:[#allocation8 + $0x100] sm:$0xff] }
 0x1c8   : > { %919 = vmatmul.mubr.f32.gmra.mxu0 %v718_v17  ;;  %v690_v55 = vmul.f32 %v2684_v45, %v647_v19  ;;  %v689_v47 = vmul.f32 %v2687_v31, %v646_v30  ;;  %v1291_v17 = vld [vmem:[#allocation8 + $0x1f0] sm:$0xff]  ;;  %v800_v56 = vld [vmem:[%s3135_s4] sm:$0x3] }
 0x1c9   : > { %924 = vmatprep.mubr.f32.mxu0 %v721_v2  ;;  %v1831_v57 = vpop.eup %1830  ;;  %v731_v3 = vadd.f32 %v2691_v10, %v688_v61  ;;  %v730_v7 = vadd.f32 %v2695_v11, %v687_v28  ;;  %v1287_v2 = vld [vmem:[#allocation8 + $0x1d0] sm:$0xff]  ;;  %v2798_v61 = vrot.slane %v800_v56, %v2676_v27 }
 0x1ca   : > { %v649_v1 = vmul.f32 %v1831_v57, %v2666_v53  ;;  %v648_v32 = vmul.f32 %v1831_v57, %v2663_v50  ;;  %v733_v63 = vadd.f32 %v2691_v10, %v690_v55  ;;  %v732_v8 = vadd.f32 %v2695_v11, %v689_v47  ;;  %v1237_v50 = vld [vmem:[#allocation8 + $0x40] sm:$0xff] }
 0x1cb   : > { %1328 = vmatpush1.msra.mxu1 %v1237_v50 }
 0x1cc   : > { %925 = vmatmul.mubr.f32.gmra.mxu0 %v720_v35  ;;  %v692_v33 = vmul.f32 %v2684_v45, %v649_v1  ;;  %v691_v18 = vmul.f32 %v2687_v31, %v648_v32  ;;  %1329 = vmatprep.subr.mxu1 %v1236_v58  ;;  %v1235_v45 = vld [vmem:[#allocation8 + $0x30] sm:$0xff]  ;;  %v1232_v31 = vld [vmem:[#allocation8 + $0x18] sm:$0xff] }
 0x1cd   : > { %930 = vmatprep.mubr.f32.mxu0 %v723_v9  ;;  %1330 = vmatpush1.msra.mxu1 %v1235_v45  ;;  %v1283_v35 = vld [vmem:[#allocation8 + $0x1b0] sm:$0xff]  ;;  %v1280_v9 = vld [vmem:[#allocation8 + $0x198] sm:$0xff] }
 0x1ce   : > { %v735_v53 = vadd.f32 %v2691_v10, %v692_v33  ;;  %v734_v23 = vadd.f32 %v2695_v11, %v691_v18  ;;  %1331 = vmatprep.subr.mxu1 %v1234_v21  ;;  %v1231_v10 = vld [vmem:[#allocation8 + $0x10] sm:$0xff]  ;;  %v1229_v11 = vld [vmem:[#allocation8] sm:$0xff] }
 0x1cf   : > { %1332 = vmatpush1.msra.mxu1 %v1233_v22 }
 0x1d0   : > { %931 = vmatmul.mubr.f32.gmra.mxu0 %v722_v52  ;;  %1333 = vmatprep.subr.mxu1 %v1232_v31  ;;  %v1276_v52 = vld [vmem:[#allocation8 + $0x178] sm:$0xff] }
 0x1d1   : > { %936 = vmatprep.mubr.f32.mxu0 %v725_v26  ;;  %1334 = vmatpush1.msra.mxu1 %v1231_v10  ;;  %v1272_v26 = vld [vmem:[#allocation8 + $0x158] sm:$0xff] }
 0x1d2   : > { %1335 = vmatprep.subr.mxu1 %v1230_v29 }
 0x1d3   : > { %1336 = vmatpush1.msra.mxu1 %v1229_v11 }
 0x1d4   : > { %937 = vmatmul.mubr.f32.gmra.mxu0 %v724_v54  ;;  %1337 = vmatprep.subr.mxu1 %v1292_v40  ;;  %v1269_v54 = vld [vmem:[#allocation8 + $0x140] sm:$0xff] }
 0x1d5   : > { %942 = vmatprep.mubr.f32.mxu0 %v727_v43  ;;  %1338 = vmatpush2.msra.mxu1 %v1291_v17  ;;  %v1265_v43 = vld [vmem:[#allocation8 + $0x120] sm:$0xff] }
 0x1d6   : > { %1339 = vmatprep.subr.mxu1 %v1290_v5 }
 0x1d7   : > { %1340 = vmatpush2.msra.mxu1 %v1289_v36 }
 0x1d8   : > { %943 = vmatmul.mubr.f32.gmra.mxu0 %v726_v16  ;;  %1341 = vmatprep.subr.mxu1 %v1288_v60  ;;  %v1262_v16 = vld [vmem:[#allocation8 + $0x108] sm:$0xff] }
 0x1d9   : > { %948 = vmatprep.mubr.f32.mxu0 %v729_v62  ;;  %1342 = vmatpush2.msra.mxu1 %v1287_v2  ;;  %v2795_v62 = vrot.slane %v800_v56, %v2678_v14 }
 0x1da   : > { %1343 = vmatprep.subr.mxu1 %v1286_v46 }
 0x1db   : > { %1344 = vmatpush2.msra.mxu1 %v1285_v6 }
 0x1dc   : > { %949 = vmatmul.mubr.f32.gmra.mxu0 %v728_v44  ;;  %1345 = vmatprep.subr.mxu1 %v1284_v37 }
 0x1dd   : > { %954 = vmatprep.mubr.f32.mxu0 %v731_v3  ;;  %1346 = vmatpush2.msra.mxu1 %v1283_v35 }
 0x1de   : > { %1347 = vmatprep.subr.mxu1 %v1282_v59 }
 0x1df   : > { %1348 = vmatpush2.msra.mxu1 %v1281_v24 }
 0x1e0   : > { %955 = vmatmul.mubr.f32.gmra.mxu0 %v730_v7  ;;  %1349 = vmatprep.subr.mxu1 %v1280_v9 }
 0x1e1   : > { %960 = vmatprep.mubr.f32.mxu0 %v733_v63  ;;  %1350 = vmatpush2.msra.mxu1 %v1279_v34 }
 0x1e2   : > { %1351 = vmatprep.subr.mxu1 %v1278_v41 }
 0x1e3   : > { %1352 = vmatpush2.msra.mxu1 %v1277_v38 }
 0x1e4   : > { %961 = vmatmul.mubr.f32.gmra.mxu0 %v732_v8  ;;  %1353 = vmatprep.subr.mxu1 %v1276_v52 }
 0x1e5   : > { %966 = vmatprep.mubr.f32.mxu0 %v735_v53  ;;  %1354 = vmatpush2.msra.mxu1 %v1275_v39 }
 0x1e6   : > { %1355 = vmatprep.subr.mxu1 %v1274_v49 }
 0x1e7   : > { %1356 = vmatpush2.msra.mxu1 %v1273_v25 }
 0x1e8   : > { %967 = vmatmul.mubr.f32.gmra.mxu0 %v734_v23  ;;  %1357 = vmatprep.subr.mxu1 %v1272_v26 }
 0x1e9   : > { %1358 = vmatpush2.msra.mxu1 %v1271_v51 }
 0x1ea   : > { %1359 = vmatprep.subr.mxu1 %v1270_v12 }
 0x1eb   : > { %1360 = vmatpush2.msra.mxu1 %v1269_v54 }
 0x1ec   : > { %1361 = vmatprep.subr.mxu1 %v1268_v4 }
 0x1ed   : > { %1362 = vmatpush2.msra.mxu1 %v1267_v42 }
 0x1ee   : > { %1363 = vmatprep.subr.mxu1 %v1266_v48 }
 0x1ef   : > { %1364 = vmatpush2.msra.mxu1 %v1265_v43 }
 0x1f0   : > { %1365 = vmatprep.subr.mxu1 %v1264_v13 }
 0x1f1   : > { %1366 = vmatpush2.msra.mxu1 %v1263_v15 }
 0x1f2   : > { %1367 = vmatprep.subr.mxu1 %v1262_v16 }
 0x1f3   : > { %1368 = vmatpush2.msra.mxu1 %v1261_v0 }
 0x26c   : > { %v878_v19 = vpop.f32.mrf.mxu0 }
 0x26d   : > { %v2801_v57 = vadd.f32 %v878_v19, %v2795_v62 }
 0x26e   : > { %v880_v44 = vpop.f32.mrf.mxu0 }
 0x26f   : > { %v1675_v28 = vmul.f32 -1.702, %v2801_v57  ;;  %v2805_v30 = vadd.f32 %v880_v44, %v2798_v61 }
 0x270   : > { %v884_v3 = vpop.f32.mrf.mxu0 }
 0x271   : > { %v1037_v55 = vmul.f32 1.442695, %v1675_v28  ;;  %v1676_v1 = vmul.f32 -1.702, %v2805_v30  ;;  %v2809_v7 = vadd.f32 %v884_v3, %v2795_v62 }
 0x272   : > { %v886_v47 = vpop.f32.mrf.mxu0 }
 0x273   : > { %1832 = vpow2.f32 %v1037_v55  ;;  %v1039_v32 = vmul.f32 1.442695, %v1676_v1  ;;  %v1677_v63 = vmul.f32 -1.702, %v2809_v7  ;;  %v2813_v33 = vadd.f32 %v886_v47, %v2798_v61 }
 0x274   : > { %v890_v8 = vpop.f32.mrf.mxu0 }
 0x275   : > { %1834 = vpow2.f32 %v1039_v32  ;;  %v1041_v18 = vmul.f32 1.442695, %v1677_v63  ;;  %v1678_v53 = vmul.f32 -1.702, %v2813_v33  ;;  %v2817_v23 = vadd.f32 %v890_v8, %v2795_v62 }
 0x276   : > { %v892_v20 = vpop.f32.mrf.mxu0 }
 0x277   : > { %1836 = vpow2.f32 %v1041_v18  ;;  %v1043_v50 = vmul.f32 1.442695, %v1678_v53  ;;  %v1679_v58 = vmul.f32 -1.702, %v2817_v23  ;;  %v2821_v45 = vadd.f32 %v892_v20, %v2798_v61 }
 0x278   : > { %v896_v21 = vpop.f32.mrf.mxu0 }
 0x279   : > { %1838 = vpow2.f32 %v1043_v50  ;;  %v1045_v22 = vmul.f32 1.442695, %v1679_v58  ;;  %v1680_v31 = vmul.f32 -1.702, %v2821_v45  ;;  %v2825_v10 = vadd.f32 %v896_v21, %v2795_v62 }
 0x27a   : > { %v898_v29 = vpop.f32.mrf.mxu0 }
 0x27b   : > { %1840 = vpow2.f32 %v1045_v22  ;;  %v1047_v11 = vmul.f32 1.442695, %v1680_v31  ;;  %v1681_v40 = vmul.f32 -1.702, %v2825_v10  ;;  %v2829_v17 = vadd.f32 %v898_v29, %v2798_v61 }
 0x27c   : > { %v902_v5 = vpop.f32.mrf.mxu0 }
 0x27d   : > { %1842 = vpow2.f32 %v1047_v11  ;;  %v1049_v36 = vmul.f32 1.442695, %v1681_v40  ;;  %v1682_v60 = vmul.f32 -1.702, %v2829_v17  ;;  %v2833_v2 = vadd.f32 %v902_v5, %v2795_v62 }
 0x27e   : > { %v904_v46 = vpop.f32.mrf.mxu0 }
 0x27f   : > { %1844 = vpow2.f32 %v1049_v36  ;;  %v1051_v6 = vmul.f32 1.442695, %v1682_v60  ;;  %v1683_v37 = vmul.f32 -1.702, %v2833_v2  ;;  %v2837_v35 = vadd.f32 %v904_v46, %v2798_v61 }
 0x280   : > { %v1833_v59 = vpop.eup %1832  ;;  %v908_v24 = vpop.f32.mrf.mxu0 }
 0x281   : > { %v1101_v9 = vadd.f32 1.0, %v1833_v59  ;;  %1846 = vpow2.f32 %v1051_v6  ;;  %v1053_v34 = vmul.f32 1.442695, %v1683_v37  ;;  %v1684_v41 = vmul.f32 -1.702, %v2837_v35 }
 0x282   : > { %v1835_v38 = vpop.eup %1834  ;;  %v2841_v52 = vadd.f32 %v908_v24, %v2795_v62  ;;  %v910_v39 = vpop.f32.mrf.mxu0 }
 0x283   : > { %1848 = vrcp.f32 %v1101_v9  ;;  %v1102_v49 = vadd.f32 1.0, %v1835_v38  ;;  %v1055_v25 = vmul.f32 1.442695, %v1684_v41  ;;  %v2844_v26 = vadd.f32 %v910_v39, %v2798_v61 }
 0x284   : > { %v1837_v51 = vpop.eup %1836  ;;  %1850 = vpow2.f32 %v1053_v34  ;;  %v1685_v12 = vmul.f32 -1.702, %v2841_v52  ;;  %v914_v54 = vpop.f32.mrf.mxu0 }
 0x285   : > { %1852 = vrcp.f32 %v1102_v49  ;;  %v1103_v4 = vadd.f32 1.0, %v1837_v51  ;;  %v1686_v42 = vmul.f32 -1.702, %v2844_v26  ;;  %v2849_v48 = vadd.f32 %v914_v54, %v2795_v62 }
 0x286   : > { %v1839_v43 = vpop.eup %1838  ;;  %1854 = vpow2.f32 %v1055_v25  ;;  %v1057_v13 = vmul.f32 1.442695, %v1685_v12  ;;  %v916_v15 = vpop.f32.mrf.mxu0 }
 0x287   : > { %1856 = vrcp.f32 %v1103_v4  ;;  %v1104_v16 = vadd.f32 1.0, %v1839_v43  ;;  %v1059_v0 = vmul.f32 1.442695, %v1686_v42  ;;  %v1687_v56 = vmul.f32 -1.702, %v2849_v48 }
 0x288   : > { %v1841_v19 = vpop.eup %1840  ;;  %1858 = vpow2.f32 %v1057_v13  ;;  %v2853_v44 = vadd.f32 %v916_v15, %v2798_v61  ;;  %v920_v28 = vpop.f32.mrf.mxu0 }
 0x289   : > { %1860 = vrcp.f32 %v1104_v16  ;;  %v1105_v3 = vadd.f32 1.0, %v1841_v19  ;;  %v1061_v55 = vmul.f32 1.442695, %v1687_v56  ;;  %v2856_v1 = vadd.f32 %v920_v28, %v2795_v62 }
 0x28a   : > { %v1843_v47 = vpop.eup %1842  ;;  %1862 = vpow2.f32 %v1059_v0  ;;  %v1688_v32 = vmul.f32 -1.702, %v2853_v44  ;;  %v922_v63 = vpop.f32.mrf.mxu0 }
 0x28b   : > { %1864 = vrcp.f32 %v1105_v3  ;;  %v1106_v8 = vadd.f32 1.0, %v1843_v47  ;;  %v1689_v18 = vmul.f32 -1.702, %v2856_v1  ;;  %v2861_v53 = vadd.f32 %v922_v63, %v2798_v61 }
 0x28c   : > { %v1845_v20 = vpop.eup %1844  ;;  %1866 = vpow2.f32 %v1061_v55  ;;  %v1063_v50 = vmul.f32 1.442695, %v1688_v32  ;;  %v926_v58 = vpop.f32.mrf.mxu0 }
 0x28d   : > { %1868 = vrcp.f32 %v1106_v8  ;;  %v1107_v21 = vadd.f32 1.0, %v1845_v20  ;;  %v1065_v22 = vmul.f32 1.442695, %v1689_v18  ;;  %v1690_v31 = vmul.f32 -1.702, %v2861_v53 }
 0x28e   : > { %v1847_v29 = vpop.eup %1846  ;;  %1870 = vpow2.f32 %v1063_v50  ;;  %v2865_v11 = vadd.f32 %v926_v58, %v2795_v62  ;;  %v928_v40 = vpop.f32.mrf.mxu0 }
 0x28f   : > { %1872 = vrcp.f32 %v1107_v21  ;;  %v1108_v5 = vadd.f32 1.0, %v1847_v29  ;;  %v1067_v36 = vmul.f32 1.442695, %v1690_v31  ;;  %v2868_v60 = vadd.f32 %v928_v40, %v2798_v61 }
 0x290   : > { %v1849_v46 = vpop.eup %1848  ;;  %1874 = vpow2.f32 %v1065_v22  ;;  %v1691_v6 = vmul.f32 -1.702, %v2865_v11  ;;  %v932_v37 = vpop.f32.mrf.mxu0 }
 0x291   : > { %v1851_v59 = vpop.eup %1850  ;;  %1876 = vrcp.f32 %v1108_v5  ;;  %v1692_v24 = vmul.f32 -1.702, %v2868_v60  ;;  %v2873_v9 = vadd.f32 %v932_v37, %v2795_v62  ;;  %v1197_v42 = vmul.f32 %v1849_v46, %v2801_v57 }
 0x292   : > { %v1853_v34 = vpop.eup %1852  ;;  %v1109_v41 = vadd.f32 1.0, %v1851_v59  ;;  %1878 = vpow2.f32 %v1067_v36  ;;  %v1069_v38 = vmul.f32 1.442695, %v1691_v6  ;;  %v934_v39 = vpop.f32.mrf.mxu0 }
 0x293   : > { %v1855_v49 = vpop.eup %1854  ;;  %v1071_v25 = vmul.f32 1.442695, %v1692_v24  ;;  %v1693_v51 = vmul.f32 -1.702, %v2873_v9  ;;  %v2877_v12 = vadd.f32 %v934_v39, %v2798_v61  ;;  %v1198_v54 = vmul.f32 %v1853_v34, %v2805_v30 }
 0x294   : > { %v1857_v4 = vpop.eup %1856  ;;  %1880 = vrcp.f32 %v1109_v41  ;;  %v1110_v43 = vadd.f32 1.0, %v1855_v49  ;;  %v938_v13 = vpop.f32.mrf.mxu0 }
 0x295   : > { %v1859_v15 = vpop.eup %1858  ;;  %1882 = vpow2.f32 %v1069_v38  ;;  %v1073_v16 = vmul.f32 1.442695, %v1693_v51  ;;  %v1694_v0 = vmul.f32 -1.702, %v2877_v12  ;;  %1369 = vmatprep.mubr.f32.mxu1 %v1198_v54  ;;  %v2883_v28 = vadd.f32 %v938_v13, %v2795_v62 }
 0x296   : > { %v1861_v56 = vpop.eup %1860  ;;  %1884 = vrcp.f32 %v1110_v43  ;;  %v1111_v19 = vadd.f32 1.0, %v1859_v15  ;;  %v940_v3 = vpop.f32.mrf.mxu0  ;;  %1370 = vmatmul.mubr.f32.vlgmr.msra.gmra.mxu1 %v1197_v42  ;;  %v1199_v63 = vmul.f32 %v1857_v4, %v2809_v7 }
 0x297   : > { %v1863_v30 = vpop.eup %1862  ;;  %v1200_v57 = vmul.f32 %v1861_v56, %v2813_v33  ;;  %1886 = vpow2.f32 %v1071_v25  ;;  %v1075_v55 = vmul.f32 1.442695, %v1694_v0  ;;  %v2887_v47 = vadd.f32 %v940_v3, %v2798_v61 }
 0x298   : > { %v1865_v32 = vpop.eup %1864  ;;  %1888 = vrcp.f32 %v1111_v19  ;;  %v1112_v8 = vadd.f32 1.0, %v1863_v30  ;;  %v1695_v18 = vmul.f32 -1.702, %v2883_v28  ;;  %v944_v20 = vpop.f32.mrf.mxu0 }
 0x299   : > { %v1867_v50 = vpop.eup %1866  ;;  %1890 = vpow2.f32 %v1073_v16  ;;  %v1696_v58 = vmul.f32 -1.702, %v2887_v47  ;;  %v2893_v21 = vadd.f32 %v944_v20, %v2795_v62  ;;  %1375 = vmatprep.mubr.f32.mxu1 %v1200_v57  ;;  %v1201_v6 = vmul.f32 %v1865_v32, %v2817_v23 }
 0x29a   : > { %v1869_v33 = vpop.eup %1868  ;;  %1892 = vrcp.f32 %v1112_v8  ;;  %v1113_v22 = vadd.f32 1.0, %v1867_v50  ;;  %v1077_v31 = vmul.f32 1.442695, %v1695_v18  ;;  %v946_v29 = vpop.f32.mrf.mxu0  ;;  %1376 = vmatmul.mubr.f32.gmra.mxu1 %v1199_v63 }
 0x29b   : > { %v1871_v7 = vpop.eup %1870  ;;  %v1202_v40 = vmul.f32 %v1869_v33, %v2821_v45  ;;  %1894 = vpow2.f32 %v1075_v55  ;;  %v1079_v5 = vmul.f32 1.442695, %v1696_v58  ;;  %v1697_v36 = vmul.f32 -1.702, %v2893_v21 }
 0x29c   : > { %v1873_v46 = vpop.eup %1872  ;;  %1896 = vrcp.f32 %v1113_v22  ;;  %v1114_v37 = vadd.f32 1.0, %v1871_v7  ;;  %v2899_v59 = vadd.f32 %v946_v29, %v2798_v61  ;;  %v950_v24 = vpop.f32.mrf.mxu0 }
 0x29d   : > { %v1875_v34 = vpop.eup %1874  ;;  %1898 = vpow2.f32 %v1077_v31  ;;  %v1081_v41 = vmul.f32 1.442695, %v1697_v36  ;;  %v2902_v38 = vadd.f32 %v950_v24, %v2795_v62  ;;  %1381 = vmatprep.mubr.f32.mxu1 %v1202_v40  ;;  %v1203_v42 = vmul.f32 %v1873_v46, %v2825_v10 }
 0x29e   : > { %v1877_v45 = vpop.eup %1876  ;;  %1900 = vrcp.f32 %v1114_v37  ;;  %v1115_v39 = vadd.f32 1.0, %v1875_v34  ;;  %v1698_v49 = vmul.f32 -1.702, %v2899_v59  ;;  %v952_v25 = vpop.f32.mrf.mxu0  ;;  %1382 = vmatmul.mubr.f32.gmra.mxu1 %v1201_v6 }
 0x29f   : > { %v1879_v23 = vpop.eup %1878  ;;  %v1204_v51 = vmul.f32 %v1877_v45, %v2829_v17  ;;  %1902 = vpow2.f32 %v1079_v5  ;;  %v1699_v54 = vmul.f32 -1.702, %v2902_v38  ;;  %v2908_v4 = vadd.f32 %v952_v25, %v2798_v61 }
 0x2a0   : > { %1904 = vrcp.f32 %v1115_v39  ;;  %v1116_v43 = vadd.f32 1.0, %v1879_v23  ;;  %v1083_v13 = vmul.f32 1.442695, %v1698_v49  ;;  %v956_v15 = vpop.f32.mrf.mxu0 }
 0x2a1   : > { %v1881_v16 = vpop.eup %1880  ;;  %1906 = vpow2.f32 %v1081_v41  ;;  %v1085_v0 = vmul.f32 1.442695, %v1699_v54  ;;  %v1700_v56 = vmul.f32 -1.702, %v2908_v4  ;;  %v2913_v19 = vadd.f32 %v956_v15, %v2795_v62  ;;  %1387 = vmatprep.mubr.f32.mxu1 %v1204_v51 }
 0x2a2   : > { %v1883_v17 = vpop.eup %1882  ;;  %1908 = vrcp.f32 %v1116_v43  ;;  %v958_v3 = vpop.f32.mrf.mxu0  ;;  %1388 = vmatmul.mubr.f32.gmra.mxu1 %v1203_v42  ;;  %v1205_v63 = vmul.f32 %v1881_v16, %v2833_v2 }
 0x2a3   : > { %v1885_v30 = vpop.eup %1884  ;;  %v1117_v57 = vadd.f32 1.0, %v1883_v17  ;;  %1910 = vpow2.f32 %v1083_v13  ;;  %v1087_v10 = vmul.f32 1.442695, %v1700_v56  ;;  %v1701_v55 = vmul.f32 -1.702, %v2913_v19 }
 0x2a4   : > { %v1887_v32 = vpop.eup %1886  ;;  %v1206_v8 = vmul.f32 %v1885_v30, %v2837_v35  ;;  %1912 = vpow2.f32 %v1085_v0  ;;  %v2919_v18 = vadd.f32 %v958_v3, %v2798_v61  ;;  %v962_v20 = vpop.f32.mrf.mxu0 }
 0x2a5   : > { %v1889_v50 = vpop.eup %1888  ;;  %1914 = vrcp.f32 %v1117_v57  ;;  %v1118_v58 = vadd.f32 1.0, %v1887_v32  ;;  %v1089_v33 = vmul.f32 1.442695, %v1701_v55  ;;  %v2922_v22 = vadd.f32 %v962_v20, %v2795_v62 }
 0x2a6   : > { %v1891_v31 = vpop.eup %1890  ;;  %1916 = vpow2.f32 %v1087_v10  ;;  %v1702_v29 = vmul.f32 -1.702, %v2919_v18  ;;  %1393 = vmatprep.mubr.f32.mxu1 %v1206_v8  ;;  %v964_v2 = vpop.f32.mrf.mxu0  ;;  %v1207_v46 = vmul.f32 %v1889_v50, %v2841_v52 }
 0x2a7   : > { %v1893_v7 = vpop.eup %1892  ;;  %1918 = vrcp.f32 %v1118_v58  ;;  %v1119_v35 = vadd.f32 1.0, %v1891_v31  ;;  %v1703_v40 = vmul.f32 -1.702, %v2922_v22  ;;  %v2927_v5 = vadd.f32 %v964_v2, %v2798_v61  ;;  %1394 = vmatmul.mubr.f32.gmra.mxu1 %v1205_v63 }
 0x2a8   : > { %v1895_v36 = vpop.eup %1894  ;;  %v1208_v6 = vmul.f32 %v1893_v7, %v2844_v26  ;;  %1920 = vpow2.f32 %v1089_v33  ;;  %v1091_v37 = vmul.f32 1.442695, %v1702_v29  ;;  %v968_v24 = vpop.f32.mrf.mxu0 }
 0x2a9   : > { %v1897_v34 = vpop.eup %1896  ;;  %1922 = vrcp.f32 %v1119_v35  ;;  %v1120_v41 = vadd.f32 1.0, %v1895_v36  ;;  %v1093_v45 = vmul.f32 1.442695, %v1703_v40  ;;  %v1704_v39 = vmul.f32 -1.702, %v2927_v5 }
 0x2aa   : > { %v1899_v49 = vpop.eup %1898  ;;  %1924 = vpow2.f32 %v1091_v37  ;;  %v2933_v25 = vadd.f32 %v968_v24, %v2795_v62  ;;  %1399 = vmatprep.mubr.f32.mxu1 %v1208_v6  ;;  %v970_v23 = vpop.f32.mrf.mxu0  ;;  %v1209_v62 = vmul.f32 %v1897_v34, %v2849_v48 }
 0x2ab   : > { %v1901_v51 = vpop.eup %1900  ;;  %1926 = vrcp.f32 %v1120_v41  ;;  %v1121_v52 = vadd.f32 1.0, %v1899_v49  ;;  %v1095_v26 = vmul.f32 1.442695, %v1704_v39  ;;  %v2936_v54 = vadd.f32 %v970_v23, %v2798_v61  ;;  %1400 = vmatmul.mubr.f32.gmra.mxu1 %v1207_v46 }
 0x2ac   : > { %v1903_v42 = vpop.eup %1902  ;;  %v1210_v43 = vmul.f32 %v1901_v51, %v2853_v44  ;;  %1928 = vpow2.f32 %v1093_v45  ;;  %v1705_v13 = vmul.f32 -1.702, %v2933_v25 }
 0x2ad   : > { %v1905_v15 = vpop.eup %1904  ;;  %1930 = vrcp.f32 %v1121_v52  ;;  %v1122_v16 = vadd.f32 1.0, %v1903_v42  ;;  %v1706_v0 = vmul.f32 -1.702, %v2936_v54 }
 0x2ae   : > { %v1907_v56 = vpop.eup %1906  ;;  %1932 = vpow2.f32 %v1095_v26  ;;  %v1097_v17 = vmul.f32 1.442695, %v1705_v13  ;;  %1405 = vmatprep.mubr.f32.mxu1 %v1210_v43  ;;  %v1211_v48 = vmul.f32 %v1905_v15, %v2856_v1 }
 0x2af   : > { %v1909_v61 = vpop.eup %1908  ;;  %1934 = vrcp.f32 %v1122_v16  ;;  %v1123_v3 = vadd.f32 1.0, %v1907_v56  ;;  %v1099_v30 = vmul.f32 1.442695, %v1706_v0  ;;  %1406 = vmatmul.mubr.f32.gmra.mxu1 %v1209_v62 }
 0x2b0   : > { %v1911_v44 = vpop.eup %1910  ;;  %v1212_v57 = vmul.f32 %v1909_v61, %v2861_v53  ;;  %1936 = vpow2.f32 %v1097_v17  ;;  %v1960_v61 = vld [vmem:[%s2374_s8] sm:$0xff] }
 0x2b1   : > { %v1913_v10 = vpop.eup %1912  ;;  %1938 = vrcp.f32 %v1123_v3  ;;  %v1124_v55 = vadd.f32 1.0, %v1911_v44 }
 0x2b2   : > { %v1915_v32 = vpop.eup %1914  ;;  %v1125_v63 = vadd.f32 1.0, %v1913_v10  ;;  %1940 = vpow2.f32 %v1099_v30  ;;  %1411 = vmatprep.mubr.f32.mxu1 %v1212_v57  ;;  %v1962_v10 = vld [vmem:[%s2374_s8 + $0x10] sm:$0xff] }
 0x2b3   : > { %v1917_v8 = vpop.eup %1916  ;;  %1942 = vrcp.f32 %v1124_v55  ;;  %1412 = vmatmul.mubr.f32.gmra.mxu1 %v1211_v48  ;;  %v1213_v31 = vmul.f32 %v1915_v32, %v2865_v11 }
 0x2b4   : > { %v1919_v20 = vpop.eup %1918  ;;  %v1126_v50 = vadd.f32 1.0, %v1917_v8  ;;  %1944 = vrcp.f32 %v1125_v63  ;;  %v1963_v63 = vld [vmem:[%s2374_s8 + $0x18] sm:$0xff] }
 0x2b5   : > { %v1921_v58 = vpop.eup %1920  ;;  %v1214_v33 = vmul.f32 %v1919_v20, %v2868_v60 }
 0x2b6   : > { %v1923_v53 = vpop.eup %1922  ;;  %1946 = vrcp.f32 %v1126_v50  ;;  %v1127_v1 = vadd.f32 1.0, %v1921_v58  ;;  %v1964_v58 = vld [vmem:[%s2374_s8 + $0x20] sm:$0xff] }
 0x2b7   : > { %v1925_v29 = vpop.eup %1924  ;;  %1417 = vmatprep.mubr.f32.mxu1 %v1214_v33  ;;  %v1215_v46 = vmul.f32 %v1923_v53, %v2873_v9 }
 0x2b8   : > { %v1927_v2 = vpop.eup %1926  ;;  %v1128_v7 = vadd.f32 1.0, %v1925_v29  ;;  %1418 = vmatmul.mubr.f32.gmra.mxu1 %v1213_v31  ;;  %1948 = vrcp.f32 %v1127_v1  ;;  %v1965_v1 = vld [vmem:[%s2374_s8 + $0x28] sm:$0xff] }
 0x2b9   : > { %v1929_v35 = vpop.eup %1928  ;;  %v1216_v40 = vmul.f32 %v1927_v2, %v2877_v12 }
 0x2ba   : > { %v1931_v36 = vpop.eup %1930  ;;  %1950 = vrcp.f32 %v1128_v7  ;;  %v1129_v60 = vadd.f32 1.0, %v1929_v35  ;;  %v1966_v35 = vld [vmem:[%s2374_s8 + $0x30] sm:$0xff] }
 0x2bb   : > { %v1933_v6 = vpop.eup %1932  ;;  %1423 = vmatprep.mubr.f32.mxu1 %v1216_v40  ;;  %v1217_v45 = vmul.f32 %v1931_v36, %v2883_v28 }
 0x2bc   : > { %v1935_v37 = vpop.eup %1934  ;;  %v1130_v11 = vadd.f32 1.0, %v1933_v6  ;;  %1424 = vmatmul.mubr.f32.gmra.mxu1 %v1215_v46  ;;  %1952 = vrcp.f32 %v1129_v60  ;;  %v1967_v46 = vld [vmem:[%s2374_s8 + $0x38] sm:$0xff] }
 0x2bd   : > { %v1937_v24 = vpop.eup %1936  ;;  %v1218_v34 = vmul.f32 %v1935_v37, %v2887_v47 }
 0x2be   : > { %v1939_v41 = vpop.eup %1938  ;;  %1954 = vrcp.f32 %v1130_v11  ;;  %v1131_v12 = vadd.f32 1.0, %v1937_v24  ;;  %v1968_v24 = vld [vmem:[%s2374_s8 + $0x40] sm:$0xff] }
 0x2bf   : > { %v1941_v39 = vpop.eup %1940  ;;  %1429 = vmatprep.mubr.f32.mxu1 %v1218_v34  ;;  %v1219_v52 = vmul.f32 %v1939_v41, %v2893_v21 }
 0x2c0   : > { %v1943_v49 = vpop.eup %1942  ;;  %v1132_v9 = vadd.f32 1.0, %v1941_v39  ;;  %1430 = vmatmul.mubr.f32.gmra.mxu1 %v1217_v45  ;;  %1956 = vrcp.f32 %v1131_v12  ;;  %v1969_v12 = vld [vmem:[%s2374_s8 + $0x48] sm:$0xff] }
 0x2c1   : > { %v1220_v23 = vmul.f32 %v1943_v49, %v2899_v59  ;;  %v1945_v51 = vpop.eup %1944 }
 0x2c2   : > { %1958 = vrcp.f32 %v1132_v9  ;;  %v1221_v42 = vmul.f32 %v1945_v51, %v2902_v38 }
 0x2c3   : > { %v1947_v26 = vpop.eup %1946  ;;  %1435 = vmatprep.mubr.f32.mxu1 %v1220_v23  ;;  %v1970_v23 = vld [vmem:[%s2374_s8 + $0x50] sm:$0xff] }
 0x2c4   : > { %v1222_v47 = vmul.f32 %v1947_v26, %v2908_v4  ;;  %1436 = vmatmul.mubr.f32.gmra.mxu1 %v1219_v52 }
 0x2c5   : > { %v1949_v28 = vpop.eup %1948 }
 0x2c6   : > { %1441 = vmatprep.mubr.f32.mxu1 %v1222_v47  ;;  %v1223_v59 = vmul.f32 %v1949_v28, %v2913_v19  ;;  %v1293_v19 = vld [vmem:[%s3137_s6] sm:$0x3]  ;;  %v1971_v47 = vld [vmem:[%s2374_s8 + $0x58] sm:$0xff] }
 0x2c7   : > { %v1951_v43 = vpop.eup %1950 }
 0x2c8   : > { %v1224_v13 = vmul.f32 %v1951_v43, %v2919_v18  ;;  %1442 = vmatmul.mubr.f32.gmra.mxu1 %v1221_v42 }
 0x2c9   : > { %v1953_v15 = vpop.eup %1952 }
 0x2ca   : > { %1447 = vmatprep.mubr.f32.mxu1 %v1224_v13  ;;  %v1225_v4 = vmul.f32 %v1953_v15, %v2922_v22  ;;  %v2967_v22 = vrot.slane %v1293_v19, %v2676_v27  ;;  %v1961_v27 = vld [vmem:[%s2374_s8 + $0x8] sm:$0xff]  ;;  %v1972_v13 = vld [vmem:[%s2374_s8 + $0x60] sm:$0xff] }
 0x2cb   : > { %v1955_v62 = vpop.eup %1954 }
 0x2cc   : > { %v1226_v21 = vmul.f32 %v1955_v62, %v2927_v5  ;;  %1448 = vmatmul.mubr.f32.gmra.mxu1 %v1223_v59  ;;  %v2964_v5 = vrot.slane %v1293_v19, %v2678_v14 }
 0x2cd   : > { %v1957_v16 = vpop.eup %1956 }
 0x2ce   : > { %1453 = vmatprep.mubr.f32.mxu1 %v1226_v21  ;;  %v1227_v18 = vmul.f32 %v1957_v16, %v2933_v25  ;;  %v1973_v21 = vld [vmem:[%s2374_s8 + $0x68] sm:$0xff] }
 0x2cf   : > { %v1959_v0 = vpop.eup %1958 }
 0x2d0   : > { %v1228_v38 = vmul.f32 %v1959_v0, %v2936_v54  ;;  %1454 = vmatmul.mubr.f32.gmra.mxu1 %v1225_v4 }
 0x2d2   : > { %1459 = vmatprep.mubr.f32.mxu1 %v1228_v38  ;;  %v1974_v38 = vld [vmem:[%s2374_s8 + $0x70] sm:$0xff] }
 0x2d4   : > { %1460 = vmatmul.mubr.f32.gmra.mxu1 %v1227_v18 }
 0x356   : > { %v1371_v56 = vpop.f32.mrf.mxu1 }
 0x357   : > { %v1372_v54 = vadd.f32 %v1371_v56, %v2964_v5  ;;  %v1975_v56 = vld [vmem:[%s2374_s8 + $0x78] sm:$0xff] }
 0x358   : > { %v1373_v17 = vpop.f32.mrf.mxu1 }
 0x359   : > { %v1466_v25 = vadd.f32 %v1960_v61, %v1372_v54  ;;  %v1374_v3 = vadd.f32 %v1373_v17, %v2967_v22 }
 0x35a   : > { %v1377_v30 = vpop.f32.mrf.mxu1 }
 0x35b   : > { %1498 = vst [vmem:[%s2974_s21] sm:$0xff] %v1466_v25  ;;  %v1467_v14 = vadd.f32 %v1961_v27, %v1374_v3  ;;  %v1378_v44 = vadd.f32 %v1377_v30, %v2964_v5  ;;  %v1976_v3 = vld [vmem:[%s2374_s8 + $0x80] sm:$0xff] }
 0x35c   : > { %v1379_v57 = vpop.f32.mrf.mxu1 }
 0x35d   : > { %1499 = vst [vmem:[%s2974_s21 + $0x8] sm:$0xff] %v1467_v14  ;;  %v1468_v48 = vadd.f32 %v1962_v10, %v1378_v44  ;;  %v1380_v55 = vadd.f32 %v1379_v57, %v2967_v22  ;;  %v1977_v44 = vld [vmem:[%s2374_s8 + $0x88] sm:$0xff] }
 0x35e   : > { %v1383_v32 = vpop.f32.mrf.mxu1 }
 0x35f   : > { %1500 = vst [vmem:[%s2974_s21 + $0x10] sm:$0xff] %v1468_v48  ;;  %v1469_v8 = vadd.f32 %v1963_v63, %v1380_v55  ;;  %v1384_v20 = vadd.f32 %v1383_v32, %v2964_v5  ;;  %v1978_v55 = vld [vmem:[%s2374_s8 + $0x90] sm:$0xff] }
 0x360   : > { %v1385_v50 = vpop.f32.mrf.mxu1 }
 0x361   : > { %1501 = vst [vmem:[%s2974_s21 + $0x18] sm:$0xff] %v1469_v8  ;;  %v1470_v33 = vadd.f32 %v1964_v58, %v1384_v20  ;;  %v1386_v53 = vadd.f32 %v1385_v50, %v2967_v22  ;;  %v1979_v20 = vld [vmem:[%s2374_s8 + $0x98] sm:$0xff] }
 0x362   : > { %v1389_v31 = vpop.f32.mrf.mxu1 }
 0x363   : > { %1502 = vst [vmem:[%s2974_s21 + $0x20] sm:$0xff] %v1470_v33  ;;  %v1471_v29 = vadd.f32 %v1965_v1, %v1386_v53  ;;  %v1390_v2 = vadd.f32 %v1389_v31, %v2964_v5  ;;  %v1980_v53 = vld [vmem:[%s2374_s8 + $0xa0] sm:$0xff] }
 0x364   : > { %v1391_v7 = vpop.f32.mrf.mxu1 }
 0x365   : > { %1503 = vst [vmem:[%s2974_s21 + $0x28] sm:$0xff] %v1471_v29  ;;  %v1472_v40 = vadd.f32 %v1966_v35, %v1390_v2  ;;  %v1392_v36 = vadd.f32 %v1391_v7, %v2967_v22  ;;  %v1981_v2 = vld [vmem:[%s2374_s8 + $0xa8] sm:$0xff] }
 0x367   : > { %1504 = vst [vmem:[%s2974_s21 + $0x30] sm:$0xff] %v1472_v40  ;;  %v1473_v60 = vadd.f32 %v1967_v46, %v1392_v36  ;;  %v1395_v6 = vpop.f32.mrf.mxu1  ;;  %v1982_v36 = vld [vmem:[%s2374_s8 + $0xb0] sm:$0xff] }
 0x368   : > { %v1396_v37 = vadd.f32 %v1395_v6, %v2964_v5 }
 0x369   : > { %1505 = vst [vmem:[%s2974_s21 + $0x38] sm:$0xff] %v1473_v60  ;;  %v1397_v11 = vpop.f32.mrf.mxu1 }
 0x36a   : > { %v1474_v34 = vadd.f32 %v1968_v24, %v1396_v37  ;;  %v1398_v41 = vadd.f32 %v1397_v11, %v2967_v22  ;;  %v1983_v37 = vld [vmem:[%s2374_s8 + $0xb8] sm:$0xff] }
 0x36b   : > { %v1401_v45 = vpop.f32.mrf.mxu1 }
 0x36c   : > { %1506 = vst [vmem:[%s2974_s21 + $0x40] sm:$0xff] %v1474_v34  ;;  %v1475_v39 = vadd.f32 %v1969_v12, %v1398_v41  ;;  %v1402_v49 = vadd.f32 %v1401_v45, %v2964_v5  ;;  %v1984_v41 = vld [vmem:[%s2374_s8 + $0xc0] sm:$0xff] }
 0x36d   : > { %v1403_v9 = vpop.f32.mrf.mxu1 }
 0x36e   : > { %1507 = vst [vmem:[%s2974_s21 + $0x48] sm:$0xff] %v1475_v39  ;;  %v1476_v51 = vadd.f32 %v1970_v23, %v1402_v49  ;;  %v1404_v52 = vadd.f32 %v1403_v9, %v2967_v22  ;;  %v1985_v49 = vld [vmem:[%s2374_s8 + $0xc8] sm:$0xff] }
 0x36f   : > { %v1407_v26 = vpop.f32.mrf.mxu1 }
 0x370   : > { %1508 = vst [vmem:[%s2974_s21 + $0x50] sm:$0xff] %v1476_v51  ;;  %v1477_v28 = vadd.f32 %v1971_v47, %v1404_v52  ;;  %v1408_v42 = vadd.f32 %v1407_v26, %v2964_v5  ;;  %v1986_v52 = vld [vmem:[%s2374_s8 + $0xd0] sm:$0xff] }
 0x371   : > { %v1409_v43 = vpop.f32.mrf.mxu1 }
 0x372   : > { %1509 = vst [vmem:[%s2974_s21 + $0x58] sm:$0xff] %v1477_v28  ;;  %v1478_v15 = vadd.f32 %v1972_v13, %v1408_v42  ;;  %v1410_v59 = vadd.f32 %v1409_v43, %v2967_v22  ;;  %v1987_v42 = vld [vmem:[%s2374_s8 + $0xd8] sm:$0xff] }
 0x373   : > { %v1413_v62 = vpop.f32.mrf.mxu1 }
 0x374   : > { %1510 = vst [vmem:[%s2974_s21 + $0x60] sm:$0xff] %v1478_v15  ;;  %v1479_v16 = vadd.f32 %v1973_v21, %v1410_v59  ;;  %v1414_v4 = vadd.f32 %v1413_v62, %v2964_v5  ;;  %v1988_v59 = vld [vmem:[%s2374_s8 + $0xe0] sm:$0xff] }
 0x375   : > { %v1415_v0 = vpop.f32.mrf.mxu1 }
 0x376   : > { %1511 = vst [vmem:[%s2974_s21 + $0x68] sm:$0xff] %v1479_v16  ;;  %v1480_v18 = vadd.f32 %v1974_v38, %v1414_v4  ;;  %v1416_v19 = vadd.f32 %v1415_v0, %v2967_v22  ;;  %v1989_v4 = vld [vmem:[%s2374_s8 + $0xe8] sm:$0xff] }
 0x378   : > { %1512 = vst [vmem:[%s2974_s21 + $0x70] sm:$0xff] %v1480_v18  ;;  %v1481_v54 = vadd.f32 %v1975_v56, %v1416_v19  ;;  %v1419_v17 = vpop.f32.mrf.mxu1  ;;  %v1990_v19 = vld [vmem:[%s2374_s8 + $0xf0] sm:$0xff] }
 0x379   : > { %v1420_v61 = vadd.f32 %v1419_v17, %v2964_v5  ;;  %v1991_v17 = vld [vmem:[%s2374_s8 + $0xf8] sm:$0xff] }
 0x37a   : > { %1513 = vst [vmem:[%s2974_s21 + $0x78] sm:$0xff] %v1481_v54  ;;  %v1421_v25 = vpop.f32.mrf.mxu1 }
 0x37b   : > { %v1482_v30 = vadd.f32 %v1976_v3, %v1420_v61  ;;  %v1422_v27 = vadd.f32 %v1421_v25, %v2967_v22 }
 0x37c   : > { %v1425_v14 = vpop.f32.mrf.mxu1 }
 0x37d   : > { %1514 = vst [vmem:[%s2974_s21 + $0x80] sm:$0xff] %v1482_v30  ;;  %v1483_v57 = vadd.f32 %v1977_v44, %v1422_v27  ;;  %v1426_v10 = vadd.f32 %v1425_v14, %v2964_v5 }
 0x37e   : > { %v1427_v48 = vpop.f32.mrf.mxu1 }
 0x37f   : > { %1515 = vst [vmem:[%s2974_s21 + $0x88] sm:$0xff] %v1483_v57  ;;  %v1484_v32 = vadd.f32 %v1978_v55, %v1426_v10  ;;  %v1428_v63 = vadd.f32 %v1427_v48, %v2967_v22 }
 0x380   : > { %v1431_v8 = vpop.f32.mrf.mxu1 }
 0x381   : > { %1516 = vst [vmem:[%s2974_s21 + $0x90] sm:$0xff] %v1484_v32  ;;  %v1485_v50 = vadd.f32 %v1979_v20, %v1428_v63  ;;  %v1432_v58 = vadd.f32 %v1431_v8, %v2964_v5 }
 0x382   : > { %v1433_v33 = vpop.f32.mrf.mxu1 }
 0x383   : > { %1517 = vst [vmem:[%s2974_s21 + $0x98] sm:$0xff] %v1485_v50  ;;  %v1486_v31 = vadd.f32 %v1980_v53, %v1432_v58  ;;  %v1434_v1 = vadd.f32 %v1433_v33, %v2967_v22 }
 0x384   : > { %v1437_v29 = vpop.f32.mrf.mxu1 }
 0x385   : > { %1518 = vst [vmem:[%s2974_s21 + $0xa0] sm:$0xff] %v1486_v31  ;;  %v1487_v7 = vadd.f32 %v1981_v2, %v1434_v1  ;;  %v1438_v35 = vadd.f32 %v1437_v29, %v2964_v5 }
 0x386   : > { %v1439_v40 = vpop.f32.mrf.mxu1 }
 0x387   : > { %1519 = vst [vmem:[%s2974_s21 + $0xa8] sm:$0xff] %v1487_v7  ;;  %v1488_v46 = vadd.f32 %v1982_v36, %v1438_v35  ;;  %v1440_v60 = vadd.f32 %v1439_v40, %v2967_v22 }
 0x388   : > { %v1443_v6 = vpop.f32.mrf.mxu1 }
 0x389   : > { %1520 = vst [vmem:[%s2974_s21 + $0xb0] sm:$0xff] %v1488_v46  ;;  %v1489_v11 = vadd.f32 %v1983_v37, %v1440_v60  ;;  %v1444_v24 = vadd.f32 %v1443_v6, %v2964_v5 }
 0x38a   : > { %v1445_v34 = vpop.f32.mrf.mxu1 }
 0x38b   : > { %1521 = vst [vmem:[%s2974_s21 + $0xb8] sm:$0xff] %v1489_v11  ;;  %v1490_v45 = vadd.f32 %v1984_v41, %v1444_v24  ;;  %v1446_v12 = vadd.f32 %v1445_v34, %v2967_v22 }
 0x38c   : > { %v1449_v39 = vpop.f32.mrf.mxu1 }
 0x38d   : > { %1522 = vst [vmem:[%s2974_s21 + $0xc0] sm:$0xff] %v1490_v45  ;;  %v1491_v9 = vadd.f32 %v1985_v49, %v1446_v12  ;;  %v1450_v23 = vadd.f32 %v1449_v39, %v2964_v5 }
 0x38e   : > { %v1451_v51 = vpop.f32.mrf.mxu1 }
 0x38f   : > { %1523 = vst [vmem:[%s2974_s21 + $0xc8] sm:$0xff] %v1491_v9  ;;  %v1492_v26 = vadd.f32 %v1986_v52, %v1450_v23  ;;  %v1452_v47 = vadd.f32 %v1451_v51, %v2967_v22 }
 0x390   : > { %v1455_v28 = vpop.f32.mrf.mxu1 }
 0x391   : > { %1524 = vst [vmem:[%s2974_s21 + $0xd0] sm:$0xff] %v1492_v26  ;;  %v1493_v43 = vadd.f32 %v1987_v42, %v1452_v47  ;;  %v1456_v13 = vadd.f32 %v1455_v28, %v2964_v5 }
 0x392   : > { %v1457_v15 = vpop.f32.mrf.mxu1 }
 0x393   : > { %1525 = vst [vmem:[%s2974_s21 + $0xd8] sm:$0xff] %v1493_v43  ;;  %v1494_v62 = vadd.f32 %v1988_v59, %v1456_v13  ;;  %v1458_v21 = vadd.f32 %v1457_v15, %v2967_v22 }
 0x394   : > { %v1461_v16 = vpop.f32.mrf.mxu1 }
 0x395   : > { %1526 = vst [vmem:[%s2974_s21 + $0xe0] sm:$0xff] %v1494_v62  ;;  %v1495_v0 = vadd.f32 %v1989_v4, %v1458_v21  ;;  %v1462_v38 = vadd.f32 %v1461_v16, %v2964_v5 }
 0x396   : > { %v1463_v18 = vpop.f32.mrf.mxu1 }
 0x397   : > { %1527 = vst [vmem:[%s2974_s21 + $0xe8] sm:$0xff] %v1495_v0  ;;  %v1496_v56 = vadd.f32 %v1990_v19, %v1462_v38  ;;  %v1464_v54 = vadd.f32 %v1463_v18, %v2967_v22  ;;  %1537 = sbr.rel (!%p3159_p5) target bundleno = 951 (0x3b7), region = 68 }
 0x399   : > { %1528 = vst [vmem:[%s2974_s21 + $0xf0] sm:$0xff] %v1496_v56  ;;  %v1497_v61 = vadd.f32 %v1991_v17, %v1464_v54 }
 0x39b   : > { %1529 = vst [vmem:[%s2974_s21 + $0xf8] sm:$0xff] %v1497_v61 }
 0x39c   : > { %s3168_s23 = smov (!%p1540_p13, %s1539_s23), 16 }
 0x39d   : > { %s3073_s1 = sshll.u32 %s3168_s23, 8 }
 0x39e   : > { %s1545_s3 = ssub.s32 4096, %s3073_s1 }
 0x39f   : > { %1546 = vsyncadd %s1531_s11, %s1545_s3  ;;  %p1711_p8 = scmp.ne.s32.totalorder %s3073_s1, 0  ;;  %s1723_s13 = sshll.u32 %s2242_s28, 12 }
 0x3a0   : > { %s3083_s8 = scalar_lea.hbm %s3138_s7, %s1723_s13  ;;  %s1552_s12 = sshll.u32 %s2974_s21, 4  ;;  %s3086_s12 = int_to_ptr.vmem [resolvable:$true] %s1552_s12 }
 0x3a1   : > { %s2096_s15 = scalar_lea.vmem %s3086_s12, %s3073_s1  ;;  %s2178_s20 = smov [#allocation10]  }
 0x3a2   : > { %p2097_p10 = scmp.ne.s32.totalorder %s3086_s12, %s2096_s15  ;;  %s2100_s9 = sshll.u32 %s2178_s20, 4  ;;  %s2101_s9 = int_to_ptr.vmem [resolvable:$false] %s2100_s9 }
 0x3a3   : > { %s2102_s28 = scalar_lea.vmem %s2101_s9, 8192  ;;  %p2103_p3 = scmp.lt.s32.totalorder %s3086_s12, %s2101_s9 }
 0x3a4   : > { %p2098_p2 = pnand %p2097_p10, %p1711_p8  ;;  %p2104_p7 = scmp.lt.s32.totalorder %s2102_s28, %s2096_s15 }
 0x3a6   : > { %p2099_p1 = pneg %p2098_p2  ;;  %p2105_p11 = por %p2104_p7, %p2103_p3 }
 0x3a8   : > { %p2106_p0 = pnand %p2105_p11, %p2099_p1 }
 0x3aa   : > { %2109 = shalt.err (!%p2106_p0)
}
 0x3ab   : > { %s2110_s29 = scalar_lea.hbm %s3083_s8, %s3073_s1  ;;  %s2114_s22 = scalar_lea.hbm %s3138_s7, 6400 }
 0x3ac   : > { %p2111_p4 = scmp.ne.s32.totalorder %s3083_s8, %s2110_s29  ;;  %p2115_p5 = scmp.lt.s32.totalorder %s3083_s8, %s3138_s7 }
 0x3ad   : > { %p2116_p13 = scmp.lt.s32.totalorder %s2114_s22, %s2110_s29 }
 0x3ae   : > { %p2112_p12 = pnand %p2111_p4, %p1711_p8 }
 0x3af   : > { %p2117_p10 = por %p2116_p13, %p2115_p5 }
 0x3b0   : > { %p2113_p6 = pneg %p2112_p12 }
 0x3b2   : > { %p2118_p2 = pnand %p2117_p10, %p2113_p6 }
 0x3b4   : > { %2121 = shalt.err (!%p2118_p2)
}
 0x3b5   : > { %s2179_s13 = smov 256   ;;  %s2180_s18 = smov 16  }
 0x3b6   : > { %1558 = dma.vmem_to_hbm [thread:$0]  (%p1711_p8), %s3086_s12, %s3073_s1, %s3083_s8, %s1531_s11, %s2179_s13, %s2179_s13, %s2180_s18  }
 0x3b7 PF: > { %s1567_s17 = sand.u32 1, %s2156_s24   ;;  %p3160_p1 = scmp.ne.s32.totalorder %s3147_s14, 0 }
 0x3b8   : > { %s1568_s15 = scalar_lea.sflag [#allocation4], %s1567_s17 }
 0x3b9   : > { %p1749_p3 = pnand %p1659_p9, %p3160_p1 }
 0x3bb   : > { %p1750_p7 = pneg %p1749_p3 }
 0x3bd   : > { %2151 = dma.done.wait (%p1750_p7), %s1568_s15, 4096  }
 0x3be   : > { %2153 = vsyncadd (%p1750_p7), %s1568_s15, 4294963200  ;;  %p22_p11 = scmp.ge.s32.totalorder %s2246_s30, 4   ;;  %s3161_s24 = smov %s2160_s25 }
 0x3bf   : > { %s3162_s25 = smov %s2164_s26  ;;  %s3163_s26 = smov %s2258_s10 }
 0x3c0   : > { %s3164_s27 = smov %s2246_s30  ;;  %24 = sbr.rel (!%p22_p11) target bundleno = 10 (0xa), region = 105 }
 0x3c5   :  { %1573 = vsyncpa [#allocation3], 1 }
 0x3c6   :  { %1575 = vsyncpa [#allocation3 + $0x1], 1 }
 0x3c7   :  { %1576 = vsyncpa [#allocation6], 1 }
 0x3c8   :  { %1577 = vsyncpa [#allocation9], 1 }
 0x3c9   :  { %1578 = vsyncpa [#allocation4], 1 }
 0x3ca   :  { %1580 = vsyncpa [#allocation4 + $0x1], 1 }

</bundles_post_ra>
